<compile_context>
chip_gen: v7x
topology: tpu7x:2x2x1
jax: 0.10.0
libtpu: 0.0.40
codegen_flags: <defaults>
</compile_context>

<pallas_src>
import functools

import jax
import jax.numpy as jnp
from jax.experimental import pallas as pl
from jax.experimental.pallas import tpu as pltpu

LANE = 128
VMEM_LIMIT = 32 * 1024 * 1024  # <= v7x scoped headroom; working sets here are tiny


def _round_up(x, m):
    return (x + m - 1) // m * m


def _cparams():
    return pltpu.CompilerParams(
        dimension_semantics=("parallel",),
        vmem_limit_bytes=VMEM_LIMIT,
    )


# ----------------------------------------------------------------------------
# Kernel 1: stage-1 3x3 stride-1 pad-1 conv + folded BN + ReLU
# ----------------------------------------------------------------------------
def _stage1_kernel(x_ref, w_ref, scale_ref, shift_ref, o_ref, xbuf_ref, *, hs, ws):
    cin = x_ref.shape[-1]
    cout = o_ref.shape[-1]
    m = hs * ws
    # Zero halo + interior every step (scratch persists across grid steps / cores).
    xbuf_ref[...] = jnp.zeros_like(xbuf_ref)
    xbuf_ref[1:1 + hs, 1:1 + ws, :] = x_ref[...].astype(jnp.float32)
    acc = jnp.zeros((m, cout), jnp.float32)
    for t in range(9):
        ki, kj = t // 3, t % 3
        tap = xbuf_ref[ki:ki + hs, kj:kj + ws, :].reshape(m, cin).astype(jnp.bfloat16)
        acc = acc + jnp.dot(tap, w_ref[t], preferred_element_type=jnp.float32)
    y = jnp.maximum(acc * scale_ref[...] + shift_ref[...], 0.0)
    o_ref[...] = y.reshape(hs, ws, cout).astype(o_ref.dtype)


def stage1_conv(x, p):
    """x: (N, H, W, Cin_p) bf16.  3x3 s1 p1 conv + folded BN + ReLU."""
    N, H, W, Cin_p = x.shape
    Cout_p = p["w"].shape[-1]
    wp8 = _round_up(W + 2, 8)
    kernel = functools.partial(_stage1_kernel, hs=H, ws=W)
    return pl.pallas_call(
        kernel,
        out_shape=jax.ShapeDtypeStruct((N, H, W, Cout_p), jnp.bfloat16),
        grid=(N,),
        in_specs=[
            pl.BlockSpec((None, H, W, Cin_p), lambda n: (n, 0, 0, 0)),
            pl.BlockSpec(p["w"].shape, lambda n: (0, 0, 0)),
            pl.BlockSpec(p["scale"].shape, lambda n: (0, 0)),
            pl.BlockSpec(p["shift"].shape, lambda n: (0, 0)),
        ],
        out_specs=pl.BlockSpec((None, H, W, Cout_p), lambda n: (n, 0, 0, 0)),
        scratch_shapes=[pltpu.VMEM((H + 2, wp8, Cin_p), jnp.float32)],
        compiler_params=_cparams(),
    )(x, p["w"], p["scale"], p["shift"])


# ----------------------------------------------------------------------------
# Kernel 2: fused residual block
#   optional fused input 2x2 maxpool / stride-2 subsample
#   -> 1x1 conv + BN + ReLU (kept in VMEM)
#   -> 3x3 conv (9-tap MXU reduction over a zero-halo VMEM scratch) + BN + ReLU
#   -> add shortcut (1x1 conv + BN) or identity residual -> ReLU
# ----------------------------------------------------------------------------
def _block_kernel(*refs, hs, ws, cp, has_sc, input_mode):
    i = 2 if input_mode == "pool" else 1
    x_refs = refs[:i]
    wa_ref, sa_ref, ba_ref, wb_ref, sb_ref, bb_ref = refs[i:i + 6]
    i += 6
    if has_sc:
        wsc_ref, ssc_ref, bsc_ref = refs[i:i + 3]
        i += 3
    o_ref, tbuf_ref = refs[i], refs[i + 1]
    cmid = wa_ref.shape[-1]
    m = hs * ws

    # -- input: optional fused 2x2 maxpool / stride-2 subsample on load -------
    if input_mode == "pool":
        x0 = x_refs[0][...]            # even-H rows, W-parity packed in lanes
        x1 = x_refs[1][...]            # odd-H rows
        x = jnp.maximum(jnp.maximum(x0[:, :, :cp], x0[:, :, cp:]),
                        jnp.maximum(x1[:, :, :cp], x1[:, :, cp:]))
    elif input_mode == "stride2":
        x = x_refs[0][...][:, :, :cp]  # even-H rows (BlockSpec), even-W cols (lanes)
    else:
        x = x_refs[0][...]
    xf = x.reshape(m, cp)              # bf16

    # -- shortcut / residual path ---------------------------------------------
    if has_sc:
        res = (jnp.dot(xf, wsc_ref[...], preferred_element_type=jnp.float32)
               * ssc_ref[...] + bsc_ref[...])
    else:
        res = xf.astype(jnp.float32)

    # -- 1x1 reduce conv + folded BN + ReLU (never leaves VMEM) ---------------
    t = jnp.dot(xf, wa_ref[...], preferred_element_type=jnp.float32)
    t = jnp.maximum(t * sa_ref[...] + ba_ref[...], 0.0)

    # -- write t into a zero-halo scratch (halo = the 3x3 conv's zero padding) -
    tbuf_ref[...] = jnp.zeros_like(tbuf_ref)
    tbuf_ref[1:1 + hs, 1:1 + ws, :] = t.reshape(hs, ws, cmid)

    # -- 3x3 conv as a 9-tap MXU reduction ------------------------------------
    acc = jnp.zeros((m, cp), jnp.float32)
    for tap in range(9):
        ki, kj = tap // 3, tap % 3
        a = tbuf_ref[ki:ki + hs, kj:kj + ws, :].reshape(m, cmid).astype(jnp.bfloat16)
        acc = acc + jnp.dot(a, wb_ref[tap], preferred_element_type=jnp.float32)

    # -- fused epilogue: BN affine, block ReLU, residual add, outer ReLU ------
    y = jnp.maximum(acc * sb_ref[...] + bb_ref[...], 0.0)
    y = jnp.maximum(y + res, 0.0)
    o_ref[...] = y.reshape(hs, ws, cp).astype(o_ref.dtype)


def residual_block(x, pa, pb, psc=None, input_mode="full"):
    """x: (N, H, W, Cp) bf16.  One fused pallas_call per residual block."""
    N, H, W, Cp = x.shape
    assert pa["w"].shape[1] == pb["w"].shape[1]
    if input_mode == "full":
        hs, ws = H, W
        x_args = [x]
        x_specs = [pl.BlockSpec((None, hs, ws, Cp), lambda n: (n, 0, 0, 0))]
    else:
        assert H % 2 == 0 and W % 2 == 0
        hs, ws = H // 2, W // 2
        xr = x.reshape(N, hs, 2, ws, 2 * Cp)   # free row-major reshape (no copy)

        def par_spec(parity):
            return pl.BlockSpec((None, hs, None, ws, 2 * Cp),
                                lambda n, p=parity: (n, 0, p, 0, 0))

        if input_mode == "pool":               # fused MaxPool2d(2) on load
            x_args = [xr, xr]
            x_specs = [par_spec(0), par_spec(1)]
        else:                                  # "stride2": even rows/cols only
            x_args = [xr]
            x_specs = [par_spec(0)]

    has_sc = psc is not None
    wp8 = _round_up(ws + 2, 8)                 # sublane-friendly halo width
    cmid = pa["w"].shape[1]

    args = x_args + [pa["w"], pa["scale"], pa["shift"],
                     pb["w"], pb["scale"], pb["shift"]]
    specs = x_specs + [
        pl.BlockSpec(pa["w"].shape, lambda n: (0, 0)),
        pl.BlockSpec(pa["scale"].shape, lambda n: (0, 0)),
        pl.BlockSpec(pa["shift"].shape, lambda n: (0, 0)),
        pl.BlockSpec(pb["w"].shape, lambda n: (0, 0, 0)),
        pl.BlockSpec(pb["scale"].shape, lambda n: (0, 0)),
        pl.BlockSpec(pb["shift"].shape, lambda n: (0, 0)),
    ]
    if has_sc:
        args += [psc["w"], psc["scale"], psc["shift"]]
        specs += [pl.BlockSpec(psc["w"].shape, lambda n: (0, 0)),
                  pl.BlockSpec(psc["scale"].shape, lambda n: (0, 0)),
                  pl.BlockSpec(psc["shift"].shape, lambda n: (0, 0))]

    kernel = functools.partial(_block_kernel, hs=hs, ws=ws, cp=Cp,
                               has_sc=has_sc, input_mode=input_mode)
    return pl.pallas_call(
        kernel,
        out_shape=jax.ShapeDtypeStruct((N, hs, ws, Cp), jnp.bfloat16),
        grid=(N,),
        in_specs=specs,
        out_specs=pl.BlockSpec((None, hs, ws, Cp), lambda n: (n, 0, 0, 0)),
        scratch_shapes=[pltpu.VMEM((hs + 2, wp8, cmid), jnp.float32)],
        compiler_params=_cparams(),
    )(*args)


# ----------------------------------------------------------------------------
# Parameters: synthetic PyTorch-layout init + one-time Pallas-friendly packing
# ----------------------------------------------------------------------------
def _init_conv_bn(key, cin, cout, k):
    ks = jax.random.split(key, 6)
    return dict(
        w=jax.random.normal(ks[0], (cout, cin, k, k), jnp.float32) * 0.1,
        b=jax.random.normal(ks[1], (cout,), jnp.float32) * 0.1,
        gamma=jax.random.uniform(ks[2], (cout,), jnp.float32, 0.5, 1.5),
        beta=jax.random.normal(ks[3], (cout,), jnp.float32) * 0.1,
        mean=jax.random.normal(ks[4], (cout,), jnp.float32) * 0.1,
        var=jax.random.uniform(ks[5], (cout,), jnp.float32, 0.5, 1.5),
    )


def init_params(key, in_channels, num_classes, oc, spatial):
    keys = jax.random.split(key, 12)
    params = {}
    params["stg1"] = _init_conv_bn(keys[0], in_channels, oc, 3)
    params["sc2"] = _init_conv_bn(keys[1], oc, oc * 2, 1)
    params["conv2_a"] = _init_conv_bn(keys[2], oc, oc // 2, 1)
    params["conv2_b"] = _init_conv_bn(keys[3], oc // 2, oc * 2, 3)
    params["ident2"] = dict(a=_init_conv_bn(keys[4], oc * 2, oc, 1),
                            b=_init_conv_bn(keys[5], oc, oc * 2, 3))
    params["sc3"] = _init_conv_bn(keys[6], oc * 2, oc * 4, 1)
    params["conv3_a"] = _init_conv_bn(keys[7], oc * 2, oc, 1)
    params["conv3_b"] = _init_conv_bn(keys[8], oc, oc * 4, 3)
    params["ident3"] = dict(a=_init_conv_bn(keys[9], oc * 4, oc * 2, 1),
                            b=_init_conv_bn(keys[10], oc * 2, oc * 4, 3))
    feat = spatial // 2 // 2 // 2          # maxpool(2), stage-3 stride 2, avgpool(2)
    in_features = oc * 4 * feat * feat     # LazyLinear resolves to this
    kw, kb = jax.random.split(keys[11])
    params["fc_w"] = jax.random.normal(kw, (num_classes, in_features), jnp.float32) * 0.05
    params["fc_b"] = jax.random.normal(kb, (num_classes,), jnp.float32) * 0.05
    return params


def _pack_conv_bn(p, pad_in, pad_out):
    """Fold conv bias + eval-BN into a per-channel affine; pad; bf16 weights."""
    w = p["w"]                                       # (O, I, kh, kw)
    O, I, kh, kw = w.shape
    wm = jnp.transpose(w, (2, 3, 1, 0)).reshape(kh * kw, I, O)
    wm = jnp.pad(wm, ((0, 0), (0, pad_in - I), (0, pad_out - O))).astype(jnp.bfloat16)
    if kh * kw == 1:
        wm = wm[0]                                   # (pad_in, pad_out)
    inv_std = 1.0 / jnp.sqrt(p["var"] + 1e-5)
    scale = p["gamma"] * inv_std
    shift = p["beta"] - p["mean"] * scale + p["b"] * scale
    scale = jnp.pad(scale, (0, pad_out - O)).reshape(1, pad_out).astype(jnp.float32)
    shift = jnp.pad(shift, (0, pad_out - O)).reshape(1, pad_out).astype(jnp.float32)
    return dict(w=wm, scale=scale, shift=shift)


def pack_params(params, oc):
    cp = LANE
    cin_p = _round_up(params["stg1"]["w"].shape[1], 8)   # input: small pad, not 128
    m2 = _round_up(max(oc // 2, 1), 8)                   # mid channels, real (rounded to 8)
    mi2 = _round_up(oc, 8)
    m3 = _round_up(oc, 8)
    mi3 = _round_up(oc * 2, 8)
    return {
        "stg1": _pack_conv_bn(params["stg1"], cin_p, cp),
        "sc2": _pack_conv_bn(params["sc2"], cp, cp),
        "conv2_a": _pack_conv_bn(params["conv2_a"], cp, m2),
        "conv2_b": _pack_conv_bn(params["conv2_b"], m2, cp),
        "ident2_a": _pack_conv_bn(params["ident2"]["a"], cp, mi2),
        "ident2_b": _pack_conv_bn(params["ident2"]["b"], mi2, cp),
        "sc3": _pack_conv_bn(params["sc3"], cp, cp),
        "conv3_a": _pack_conv_bn(params["conv3_a"], cp, m3),
        "conv3_b": _pack_conv_bn(params["conv3_b"], m3, cp),
        "ident3_a": _pack_conv_bn(params["ident3"]["a"], cp, mi3),
        "ident3_b": _pack_conv_bn(params["ident3"]["b"], mi3, cp),
        "fc_w": params["fc_w"],
        "fc_b": params["fc_b"],
    }


# ----------------------------------------------------------------------------
# ResNet forward
# ----------------------------------------------------------------------------
def resnet_forward(pp, x_nchw, *, oc, stage2_loop, stage3_loop):
    # Entry: NCHW -> NHWC, channel pad ONCE (to 8 lanes for the input), bf16 ONCE.
    x = jnp.transpose(x_nchw, (0, 2, 3, 1))
    cin_p = pp["stg1"]["w"].shape[1]
    x = jnp.pad(x, ((0, 0), (0, 0), (0, 0), (0, cin_p - x.shape[-1])))
    x = x.astype(jnp.bfloat16)

    # stage 1: conv3x3 + BN + ReLU (the MaxPool2d(2) is fused into stage-2's load)
    out = stage1_conv(x, pp["stg1"])

    # stage 2: relu(conv2(out) + convShortcut2(out)); maxpool fused on load
    out = residual_block(out, pp["conv2_a"], pp["conv2_b"], psc=pp["sc2"],
                         input_mode="pool")
    for _ in range(stage2_loop):
        out = residual_block(out, pp["ident2_a"], pp["ident2_b"])

    # stage 3: relu(conv3(out) + convShortcut3(out)); stride-2 fused on load
    out = residual_block(out, pp["conv3_a"], pp["conv3_b"], psc=pp["sc3"],
                         input_mode="stride2")
    for _ in range(stage3_loop):
        out = residual_block(out, pp["ident3_a"], pp["ident3_b"])

    # classifier: AvgPool2d(2) -> Dropout -> Flatten -> Dropout -> Linear
    # TODO(synk): Dropout layers are identity (eval-mode); training-mode RNG masking not implemented.
    N, Hf, Wf, _ = out.shape
    c_real = oc * 4
    feats = out[..., :c_real].astype(jnp.float32)
    feats = feats.reshape(N, Hf // 2, 2, Wf // 2, 2, c_real).mean(axis=(2, 4))
    flat = jnp.transpose(feats, (0, 3, 1, 2)).reshape(N, -1)   # PyTorch NCHW flatten order
    # Final Linear has M = batch = 2: plain jnp.dot (a Pallas call here is pure overhead).
    return flat @ pp["fc_w"].T + pp["fc_b"]


# ----------------------------------------------------------------------------
if __name__ == "__main__":
    key = jax.random.PRNGKey(0)
    kx, kp = jax.random.split(key)

    # ResNet(in_channels=3, num_classes=10, stage2_loop=1, stage3_loop=1,
    #        dropout1=0.1, dropout2=0.1, out_channels=8)
    in_channels, num_classes, out_channels = 3, 10, 8
    stage2_loop, stage3_loop = 1, 1
    N, H, W = 2, 16, 16

    x = jax.random.normal(kx, (N, in_channels, H, W), jnp.float32)
    params = init_params(kp, in_channels, num_classes, out_channels, H)
    packed = pack_params(params, out_channels)      # fold BN / pad / bf16-cast once

    fwd = jax.jit(functools.partial(resnet_forward, oc=out_channels,
                                    stage2_loop=stage2_loop,
                                    stage3_loop=stage3_loop))
    out = fwd(packed, x)
    jax.block_until_ready(out)
    assert out.shape == (N, num_classes), out.shape
    print("KERNEL_OK")
</pallas_src>

<mosaic_0001>
module attributes {stable_mosaic.version = 11 : i64} {
  func.func @_stage1_kernel(%arg0: i32, %arg1: memref<1x16x16x8xbf16, #tpu.memory_space<vmem>>, %arg2: memref<9x8x128xbf16, #tpu.memory_space<vmem>>, %arg3: memref<1x128xf32, #tpu.memory_space<vmem>>, %arg4: memref<1x128xf32, #tpu.memory_space<vmem>>, %arg5: memref<1x16x16x128xbf16, #tpu.memory_space<vmem>>, %arg6: memref<18x24x8xf32, #tpu.memory_space<vmem>>) attributes {dimension_semantics = [#tpu.dimension_semantics<parallel>], iteration_bounds = array<i64: 2>, scalar_prefetch = 0 : i64, scratch_operands = 1 : i64, tpu.core_type = #tpu.core_type<tc>, window_params = [{transform_indices = @transform_0, window_bounds = array<i64: 1, 16, 16, 8>}, {pipeline_mode = #tpu.pipeline_mode<synchronous>, transform_indices = @transform_1, window_bounds = array<i64: 9, 8, 128>}, {pipeline_mode = #tpu.pipeline_mode<synchronous>, transform_indices = @transform_2, window_bounds = array<i64: 1, 128>}, {pipeline_mode = #tpu.pipeline_mode<synchronous>, transform_indices = @transform_3, window_bounds = array<i64: 1, 128>}, {transform_indices = @transform_4, window_bounds = array<i64: 1, 16, 16, 128>}]} {
    %cst = arith.constant 0.000000e+00 : f32
    %0 = vector.broadcast %cst : f32 to vector<18x24x8xf32>
    %c0 = arith.constant 0 : index
    %c0_0 = arith.constant 0 : index
    %c0_1 = arith.constant 0 : index
    %1 = vector.load %arg6[%c0, %c0_0, %c0_1] : memref<18x24x8xf32, #tpu.memory_space<vmem>>, vector<18x24x8xf32>
    tpu.vector_store %arg6[%c0, %c0_0, %c0_1], %0 {strides = array<i32>} : memref<18x24x8xf32, #tpu.memory_space<vmem>>, vector<18x24x8xf32>,
    %c0_2 = arith.constant 0 : index
    %c0_3 = arith.constant 0 : index
    %c0_4 = arith.constant 0 : index
    %c0_5 = arith.constant 0 : index
    %2 = vector.load %arg1[%c0_2, %c0_3, %c0_4, %c0_5] : memref<1x16x16x8xbf16, #tpu.memory_space<vmem>>, vector<1x16x16x8xbf16>
    %3 = vector.shape_cast %2 : vector<1x16x16x8xbf16> to vector<16x16x8xbf16>
    %4 = arith.extf %3 : vector<16x16x8xbf16> to vector<16x16x8xf32>
    %c1 = arith.constant 1 : index
    %c1_6 = arith.constant 1 : index
    %c0_7 = arith.constant 0 : index
    %5 = vector.load %arg6[%c1, %c1_6, %c0_7] : memref<18x24x8xf32, #tpu.memory_space<vmem>>, vector<16x16x8xf32>
    tpu.vector_store %arg6[%c1, %c1_6, %c0_7], %4 {strides = array<i32>} : memref<18x24x8xf32, #tpu.memory_space<vmem>>, vector<16x16x8xf32>,
    %cst_8 = arith.constant 0.000000e+00 : f32
    %6 = vector.broadcast %cst_8 : f32 to vector<256x128xf32>
    %c0_9 = arith.constant 0 : index
    %c0_10 = arith.constant 0 : index
    %c0_11 = arith.constant 0 : index
    %7 = vector.load %arg6[%c0_9, %c0_10, %c0_11] : memref<18x24x8xf32, #tpu.memory_space<vmem>>, vector<16x16x8xf32>
    %8 = vector.shape_cast %7 : vector<16x16x8xf32> to vector<256x8xf32>
    %9 = arith.truncf %8 : vector<256x8xf32> to vector<256x8xbf16>
    %c0_12 = arith.constant 0 : index
    %c0_13 = arith.constant 0 : index
    %c0_14 = arith.constant 0 : index
    %10 = vector.load %arg2[%c0_12, %c0_13, %c0_14] : memref<9x8x128xbf16, #tpu.memory_space<vmem>>, vector<1x8x128xbf16>
    %11 = vector.shape_cast %10 : vector<1x8x128xbf16> to vector<8x128xbf16>
    %cst_15 = arith.constant dense<0.000000e+00> : vector<256x128xf32>
    %12 = tpu.matmul %9, %11, %cst_15 {dimension_numbers = #tpu.dot_dimension_numbers<[1], [0], [0], [1], [0, 0, 1, 1], [], []>} : vector<256x8xbf16>, vector<8x128xbf16>, vector<256x128xf32> -> vector<256x128xf32>
    %13 = arith.addf %6, %12 : vector<256x128xf32>
    %c0_16 = arith.constant 0 : index
    %c1_17 = arith.constant 1 : index
    %c0_18 = arith.constant 0 : index
    %14 = vector.load %arg6[%c0_16, %c1_17, %c0_18] : memref<18x24x8xf32, #tpu.memory_space<vmem>>, vector<16x16x8xf32>
    %15 = vector.shape_cast %14 : vector<16x16x8xf32> to vector<256x8xf32>
    %16 = arith.truncf %15 : vector<256x8xf32> to vector<256x8xbf16>
    %c1_19 = arith.constant 1 : index
    %c0_20 = arith.constant 0 : index
    %c0_21 = arith.constant 0 : index
    %17 = vector.load %arg2[%c1_19, %c0_20, %c0_21] : memref<9x8x128xbf16, #tpu.memory_space<vmem>>, vector<1x8x128xbf16>
    %18 = vector.shape_cast %17 : vector<1x8x128xbf16> to vector<8x128xbf16>
    %cst_22 = arith.constant dense<0.000000e+00> : vector<256x128xf32>
    %19 = tpu.matmul %16, %18, %cst_22 {dimension_numbers = #tpu.dot_dimension_numbers<[1], [0], [0], [1], [0, 0, 1, 1], [], []>} : vector<256x8xbf16>, vector<8x128xbf16>, vector<256x128xf32> -> vector<256x128xf32>
    %20 = arith.addf %13, %19 : vector<256x128xf32>
    %c0_23 = arith.constant 0 : index
    %c2 = arith.constant 2 : index
    %c0_24 = arith.constant 0 : index
    %21 = vector.load %arg6[%c0_23, %c2, %c0_24] : memref<18x24x8xf32, #tpu.memory_space<vmem>>, vector<16x16x8xf32>
    %22 = vector.shape_cast %21 : vector<16x16x8xf32> to vector<256x8xf32>
    %23 = arith.truncf %22 : vector<256x8xf32> to vector<256x8xbf16>
    %c2_25 = arith.constant 2 : index
    %c0_26 = arith.constant 0 : index
    %c0_27 = arith.constant 0 : index
    %24 = vector.load %arg2[%c2_25, %c0_26, %c0_27] : memref<9x8x128xbf16, #tpu.memory_space<vmem>>, vector<1x8x128xbf16>
    %25 = vector.shape_cast %24 : vector<1x8x128xbf16> to vector<8x128xbf16>
    %cst_28 = arith.constant dense<0.000000e+00> : vector<256x128xf32>
    %26 = tpu.matmul %23, %25, %cst_28 {dimension_numbers = #tpu.dot_dimension_numbers<[1], [0], [0], [1], [0, 0, 1, 1], [], []>} : vector<256x8xbf16>, vector<8x128xbf16>, vector<256x128xf32> -> vector<256x128xf32>
    %27 = arith.addf %20, %26 : vector<256x128xf32>
    %c1_29 = arith.constant 1 : index
    %c0_30 = arith.constant 0 : index
    %c0_31 = arith.constant 0 : index
    %28 = vector.load %arg6[%c1_29, %c0_30, %c0_31] : memref<18x24x8xf32, #tpu.memory_space<vmem>>, vector<16x16x8xf32>
    %29 = vector.shape_cast %28 : vector<16x16x8xf32> to vector<256x8xf32>
    %30 = arith.truncf %29 : vector<256x8xf32> to vector<256x8xbf16>
    %c3 = arith.constant 3 : index
    %c0_32 = arith.constant 0 : index
    %c0_33 = arith.constant 0 : index
    %31 = vector.load %arg2[%c3, %c0_32, %c0_33] : memref<9x8x128xbf16, #tpu.memory_space<vmem>>, vector<1x8x128xbf16>
    %32 = vector.shape_cast %31 : vector<1x8x128xbf16> to vector<8x128xbf16>
    %cst_34 = arith.constant dense<0.000000e+00> : vector<256x128xf32>
    %33 = tpu.matmul %30, %32, %cst_34 {dimension_numbers = #tpu.dot_dimension_numbers<[1], [0], [0], [1], [0, 0, 1, 1], [], []>} : vector<256x8xbf16>, vector<8x128xbf16>, vector<256x128xf32> -> vector<256x128xf32>
    %34 = arith.addf %27, %33 : vector<256x128xf32>
    %c1_35 = arith.constant 1 : index
    %c1_36 = arith.constant 1 : index
    %c0_37 = arith.constant 0 : index
    %35 = vector.load %arg6[%c1_35, %c1_36, %c0_37] : memref<18x24x8xf32, #tpu.memory_space<vmem>>, vector<16x16x8xf32>
    %36 = vector.shape_cast %35 : vector<16x16x8xf32> to vector<256x8xf32>
    %37 = arith.truncf %36 : vector<256x8xf32> to vector<256x8xbf16>
    %c4 = arith.constant 4 : index
    %c0_38 = arith.constant 0 : index
    %c0_39 = arith.constant 0 : index
    %38 = vector.load %arg2[%c4, %c0_38, %c0_39] : memref<9x8x128xbf16, #tpu.memory_space<vmem>>, vector<1x8x128xbf16>
    %39 = vector.shape_cast %38 : vector<1x8x128xbf16> to vector<8x128xbf16>
    %cst_40 = arith.constant dense<0.000000e+00> : vector<256x128xf32>
    %40 = tpu.matmul %37, %39, %cst_40 {dimension_numbers = #tpu.dot_dimension_numbers<[1], [0], [0], [1], [0, 0, 1, 1], [], []>} : vector<256x8xbf16>, vector<8x128xbf16>, vector<256x128xf32> -> vector<256x128xf32>
    %41 = arith.addf %34, %40 : vector<256x128xf32>
    %c1_41 = arith.constant 1 : index
    %c2_42 = arith.constant 2 : index
    %c0_43 = arith.constant 0 : index
    %42 = vector.load %arg6[%c1_41, %c2_42, %c0_43] : memref<18x24x8xf32, #tpu.memory_space<vmem>>, vector<16x16x8xf32>
    %43 = vector.shape_cast %42 : vector<16x16x8xf32> to vector<256x8xf32>
    %44 = arith.truncf %43 : vector<256x8xf32> to vector<256x8xbf16>
    %c5 = arith.constant 5 : index
    %c0_44 = arith.constant 0 : index
    %c0_45 = arith.constant 0 : index
    %45 = vector.load %arg2[%c5, %c0_44, %c0_45] : memref<9x8x128xbf16, #tpu.memory_space<vmem>>, vector<1x8x128xbf16>
    %46 = vector.shape_cast %45 : vector<1x8x128xbf16> to vector<8x128xbf16>
    %cst_46 = arith.constant dense<0.000000e+00> : vector<256x128xf32>
    %47 = tpu.matmul %44, %46, %cst_46 {dimension_numbers = #tpu.dot_dimension_numbers<[1], [0], [0], [1], [0, 0, 1, 1], [], []>} : vector<256x8xbf16>, vector<8x128xbf16>, vector<256x128xf32> -> vector<256x128xf32>
    %48 = arith.addf %41, %47 : vector<256x128xf32>
    %c2_47 = arith.constant 2 : index
    %c0_48 = arith.constant 0 : index
    %c0_49 = arith.constant 0 : index
    %49 = vector.load %arg6[%c2_47, %c0_48, %c0_49] : memref<18x24x8xf32, #tpu.memory_space<vmem>>, vector<16x16x8xf32>
    %50 = vector.shape_cast %49 : vector<16x16x8xf32> to vector<256x8xf32>
    %51 = arith.truncf %50 : vector<256x8xf32> to vector<256x8xbf16>
    %c6 = arith.constant 6 : index
    %c0_50 = arith.constant 0 : index
    %c0_51 = arith.constant 0 : index
    %52 = vector.load %arg2[%c6, %c0_50, %c0_51] : memref<9x8x128xbf16, #tpu.memory_space<vmem>>, vector<1x8x128xbf16>
    %53 = vector.shape_cast %52 : vector<1x8x128xbf16> to vector<8x128xbf16>
    %cst_52 = arith.constant dense<0.000000e+00> : vector<256x128xf32>
    %54 = tpu.matmul %51, %53, %cst_52 {dimension_numbers = #tpu.dot_dimension_numbers<[1], [0], [0], [1], [0, 0, 1, 1], [], []>} : vector<256x8xbf16>, vector<8x128xbf16>, vector<256x128xf32> -> vector<256x128xf32>
    %55 = arith.addf %48, %54 : vector<256x128xf32>
    %c2_53 = arith.constant 2 : index
    %c1_54 = arith.constant 1 : index
    %c0_55 = arith.constant 0 : index
    %56 = vector.load %arg6[%c2_53, %c1_54, %c0_55] : memref<18x24x8xf32, #tpu.memory_space<vmem>>, vector<16x16x8xf32>
    %57 = vector.shape_cast %56 : vector<16x16x8xf32> to vector<256x8xf32>
    %58 = arith.truncf %57 : vector<256x8xf32> to vector<256x8xbf16>
    %c7 = arith.constant 7 : index
    %c0_56 = arith.constant 0 : index
    %c0_57 = arith.constant 0 : index
    %59 = vector.load %arg2[%c7, %c0_56, %c0_57] : memref<9x8x128xbf16, #tpu.memory_space<vmem>>, vector<1x8x128xbf16>
    %60 = vector.shape_cast %59 : vector<1x8x128xbf16> to vector<8x128xbf16>
    %cst_58 = arith.constant dense<0.000000e+00> : vector<256x128xf32>
    %61 = tpu.matmul %58, %60, %cst_58 {dimension_numbers = #tpu.dot_dimension_numbers<[1], [0], [0], [1], [0, 0, 1, 1], [], []>} : vector<256x8xbf16>, vector<8x128xbf16>, vector<256x128xf32> -> vector<256x128xf32>
    %62 = arith.addf %55, %61 : vector<256x128xf32>
    %c2_59 = arith.constant 2 : index
    %c2_60 = arith.constant 2 : index
    %c0_61 = arith.constant 0 : index
    %63 = vector.load %arg6[%c2_59, %c2_60, %c0_61] : memref<18x24x8xf32, #tpu.memory_space<vmem>>, vector<16x16x8xf32>
    %64 = vector.shape_cast %63 : vector<16x16x8xf32> to vector<256x8xf32>
    %65 = arith.truncf %64 : vector<256x8xf32> to vector<256x8xbf16>
    %c8 = arith.constant 8 : index
    %c0_62 = arith.constant 0 : index
    %c0_63 = arith.constant 0 : index
    %66 = vector.load %arg2[%c8, %c0_62, %c0_63] : memref<9x8x128xbf16, #tpu.memory_space<vmem>>, vector<1x8x128xbf16>
    %67 = vector.shape_cast %66 : vector<1x8x128xbf16> to vector<8x128xbf16>
    %cst_64 = arith.constant dense<0.000000e+00> : vector<256x128xf32>
    %68 = tpu.matmul %65, %67, %cst_64 {dimension_numbers = #tpu.dot_dimension_numbers<[1], [0], [0], [1], [0, 0, 1, 1], [], []>} : vector<256x8xbf16>, vector<8x128xbf16>, vector<256x128xf32> -> vector<256x128xf32>
    %69 = arith.addf %62, %68 : vector<256x128xf32>
    %c0_65 = arith.constant 0 : index
    %c0_66 = arith.constant 0 : index
    %70 = vector.load %arg3[%c0_65, %c0_66] : memref<1x128xf32, #tpu.memory_space<vmem>>, vector<1x128xf32>
    %71 = vector.broadcast %70 : vector<1x128xf32> to vector<256x128xf32>
    %72 = arith.mulf %69, %71 : vector<256x128xf32>
    %c0_67 = arith.constant 0 : index
    %c0_68 = arith.constant 0 : index
    %73 = vector.load %arg4[%c0_67, %c0_68] : memref<1x128xf32, #tpu.memory_space<vmem>>, vector<1x128xf32>
    %74 = vector.broadcast %73 : vector<1x128xf32> to vector<256x128xf32>
    %75 = arith.addf %72, %74 : vector<256x128xf32>
    %cst_69 = arith.constant 0.000000e+00 : f32
    %76 = vector.broadcast %cst_69 : f32 to vector<256x128xf32>
    %77 = arith.maximumf %75, %76 : vector<256x128xf32>
    %78 = vector.shape_cast %77 : vector<256x128xf32> to vector<16x16x128xf32>
    %79 = arith.truncf %78 : vector<16x16x128xf32> to vector<16x16x128xbf16>
    %c0_70 = arith.constant 0 : index
    %c0_71 = arith.constant 0 : index
    %c0_72 = arith.constant 0 : index
    %c0_73 = arith.constant 0 : index
    %80 = vector.load %arg5[%c0_70, %c0_71, %c0_72, %c0_73] : memref<1x16x16x128xbf16, #tpu.memory_space<vmem>>, vector<1x16x16x128xbf16>
    %81 = vector.shape_cast %80 : vector<1x16x16x128xbf16> to vector<16x16x128xbf16>
    %82 = vector.shape_cast %79 : vector<16x16x128xbf16> to vector<1x16x16x128xbf16>
    tpu.vector_store %arg5[%c0_70, %c0_71, %c0_72, %c0_73], %82 {strides = array<i32>} : memref<1x16x16x128xbf16, #tpu.memory_space<vmem>>, vector<1x16x16x128xbf16>,
    return
  }
  func.func @transform_0(%arg0: i32) -> (i32, i32, i32, i32) {
    %c0_i32 = arith.constant 0 : i32
    %c0_i32_0 = arith.constant 0 : i32
    %c0_i32_1 = arith.constant 0 : i32
    %c0_i32_2 = arith.constant 0 : i32
    return %arg0, %c0_i32, %c0_i32_0, %c0_i32_1 : i32, i32, i32, i32
  }
  func.func @transform_1(%arg0: i32) -> (i32, i32, i32) {
    %c0_i32 = arith.constant 0 : i32
    %c0_i32_0 = arith.constant 0 : i32
    %c0_i32_1 = arith.constant 0 : i32
    %c0_i32_2 = arith.constant 0 : i32
    return %c0_i32, %c0_i32_0, %c0_i32_1 : i32, i32, i32
  }
  func.func @transform_2(%arg0: i32) -> (i32, i32) {
    %c0_i32 = arith.constant 0 : i32
    %c0_i32_0 = arith.constant 0 : i32
    %c0_i32_1 = arith.constant 0 : i32
    return %c0_i32, %c0_i32_0 : i32, i32
  }
  func.func @transform_3(%arg0: i32) -> (i32, i32) {
    %c0_i32 = arith.constant 0 : i32
    %c0_i32_0 = arith.constant 0 : i32
    %c0_i32_1 = arith.constant 0 : i32
    return %c0_i32, %c0_i32_0 : i32, i32
  }
  func.func @transform_4(%arg0: i32) -> (i32, i32, i32, i32) {
    %c0_i32 = arith.constant 0 : i32
    %c0_i32_0 = arith.constant 0 : i32
    %c0_i32_1 = arith.constant 0 : i32
    %c0_i32_2 = arith.constant 0 : i32
    return %arg0, %c0_i32, %c0_i32_0, %c0_i32_1 : i32, i32, i32, i32
  }
}

module attributes {stable_mosaic.version = 11 : i64} {
  func.func @_block_kernel(%arg0: i32, %arg1: memref<1x8x1x8x256xbf16, #tpu.memory_space<vmem>>, %arg2: memref<1x8x1x8x256xbf16, #tpu.memory_space<vmem>>, %arg3: memref<128x8xbf16, #tpu.memory_space<vmem>>, %arg4: memref<1x8xf32, #tpu.memory_space<vmem>>, %arg5: memref<1x8xf32, #tpu.memory_space<vmem>>, %arg6: memref<9x8x128xbf16, #tpu.memory_space<vmem>>, %arg7: memref<1x128xf32, #tpu.memory_space<vmem>>, %arg8: memref<1x128xf32, #tpu.memory_space<vmem>>, %arg9: memref<128x128xbf16, #tpu.memory_space<vmem>>, %arg10: memref<1x128xf32, #tpu.memory_space<vmem>>, %arg11: memref<1x128xf32, #tpu.memory_space<vmem>>, %arg12: memref<1x8x8x128xbf16, #tpu.memory_space<vmem>>, %arg13: memref<10x16x8xf32, #tpu.memory_space<vmem>>) attributes {dimension_semantics = [#tpu.dimension_semantics<parallel>], iteration_bounds = array<i64: 2>, scalar_prefetch = 0 : i64, scratch_operands = 1 : i64, tpu.core_type = #tpu.core_type<tc>, window_params = [{transform_indices = @transform_0, window_bounds = array<i64: 1, 8, 1, 8, 256>}, {transform_indices = @transform_1, window_bounds = array<i64: 1, 8, 1, 8, 256>}, {pipeline_mode = #tpu.pipeline_mode<synchronous>, transform_indices = @transform_2, window_bounds = array<i64: 128, 8>}, {pipeline_mode = #tpu.pipeline_mode<synchronous>, transform_indices = @transform_3, window_bounds = array<i64: 1, 8>}, {pipeline_mode = #tpu.pipeline_mode<synchronous>, transform_indices = @transform_4, window_bounds = array<i64: 1, 8>}, {pipeline_mode = #tpu.pipeline_mode<synchronous>, transform_indices = @transform_5, window_bounds = array<i64: 9, 8, 128>}, {pipeline_mode = #tpu.pipeline_mode<synchronous>, transform_indices = @transform_6, window_bounds = array<i64: 1, 128>}, {pipeline_mode = #tpu.pipeline_mode<synchronous>, transform_indices = @transform_7, window_bounds = array<i64: 1, 128>}, {pipeline_mode = #tpu.pipeline_mode<synchronous>, transform_indices = @transform_8, window_bounds = array<i64: 128, 128>}, {pipeline_mode = #tpu.pipeline_mode<synchronous>, transform_indices = @transform_9, window_bounds = array<i64: 1, 128>}, {pipeline_mode = #tpu.pipeline_mode<synchronous>, transform_indices = @transform_10, window_bounds = array<i64: 1, 128>}, {transform_indices = @transform_11, window_bounds = array<i64: 1, 8, 8, 128>}]} {
    %c0 = arith.constant 0 : index
    %c0_0 = arith.constant 0 : index
    %c0_1 = arith.constant 0 : index
    %c0_2 = arith.constant 0 : index
    %c0_3 = arith.constant 0 : index
    %0 = vector.load %arg1[%c0, %c0_0, %c0_1, %c0_2, %c0_3] : memref<1x8x1x8x256xbf16, #tpu.memory_space<vmem>>, vector<1x8x1x8x256xbf16>
    %1 = vector.shape_cast %0 : vector<1x8x1x8x256xbf16> to vector<8x8x256xbf16>
    %c0_4 = arith.constant 0 : index
    %c0_5 = arith.constant 0 : index
    %c0_6 = arith.constant 0 : index
    %c0_7 = arith.constant 0 : index
    %c0_8 = arith.constant 0 : index
    %2 = vector.load %arg2[%c0_4, %c0_5, %c0_6, %c0_7, %c0_8] : memref<1x8x1x8x256xbf16, #tpu.memory_space<vmem>>, vector<1x8x1x8x256xbf16>
    %3 = vector.shape_cast %2 : vector<1x8x1x8x256xbf16> to vector<8x8x256xbf16>
    %4 = vector.extract_strided_slice %1 {offsets = [0, 0, 0], sizes = [8, 8, 128], strides = [1, 1, 1]} : vector<8x8x256xbf16> to vector<8x8x128xbf16>
    %5 = vector.extract_strided_slice %1 {offsets = [0, 0, 128], sizes = [8, 8, 128], strides = [1, 1, 1]} : vector<8x8x256xbf16> to vector<8x8x128xbf16>
    %6 = arith.maximumf %4, %5 : vector<8x8x128xbf16>
    %7 = vector.extract_strided_slice %3 {offsets = [0, 0, 0], sizes = [8, 8, 128], strides = [1, 1, 1]} : vector<8x8x256xbf16> to vector<8x8x128xbf16>
    %8 = vector.extract_strided_slice %3 {offsets = [0, 0, 128], sizes = [8, 8, 128], strides = [1, 1, 1]} : vector<8x8x256xbf16> to vector<8x8x128xbf16>
    %9 = arith.maximumf %7, %8 : vector<8x8x128xbf16>
    %10 = arith.maximumf %6, %9 : vector<8x8x128xbf16>
    %11 = vector.shape_cast %10 : vector<8x8x128xbf16> to vector<64x128xbf16>
    %c0_9 = arith.constant 0 : index
    %c0_10 = arith.constant 0 : index
    %12 = vector.load %arg9[%c0_9, %c0_10] : memref<128x128xbf16, #tpu.memory_space<vmem>>, vector<128x128xbf16>
    %cst = arith.constant dense<0.000000e+00> : vector<64x128xf32>
    %13 = tpu.matmul %11, %12, %cst {dimension_numbers = #tpu.dot_dimension_numbers<[1], [0], [0], [1], [0, 0, 1, 1], [], []>} : vector<64x128xbf16>, vector<128x128xbf16>, vector<64x128xf32> -> vector<64x128xf32>
    %c0_11 = arith.constant 0 : index
    %c0_12 = arith.constant 0 : index
    %14 = vector.load %arg10[%c0_11, %c0_12] : memref<1x128xf32, #tpu.memory_space<vmem>>, vector<1x128xf32>
    %15 = vector.broadcast %14 : vector<1x128xf32> to vector<64x128xf32>
    %16 = arith.mulf %13, %15 : vector<64x128xf32>
    %c0_13 = arith.constant 0 : index
    %c0_14 = arith.constant 0 : index
    %17 = vector.load %arg11[%c0_13, %c0_14] : memref<1x128xf32, #tpu.memory_space<vmem>>, vector<1x128xf32>
    %18 = vector.broadcast %17 : vector<1x128xf32> to vector<64x128xf32>
    %19 = arith.addf %16, %18 : vector<64x128xf32>
    %c0_15 = arith.constant 0 : index
    %c0_16 = arith.constant 0 : index
    %20 = vector.load %arg3[%c0_15, %c0_16] : memref<128x8xbf16, #tpu.memory_space<vmem>>, vector<128x8xbf16>
    %cst_17 = arith.constant dense<0.000000e+00> : vector<64x8xf32>
    %21 = tpu.matmul %11, %20, %cst_17 {dimension_numbers = #tpu.dot_dimension_numbers<[1], [0], [0], [1], [0, 0, 1, 1], [], []>} : vector<64x128xbf16>, vector<128x8xbf16>, vector<64x8xf32> -> vector<64x8xf32>
    %c0_18 = arith.constant 0 : index
    %c0_19 = arith.constant 0 : index
    %22 = vector.load %arg4[%c0_18, %c0_19] : memref<1x8xf32, #tpu.memory_space<vmem>>, vector<1x8xf32>
    %23 = vector.broadcast %22 : vector<1x8xf32> to vector<64x8xf32>
    %24 = arith.mulf %21, %23 : vector<64x8xf32>
    %c0_20 = arith.constant 0 : index
    %c0_21 = arith.constant 0 : index
    %25 = vector.load %arg5[%c0_20, %c0_21] : memref<1x8xf32, #tpu.memory_space<vmem>>, vector<1x8xf32>
    %26 = vector.broadcast %25 : vector<1x8xf32> to vector<64x8xf32>
    %27 = arith.addf %24, %26 : vector<64x8xf32>
    %cst_22 = arith.constant 0.000000e+00 : f32
    %28 = vector.broadcast %cst_22 : f32 to vector<64x8xf32>
    %29 = arith.maximumf %27, %28 : vector<64x8xf32>
    %cst_23 = arith.constant 0.000000e+00 : f32
    %30 = vector.broadcast %cst_23 : f32 to vector<10x16x8xf32>
    %c0_24 = arith.constant 0 : index
    %c0_25 = arith.constant 0 : index
    %c0_26 = arith.constant 0 : index
    %31 = vector.load %arg13[%c0_24, %c0_25, %c0_26] : memref<10x16x8xf32, #tpu.memory_space<vmem>>, vector<10x16x8xf32>
    tpu.vector_store %arg13[%c0_24, %c0_25, %c0_26], %30 {strides = array<i32>} : memref<10x16x8xf32, #tpu.memory_space<vmem>>, vector<10x16x8xf32>,
    %32 = vector.shape_cast %29 : vector<64x8xf32> to vector<8x8x8xf32>
    %c1 = arith.constant 1 : index
    %c1_27 = arith.constant 1 : index
    %c0_28 = arith.constant 0 : index
    %33 = vector.load %arg13[%c1, %c1_27, %c0_28] : memref<10x16x8xf32, #tpu.memory_space<vmem>>, vector<8x8x8xf32>
    tpu.vector_store %arg13[%c1, %c1_27, %c0_28], %32 {strides = array<i32>} : memref<10x16x8xf32, #tpu.memory_space<vmem>>, vector<8x8x8xf32>,
    %cst_29 = arith.constant 0.000000e+00 : f32
    %34 = vector.broadcast %cst_29 : f32 to vector<64x128xf32>
    %c0_30 = arith.constant 0 : index
    %c0_31 = arith.constant 0 : index
    %c0_32 = arith.constant 0 : index
    %35 = vector.load %arg13[%c0_30, %c0_31, %c0_32] : memref<10x16x8xf32, #tpu.memory_space<vmem>>, vector<8x8x8xf32>
    %36 = vector.shape_cast %35 : vector<8x8x8xf32> to vector<64x8xf32>
    %37 = arith.truncf %36 : vector<64x8xf32> to vector<64x8xbf16>
    %c0_33 = arith.constant 0 : index
    %c0_34 = arith.constant 0 : index
    %c0_35 = arith.constant 0 : index
    %38 = vector.load %arg6[%c0_33, %c0_34, %c0_35] : memref<9x8x128xbf16, #tpu.memory_space<vmem>>, vector<1x8x128xbf16>
    %39 = vector.shape_cast %38 : vector<1x8x128xbf16> to vector<8x128xbf16>
    %cst_36 = arith.constant dense<0.000000e+00> : vector<64x128xf32>
    %40 = tpu.matmul %37, %39, %cst_36 {dimension_numbers = #tpu.dot_dimension_numbers<[1], [0], [0], [1], [0, 0, 1, 1], [], []>} : vector<64x8xbf16>, vector<8x128xbf16>, vector<64x128xf32> -> vector<64x128xf32>
    %41 = arith.addf %34, %40 : vector<64x128xf32>
    %c0_37 = arith.constant 0 : index
    %c1_38 = arith.constant 1 : index
    %c0_39 = arith.constant 0 : index
    %42 = vector.load %arg13[%c0_37, %c1_38, %c0_39] : memref<10x16x8xf32, #tpu.memory_space<vmem>>, vector<8x8x8xf32>
    %43 = vector.shape_cast %42 : vector<8x8x8xf32> to vector<64x8xf32>
    %44 = arith.truncf %43 : vector<64x8xf32> to vector<64x8xbf16>
    %c1_40 = arith.constant 1 : index
    %c0_41 = arith.constant 0 : index
    %c0_42 = arith.constant 0 : index
    %45 = vector.load %arg6[%c1_40, %c0_41, %c0_42] : memref<9x8x128xbf16, #tpu.memory_space<vmem>>, vector<1x8x128xbf16>
    %46 = vector.shape_cast %45 : vector<1x8x128xbf16> to vector<8x128xbf16>
    %cst_43 = arith.constant dense<0.000000e+00> : vector<64x128xf32>
    %47 = tpu.matmul %44, %46, %cst_43 {dimension_numbers = #tpu.dot_dimension_numbers<[1], [0], [0], [1], [0, 0, 1, 1], [], []>} : vector<64x8xbf16>, vector<8x128xbf16>, vector<64x128xf32> -> vector<64x128xf32>
    %48 = arith.addf %41, %47 : vector<64x128xf32>
    %c0_44 = arith.constant 0 : index
    %c2 = arith.constant 2 : index
    %c0_45 = arith.constant 0 : index
    %49 = vector.load %arg13[%c0_44, %c2, %c0_45] : memref<10x16x8xf32, #tpu.memory_space<vmem>>, vector<8x8x8xf32>
    %50 = vector.shape_cast %49 : vector<8x8x8xf32> to vector<64x8xf32>
    %51 = arith.truncf %50 : vector<64x8xf32> to vector<64x8xbf16>
    %c2_46 = arith.constant 2 : index
    %c0_47 = arith.constant 0 : index
    %c0_48 = arith.constant 0 : index
    %52 = vector.load %arg6[%c2_46, %c0_47, %c0_48] : memref<9x8x128xbf16, #tpu.memory_space<vmem>>, vector<1x8x128xbf16>
    %53 = vector.shape_cast %52 : vector<1x8x128xbf16> to vector<8x128xbf16>
    %cst_49 = arith.constant dense<0.000000e+00> : vector<64x128xf32>
    %54 = tpu.matmul %51, %53, %cst_49 {dimension_numbers = #tpu.dot_dimension_numbers<[1], [0], [0], [1], [0, 0, 1, 1], [], []>} : vector<64x8xbf16>, vector<8x128xbf16>, vector<64x128xf32> -> vector<64x128xf32>
    %55 = arith.addf %48, %54 : vector<64x128xf32>
    %c1_50 = arith.constant 1 : index
    %c0_51 = arith.constant 0 : index
    %c0_52 = arith.constant 0 : index
    %56 = vector.load %arg13[%c1_50, %c0_51, %c0_52] : memref<10x16x8xf32, #tpu.memory_space<vmem>>, vector<8x8x8xf32>
    %57 = vector.shape_cast %56 : vector<8x8x8xf32> to vector<64x8xf32>
    %58 = arith.truncf %57 : vector<64x8xf32> to vector<64x8xbf16>
    %c3 = arith.constant 3 : index
    %c0_53 = arith.constant 0 : index
    %c0_54 = arith.constant 0 : index
    %59 = vector.load %arg6[%c3, %c0_53, %c0_54] : memref<9x8x128xbf16, #tpu.memory_space<vmem>>, vector<1x8x128xbf16>
    %60 = vector.shape_cast %59 : vector<1x8x128xbf16> to vector<8x128xbf16>
    %cst_55 = arith.constant dense<0.000000e+00> : vector<64x128xf32>
    %61 = tpu.matmul %58, %60, %cst_55 {dimension_numbers = #tpu.dot_dimension_numbers<[1], [0], [0], [1], [0, 0, 1, 1], [], []>} : vector<64x8xbf16>, vector<8x128xbf16>, vector<64x128xf32> -> vector<64x128xf32>
    %62 = arith.addf %55, %61 : vector<64x128xf32>
    %c1_56 = arith.constant 1 : index
    %c1_57 = arith.constant 1 : index
    %c0_58 = arith.constant 0 : index
    %63 = vector.load %arg13[%c1_56, %c1_57, %c0_58] : memref<10x16x8xf32, #tpu.memory_space<vmem>>, vector<8x8x8xf32>
    %64 = vector.shape_cast %63 : vector<8x8x8xf32> to vector<64x8xf32>
    %65 = arith.truncf %64 : vector<64x8xf32> to vector<64x8xbf16>
    %c4 = arith.constant 4 : index
    %c0_59 = arith.constant 0 : index
    %c0_60 = arith.constant 0 : index
    %66 = vector.load %arg6[%c4, %c0_59, %c0_60] : memref<9x8x128xbf16, #tpu.memory_space<vmem>>, vector<1x8x128xbf16>
    %67 = vector.shape_cast %66 : vector<1x8x128xbf16> to vector<8x128xbf16>
    %cst_61 = arith.constant dense<0.000000e+00> : vector<64x128xf32>
    %68 = tpu.matmul %65, %67, %cst_61 {dimension_numbers = #tpu.dot_dimension_numbers<[1], [0], [0], [1], [0, 0, 1, 1], [], []>} : vector<64x8xbf16>, vector<8x128xbf16>, vector<64x128xf32> -> vector<64x128xf32>
    %69 = arith.addf %62, %68 : vector<64x128xf32>
    %c1_62 = arith.constant 1 : index
    %c2_63 = arith.constant 2 : index
    %c0_64 = arith.constant 0 : index
    %70 = vector.load %arg13[%c1_62, %c2_63, %c0_64] : memref<10x16x8xf32, #tpu.memory_space<vmem>>, vector<8x8x8xf32>
    %71 = vector.shape_cast %70 : vector<8x8x8xf32> to vector<64x8xf32>
    %72 = arith.truncf %71 : vector<64x8xf32> to vector<64x8xbf16>
    %c5 = arith.constant 5 : index
    %c0_65 = arith.constant 0 : index
    %c0_66 = arith.constant 0 : index
    %73 = vector.load %arg6[%c5, %c0_65, %c0_66] : memref<9x8x128xbf16, #tpu.memory_space<vmem>>, vector<1x8x128xbf16>
    %74 = vector.shape_cast %73 : vector<1x8x128xbf16> to vector<8x128xbf16>
    %cst_67 = arith.constant dense<0.000000e+00> : vector<64x128xf32>
    %75 = tpu.matmul %72, %74, %cst_67 {dimension_numbers = #tpu.dot_dimension_numbers<[1], [0], [0], [1], [0, 0, 1, 1], [], []>} : vector<64x8xbf16>, vector<8x128xbf16>, vector<64x128xf32> -> vector<64x128xf32>
    %76 = arith.addf %69, %75 : vector<64x128xf32>
    %c2_68 = arith.constant 2 : index
    %c0_69 = arith.constant 0 : index
    %c0_70 = arith.constant 0 : index
    %77 = vector.load %arg13[%c2_68, %c0_69, %c0_70] : memref<10x16x8xf32, #tpu.memory_space<vmem>>, vector<8x8x8xf32>
    %78 = vector.shape_cast %77 : vector<8x8x8xf32> to vector<64x8xf32>
    %79 = arith.truncf %78 : vector<64x8xf32> to vector<64x8xbf16>
    %c6 = arith.constant 6 : index
    %c0_71 = arith.constant 0 : index
    %c0_72 = arith.constant 0 : index
    %80 = vector.load %arg6[%c6, %c0_71, %c0_72] : memref<9x8x128xbf16, #tpu.memory_space<vmem>>, vector<1x8x128xbf16>
    %81 = vector.shape_cast %80 : vector<1x8x128xbf16> to vector<8x128xbf16>
    %cst_73 = arith.constant dense<0.000000e+00> : vector<64x128xf32>
    %82 = tpu.matmul %79, %81, %cst_73 {dimension_numbers = #tpu.dot_dimension_numbers<[1], [0], [0], [1], [0, 0, 1, 1], [], []>} : vector<64x8xbf16>, vector<8x128xbf16>, vector<64x128xf32> -> vector<64x128xf32>
    %83 = arith.addf %76, %82 : vector<64x128xf32>
    %c2_74 = arith.constant 2 : index
    %c1_75 = arith.constant 1 : index
    %c0_76 = arith.constant 0 : index
    %84 = vector.load %arg13[%c2_74, %c1_75, %c0_76] : memref<10x16x8xf32, #tpu.memory_space<vmem>>, vector<8x8x8xf32>
    %85 = vector.shape_cast %84 : vector<8x8x8xf32> to vector<64x8xf32>
    %86 = arith.truncf %85 : vector<64x8xf32> to vector<64x8xbf16>
    %c7 = arith.constant 7 : index
    %c0_77 = arith.constant 0 : index
    %c0_78 = arith.constant 0 : index
    %87 = vector.load %arg6[%c7, %c0_77, %c0_78] : memref<9x8x128xbf16, #tpu.memory_space<vmem>>, vector<1x8x128xbf16>
    %88 = vector.shape_cast %87 : vector<1x8x128xbf16> to vector<8x128xbf16>
    %cst_79 = arith.constant dense<0.000000e+00> : vector<64x128xf32>
    %89 = tpu.matmul %86, %88, %cst_79 {dimension_numbers = #tpu.dot_dimension_numbers<[1], [0], [0], [1], [0, 0, 1, 1], [], []>} : vector<64x8xbf16>, vector<8x128xbf16>, vector<64x128xf32> -> vector<64x128xf32>
    %90 = arith.addf %83, %89 : vector<64x128xf32>
    %c2_80 = arith.constant 2 : index
    %c2_81 = arith.constant 2 : index
    %c0_82 = arith.constant 0 : index
    %91 = vector.load %arg13[%c2_80, %c2_81, %c0_82] : memref<10x16x8xf32, #tpu.memory_space<vmem>>, vector<8x8x8xf32>
    %92 = vector.shape_cast %91 : vector<8x8x8xf32> to vector<64x8xf32>
    %93 = arith.truncf %92 : vector<64x8xf32> to vector<64x8xbf16>
    %c8 = arith.constant 8 : index
    %c0_83 = arith.constant 0 : index
    %c0_84 = arith.constant 0 : index
    %94 = vector.load %arg6[%c8, %c0_83, %c0_84] : memref<9x8x128xbf16, #tpu.memory_space<vmem>>, vector<1x8x128xbf16>
    %95 = vector.shape_cast %94 : vector<1x8x128xbf16> to vector<8x128xbf16>
    %cst_85 = arith.constant dense<0.000000e+00> : vector<64x128xf32>
    %96 = tpu.matmul %93, %95, %cst_85 {dimension_numbers = #tpu.dot_dimension_numbers<[1], [0], [0], [1], [0, 0, 1, 1], [], []>} : vector<64x8xbf16>, vector<8x128xbf16>, vector<64x128xf32> -> vector<64x128xf32>
    %97 = arith.addf %90, %96 : vector<64x128xf32>
    %c0_86 = arith.constant 0 : index
    %c0_87 = arith.constant 0 : index
    %98 = vector.load %arg7[%c0_86, %c0_87] : memref<1x128xf32, #tpu.memory_space<vmem>>, vector<1x128xf32>
    %99 = vector.broadcast %98 : vector<1x128xf32> to vector<64x128xf32>
    %100 = arith.mulf %97, %99 : vector<64x128xf32>
    %c0_88 = arith.constant 0 : index
    %c0_89 = arith.constant 0 : index
    %101 = vector.load %arg8[%c0_88, %c0_89] : memref<1x128xf32, #tpu.memory_space<vmem>>, vector<1x128xf32>
    %102 = vector.broadcast %101 : vector<1x128xf32> to vector<64x128xf32>
    %103 = arith.addf %100, %102 : vector<64x128xf32>
    %cst_90 = arith.constant 0.000000e+00 : f32
    %104 = vector.broadcast %cst_90 : f32 to vector<64x128xf32>
    %105 = arith.maximumf %103, %104 : vector<64x128xf32>
    %106 = arith.addf %105, %19 : vector<64x128xf32>
    %cst_91 = arith.constant 0.000000e+00 : f32
    %107 = vector.broadcast %cst_91 : f32 to vector<64x128xf32>
    %108 = arith.maximumf %106, %107 : vector<64x128xf32>
    %109 = vector.shape_cast %108 : vector<64x128xf32> to vector<8x8x128xf32>
    %110 = arith.truncf %109 : vector<8x8x128xf32> to vector<8x8x128xbf16>
    %c0_92 = arith.constant 0 : index
    %c0_93 = arith.constant 0 : index
    %c0_94 = arith.constant 0 : index
    %c0_95 = arith.constant 0 : index
    %111 = vector.load %arg12[%c0_92, %c0_93, %c0_94, %c0_95] : memref<1x8x8x128xbf16, #tpu.memory_space<vmem>>, vector<1x8x8x128xbf16>
    %112 = vector.shape_cast %111 : vector<1x8x8x128xbf16> to vector<8x8x128xbf16>
    %113 = vector.shape_cast %110 : vector<8x8x128xbf16> to vector<1x8x8x128xbf16>
    tpu.vector_store %arg12[%c0_92, %c0_93, %c0_94, %c0_95], %113 {strides = array<i32>} : memref<1x8x8x128xbf16, #tpu.memory_space<vmem>>, vector<1x8x8x128xbf16>,
    return
  }
  func.func @transform_0(%arg0: i32) -> (i32, i32, i32, i32, i32) {
    %c0_i32 = arith.constant 0 : i32
    %c0_i32_0 = arith.constant 0 : i32
    %c0_i32_1 = arith.constant 0 : i32
    %c0_i32_2 = arith.constant 0 : i32
    %c0_i32_3 = arith.constant 0 : i32
    return %arg0, %c0_i32, %c0_i32_0, %c0_i32_1, %c0_i32_2 : i32, i32, i32, i32, i32
  }
  func.func @transform_1(%arg0: i32) -> (i32, i32, i32, i32, i32) {
    %c0_i32 = arith.constant 0 : i32
    %c1_i32 = arith.constant 1 : i32
    %c0_i32_0 = arith.constant 0 : i32
    %c0_i32_1 = arith.constant 0 : i32
    %c0_i32_2 = arith.constant 0 : i32
    return %arg0, %c0_i32, %c1_i32, %c0_i32_0, %c0_i32_1 : i32, i32, i32, i32, i32
  }
  func.func @transform_2(%arg0: i32) -> (i32, i32) {
    %c0_i32 = arith.constant 0 : i32
    %c0_i32_0 = arith.constant 0 : i32
    %c0_i32_1 = arith.constant 0 : i32
    return %c0_i32, %c0_i32_0 : i32, i32
  }
  func.func @transform_3(%arg0: i32) -> (i32, i32) {
    %c0_i32 = arith.constant 0 : i32
    %c0_i32_0 = arith.constant 0 : i32
    %c0_i32_1 = arith.constant 0 : i32
    return %c0_i32, %c0_i32_0 : i32, i32
  }
  func.func @transform_4(%arg0: i32) -> (i32, i32) {
    %c0_i32 = arith.constant 0 : i32
    %c0_i32_0 = arith.constant 0 : i32
    %c0_i32_1 = arith.constant 0 : i32
    return %c0_i32, %c0_i32_0 : i32, i32
  }
  func.func @transform_5(%arg0: i32) -> (i32, i32, i32) {
    %c0_i32 = arith.constant 0 : i32
    %c0_i32_0 = arith.constant 0 : i32
    %c0_i32_1 = arith.constant 0 : i32
    %c0_i32_2 = arith.constant 0 : i32
    return %c0_i32, %c0_i32_0, %c0_i32_1 : i32, i32, i32
  }
  func.func @transform_6(%arg0: i32) -> (i32, i32) {
    %c0_i32 = arith.constant 0 : i32
    %c0_i32_0 = arith.constant 0 : i32
    %c0_i32_1 = arith.constant 0 : i32
    return %c0_i32, %c0_i32_0 : i32, i32
  }
  func.func @transform_7(%arg0: i32) -> (i32, i32) {
    %c0_i32 = arith.constant 0 : i32
    %c0_i32_0 = arith.constant 0 : i32
    %c0_i32_1 = arith.constant 0 : i32
    return %c0_i32, %c0_i32_0 : i32, i32
  }
  func.func @transform_8(%arg0: i32) -> (i32, i32) {
    %c0_i32 = arith.constant 0 : i32
    %c0_i32_0 = arith.constant 0 : i32
    %c0_i32_1 = arith.constant 0 : i32
    return %c0_i32, %c0_i32_0 : i32, i32
  }
  func.func @transform_9(%arg0: i32) -> (i32, i32) {
    %c0_i32 = arith.constant 0 : i32
    %c0_i32_0 = arith.constant 0 : i32
    %c0_i32_1 = arith.constant 0 : i32
    return %c0_i32, %c0_i32_0 : i32, i32
  }
  func.func @transform_10(%arg0: i32) -> (i32, i32) {
    %c0_i32 = arith.constant 0 : i32
    %c0_i32_0 = arith.constant 0 : i32
    %c0_i32_1 = arith.constant 0 : i32
    return %c0_i32, %c0_i32_0 : i32, i32
  }
  func.func @transform_11(%arg0: i32) -> (i32, i32, i32, i32) {
    %c0_i32 = arith.constant 0 : i32
    %c0_i32_0 = arith.constant 0 : i32
    %c0_i32_1 = arith.constant 0 : i32
    %c0_i32_2 = arith.constant 0 : i32
    return %arg0, %c0_i32, %c0_i32_0, %c0_i32_1 : i32, i32, i32, i32
  }
}

module attributes {stable_mosaic.version = 11 : i64} {
  func.func @_block_kernel(%arg0: i32, %arg1: memref<1x8x8x128xbf16, #tpu.memory_space<vmem>>, %arg2: memref<128x8xbf16, #tpu.memory_space<vmem>>, %arg3: memref<1x8xf32, #tpu.memory_space<vmem>>, %arg4: memref<1x8xf32, #tpu.memory_space<vmem>>, %arg5: memref<9x8x128xbf16, #tpu.memory_space<vmem>>, %arg6: memref<1x128xf32, #tpu.memory_space<vmem>>, %arg7: memref<1x128xf32, #tpu.memory_space<vmem>>, %arg8: memref<1x8x8x128xbf16, #tpu.memory_space<vmem>>, %arg9: memref<10x16x8xf32, #tpu.memory_space<vmem>>) attributes {dimension_semantics = [#tpu.dimension_semantics<parallel>], iteration_bounds = array<i64: 2>, scalar_prefetch = 0 : i64, scratch_operands = 1 : i64, tpu.core_type = #tpu.core_type<tc>, window_params = [{transform_indices = @transform_0, window_bounds = array<i64: 1, 8, 8, 128>}, {pipeline_mode = #tpu.pipeline_mode<synchronous>, transform_indices = @transform_1, window_bounds = array<i64: 128, 8>}, {pipeline_mode = #tpu.pipeline_mode<synchronous>, transform_indices = @transform_2, window_bounds = array<i64: 1, 8>}, {pipeline_mode = #tpu.pipeline_mode<synchronous>, transform_indices = @transform_3, window_bounds = array<i64: 1, 8>}, {pipeline_mode = #tpu.pipeline_mode<synchronous>, transform_indices = @transform_4, window_bounds = array<i64: 9, 8, 128>}, {pipeline_mode = #tpu.pipeline_mode<synchronous>, transform_indices = @transform_5, window_bounds = array<i64: 1, 128>}, {pipeline_mode = #tpu.pipeline_mode<synchronous>, transform_indices = @transform_6, window_bounds = array<i64: 1, 128>}, {transform_indices = @transform_7, window_bounds = array<i64: 1, 8, 8, 128>}]} {
    %c0 = arith.constant 0 : index
    %c0_0 = arith.constant 0 : index
    %c0_1 = arith.constant 0 : index
    %c0_2 = arith.constant 0 : index
    %0 = vector.load %arg1[%c0, %c0_0, %c0_1, %c0_2] : memref<1x8x8x128xbf16, #tpu.memory_space<vmem>>, vector<1x8x8x128xbf16>
    %1 = vector.shape_cast %0 : vector<1x8x8x128xbf16> to vector<8x8x128xbf16>
    %2 = vector.shape_cast %1 : vector<8x8x128xbf16> to vector<64x128xbf16>
    %3 = arith.extf %2 : vector<64x128xbf16> to vector<64x128xf32>
    %c0_3 = arith.constant 0 : index
    %c0_4 = arith.constant 0 : index
    %4 = vector.load %arg2[%c0_3, %c0_4] : memref<128x8xbf16, #tpu.memory_space<vmem>>, vector<128x8xbf16>
    %cst = arith.constant dense<0.000000e+00> : vector<64x8xf32>
    %5 = tpu.matmul %2, %4, %cst {dimension_numbers = #tpu.dot_dimension_numbers<[1], [0], [0], [1], [0, 0, 1, 1], [], []>} : vector<64x128xbf16>, vector<128x8xbf16>, vector<64x8xf32> -> vector<64x8xf32>
    %c0_5 = arith.constant 0 : index
    %c0_6 = arith.constant 0 : index
    %6 = vector.load %arg3[%c0_5, %c0_6] : memref<1x8xf32, #tpu.memory_space<vmem>>, vector<1x8xf32>
    %7 = vector.broadcast %6 : vector<1x8xf32> to vector<64x8xf32>
    %8 = arith.mulf %5, %7 : vector<64x8xf32>
    %c0_7 = arith.constant 0 : index
    %c0_8 = arith.constant 0 : index
    %9 = vector.load %arg4[%c0_7, %c0_8] : memref<1x8xf32, #tpu.memory_space<vmem>>, vector<1x8xf32>
    %10 = vector.broadcast %9 : vector<1x8xf32> to vector<64x8xf32>
    %11 = arith.addf %8, %10 : vector<64x8xf32>
    %cst_9 = arith.constant 0.000000e+00 : f32
    %12 = vector.broadcast %cst_9 : f32 to vector<64x8xf32>
    %13 = arith.maximumf %11, %12 : vector<64x8xf32>
    %cst_10 = arith.constant 0.000000e+00 : f32
    %14 = vector.broadcast %cst_10 : f32 to vector<10x16x8xf32>
    %c0_11 = arith.constant 0 : index
    %c0_12 = arith.constant 0 : index
    %c0_13 = arith.constant 0 : index
    %15 = vector.load %arg9[%c0_11, %c0_12, %c0_13] : memref<10x16x8xf32, #tpu.memory_space<vmem>>, vector<10x16x8xf32>
    tpu.vector_store %arg9[%c0_11, %c0_12, %c0_13], %14 {strides = array<i32>} : memref<10x16x8xf32, #tpu.memory_space<vmem>>, vector<10x16x8xf32>,
    %16 = vector.shape_cast %13 : vector<64x8xf32> to vector<8x8x8xf32>
    %c1 = arith.constant 1 : index
    %c1_14 = arith.constant 1 : index
    %c0_15 = arith.constant 0 : index
    %17 = vector.load %arg9[%c1, %c1_14, %c0_15] : memref<10x16x8xf32, #tpu.memory_space<vmem>>, vector<8x8x8xf32>
    tpu.vector_store %arg9[%c1, %c1_14, %c0_15], %16 {strides = array<i32>} : memref<10x16x8xf32, #tpu.memory_space<vmem>>, vector<8x8x8xf32>,
    %cst_16 = arith.constant 0.000000e+00 : f32
    %18 = vector.broadcast %cst_16 : f32 to vector<64x128xf32>
    %c0_17 = arith.constant 0 : index
    %c0_18 = arith.constant 0 : index
    %c0_19 = arith.constant 0 : index
    %19 = vector.load %arg9[%c0_17, %c0_18, %c0_19] : memref<10x16x8xf32, #tpu.memory_space<vmem>>, vector<8x8x8xf32>
    %20 = vector.shape_cast %19 : vector<8x8x8xf32> to vector<64x8xf32>
    %21 = arith.truncf %20 : vector<64x8xf32> to vector<64x8xbf16>
    %c0_20 = arith.constant 0 : index
    %c0_21 = arith.constant 0 : index
    %c0_22 = arith.constant 0 : index
    %22 = vector.load %arg5[%c0_20, %c0_21, %c0_22] : memref<9x8x128xbf16, #tpu.memory_space<vmem>>, vector<1x8x128xbf16>
    %23 = vector.shape_cast %22 : vector<1x8x128xbf16> to vector<8x128xbf16>
    %cst_23 = arith.constant dense<0.000000e+00> : vector<64x128xf32>
    %24 = tpu.matmul %21, %23, %cst_23 {dimension_numbers = #tpu.dot_dimension_numbers<[1], [0], [0], [1], [0, 0, 1, 1], [], []>} : vector<64x8xbf16>, vector<8x128xbf16>, vector<64x128xf32> -> vector<64x128xf32>
    %25 = arith.addf %18, %24 : vector<64x128xf32>
    %c0_24 = arith.constant 0 : index
    %c1_25 = arith.constant 1 : index
    %c0_26 = arith.constant 0 : index
    %26 = vector.load %arg9[%c0_24, %c1_25, %c0_26] : memref<10x16x8xf32, #tpu.memory_space<vmem>>, vector<8x8x8xf32>
    %27 = vector.shape_cast %26 : vector<8x8x8xf32> to vector<64x8xf32>
    %28 = arith.truncf %27 : vector<64x8xf32> to vector<64x8xbf16>
    %c1_27 = arith.constant 1 : index
    %c0_28 = arith.constant 0 : index
    %c0_29 = arith.constant 0 : index
    %29 = vector.load %arg5[%c1_27, %c0_28, %c0_29] : memref<9x8x128xbf16, #tpu.memory_space<vmem>>, vector<1x8x128xbf16>
    %30 = vector.shape_cast %29 : vector<1x8x128xbf16> to vector<8x128xbf16>
    %cst_30 = arith.constant dense<0.000000e+00> : vector<64x128xf32>
    %31 = tpu.matmul %28, %30, %cst_30 {dimension_numbers = #tpu.dot_dimension_numbers<[1], [0], [0], [1], [0, 0, 1, 1], [], []>} : vector<64x8xbf16>, vector<8x128xbf16>, vector<64x128xf32> -> vector<64x128xf32>
    %32 = arith.addf %25, %31 : vector<64x128xf32>
    %c0_31 = arith.constant 0 : index
    %c2 = arith.constant 2 : index
    %c0_32 = arith.constant 0 : index
    %33 = vector.load %arg9[%c0_31, %c2, %c0_32] : memref<10x16x8xf32, #tpu.memory_space<vmem>>, vector<8x8x8xf32>
    %34 = vector.shape_cast %33 : vector<8x8x8xf32> to vector<64x8xf32>
    %35 = arith.truncf %34 : vector<64x8xf32> to vector<64x8xbf16>
    %c2_33 = arith.constant 2 : index
    %c0_34 = arith.constant 0 : index
    %c0_35 = arith.constant 0 : index
    %36 = vector.load %arg5[%c2_33, %c0_34, %c0_35] : memref<9x8x128xbf16, #tpu.memory_space<vmem>>, vector<1x8x128xbf16>
    %37 = vector.shape_cast %36 : vector<1x8x128xbf16> to vector<8x128xbf16>
    %cst_36 = arith.constant dense<0.000000e+00> : vector<64x128xf32>
    %38 = tpu.matmul %35, %37, %cst_36 {dimension_numbers = #tpu.dot_dimension_numbers<[1], [0], [0], [1], [0, 0, 1, 1], [], []>} : vector<64x8xbf16>, vector<8x128xbf16>, vector<64x128xf32> -> vector<64x128xf32>
    %39 = arith.addf %32, %38 : vector<64x128xf32>
    %c1_37 = arith.constant 1 : index
    %c0_38 = arith.constant 0 : index
    %c0_39 = arith.constant 0 : index
    %40 = vector.load %arg9[%c1_37, %c0_38, %c0_39] : memref<10x16x8xf32, #tpu.memory_space<vmem>>, vector<8x8x8xf32>
    %41 = vector.shape_cast %40 : vector<8x8x8xf32> to vector<64x8xf32>
    %42 = arith.truncf %41 : vector<64x8xf32> to vector<64x8xbf16>
    %c3 = arith.constant 3 : index
    %c0_40 = arith.constant 0 : index
    %c0_41 = arith.constant 0 : index
    %43 = vector.load %arg5[%c3, %c0_40, %c0_41] : memref<9x8x128xbf16, #tpu.memory_space<vmem>>, vector<1x8x128xbf16>
    %44 = vector.shape_cast %43 : vector<1x8x128xbf16> to vector<8x128xbf16>
    %cst_42 = arith.constant dense<0.000000e+00> : vector<64x128xf32>
    %45 = tpu.matmul %42, %44, %cst_42 {dimension_numbers = #tpu.dot_dimension_numbers<[1], [0], [0], [1], [0, 0, 1, 1], [], []>} : vector<64x8xbf16>, vector<8x128xbf16>, vector<64x128xf32> -> vector<64x128xf32>
    %46 = arith.addf %39, %45 : vector<64x128xf32>
    %c1_43 = arith.constant 1 : index
    %c1_44 = arith.constant 1 : index
    %c0_45 = arith.constant 0 : index
    %47 = vector.load %arg9[%c1_43, %c1_44, %c0_45] : memref<10x16x8xf32, #tpu.memory_space<vmem>>, vector<8x8x8xf32>
    %48 = vector.shape_cast %47 : vector<8x8x8xf32> to vector<64x8xf32>
    %49 = arith.truncf %48 : vector<64x8xf32> to vector<64x8xbf16>
    %c4 = arith.constant 4 : index
    %c0_46 = arith.constant 0 : index
    %c0_47 = arith.constant 0 : index
    %50 = vector.load %arg5[%c4, %c0_46, %c0_47] : memref<9x8x128xbf16, #tpu.memory_space<vmem>>, vector<1x8x128xbf16>
    %51 = vector.shape_cast %50 : vector<1x8x128xbf16> to vector<8x128xbf16>
    %cst_48 = arith.constant dense<0.000000e+00> : vector<64x128xf32>
    %52 = tpu.matmul %49, %51, %cst_48 {dimension_numbers = #tpu.dot_dimension_numbers<[1], [0], [0], [1], [0, 0, 1, 1], [], []>} : vector<64x8xbf16>, vector<8x128xbf16>, vector<64x128xf32> -> vector<64x128xf32>
    %53 = arith.addf %46, %52 : vector<64x128xf32>
    %c1_49 = arith.constant 1 : index
    %c2_50 = arith.constant 2 : index
    %c0_51 = arith.constant 0 : index
    %54 = vector.load %arg9[%c1_49, %c2_50, %c0_51] : memref<10x16x8xf32, #tpu.memory_space<vmem>>, vector<8x8x8xf32>
    %55 = vector.shape_cast %54 : vector<8x8x8xf32> to vector<64x8xf32>
    %56 = arith.truncf %55 : vector<64x8xf32> to vector<64x8xbf16>
    %c5 = arith.constant 5 : index
    %c0_52 = arith.constant 0 : index
    %c0_53 = arith.constant 0 : index
    %57 = vector.load %arg5[%c5, %c0_52, %c0_53] : memref<9x8x128xbf16, #tpu.memory_space<vmem>>, vector<1x8x128xbf16>
    %58 = vector.shape_cast %57 : vector<1x8x128xbf16> to vector<8x128xbf16>
    %cst_54 = arith.constant dense<0.000000e+00> : vector<64x128xf32>
    %59 = tpu.matmul %56, %58, %cst_54 {dimension_numbers = #tpu.dot_dimension_numbers<[1], [0], [0], [1], [0, 0, 1, 1], [], []>} : vector<64x8xbf16>, vector<8x128xbf16>, vector<64x128xf32> -> vector<64x128xf32>
    %60 = arith.addf %53, %59 : vector<64x128xf32>
    %c2_55 = arith.constant 2 : index
    %c0_56 = arith.constant 0 : index
    %c0_57 = arith.constant 0 : index
    %61 = vector.load %arg9[%c2_55, %c0_56, %c0_57] : memref<10x16x8xf32, #tpu.memory_space<vmem>>, vector<8x8x8xf32>
    %62 = vector.shape_cast %61 : vector<8x8x8xf32> to vector<64x8xf32>
    %63 = arith.truncf %62 : vector<64x8xf32> to vector<64x8xbf16>
    %c6 = arith.constant 6 : index
    %c0_58 = arith.constant 0 : index
    %c0_59 = arith.constant 0 : index
    %64 = vector.load %arg5[%c6, %c0_58, %c0_59] : memref<9x8x128xbf16, #tpu.memory_space<vmem>>, vector<1x8x128xbf16>
    %65 = vector.shape_cast %64 : vector<1x8x128xbf16> to vector<8x128xbf16>
    %cst_60 = arith.constant dense<0.000000e+00> : vector<64x128xf32>
    %66 = tpu.matmul %63, %65, %cst_60 {dimension_numbers = #tpu.dot_dimension_numbers<[1], [0], [0], [1], [0, 0, 1, 1], [], []>} : vector<64x8xbf16>, vector<8x128xbf16>, vector<64x128xf32> -> vector<64x128xf32>
    %67 = arith.addf %60, %66 : vector<64x128xf32>
    %c2_61 = arith.constant 2 : index
    %c1_62 = arith.constant 1 : index
    %c0_63 = arith.constant 0 : index
    %68 = vector.load %arg9[%c2_61, %c1_62, %c0_63] : memref<10x16x8xf32, #tpu.memory_space<vmem>>, vector<8x8x8xf32>
    %69 = vector.shape_cast %68 : vector<8x8x8xf32> to vector<64x8xf32>
    %70 = arith.truncf %69 : vector<64x8xf32> to vector<64x8xbf16>
    %c7 = arith.constant 7 : index
    %c0_64 = arith.constant 0 : index
    %c0_65 = arith.constant 0 : index
    %71 = vector.load %arg5[%c7, %c0_64, %c0_65] : memref<9x8x128xbf16, #tpu.memory_space<vmem>>, vector<1x8x128xbf16>
    %72 = vector.shape_cast %71 : vector<1x8x128xbf16> to vector<8x128xbf16>
    %cst_66 = arith.constant dense<0.000000e+00> : vector<64x128xf32>
    %73 = tpu.matmul %70, %72, %cst_66 {dimension_numbers = #tpu.dot_dimension_numbers<[1], [0], [0], [1], [0, 0, 1, 1], [], []>} : vector<64x8xbf16>, vector<8x128xbf16>, vector<64x128xf32> -> vector<64x128xf32>
    %74 = arith.addf %67, %73 : vector<64x128xf32>
    %c2_67 = arith.constant 2 : index
    %c2_68 = arith.constant 2 : index
    %c0_69 = arith.constant 0 : index
    %75 = vector.load %arg9[%c2_67, %c2_68, %c0_69] : memref<10x16x8xf32, #tpu.memory_space<vmem>>, vector<8x8x8xf32>
    %76 = vector.shape_cast %75 : vector<8x8x8xf32> to vector<64x8xf32>
    %77 = arith.truncf %76 : vector<64x8xf32> to vector<64x8xbf16>
    %c8 = arith.constant 8 : index
    %c0_70 = arith.constant 0 : index
    %c0_71 = arith.constant 0 : index
    %78 = vector.load %arg5[%c8, %c0_70, %c0_71] : memref<9x8x128xbf16, #tpu.memory_space<vmem>>, vector<1x8x128xbf16>
    %79 = vector.shape_cast %78 : vector<1x8x128xbf16> to vector<8x128xbf16>
    %cst_72 = arith.constant dense<0.000000e+00> : vector<64x128xf32>
    %80 = tpu.matmul %77, %79, %cst_72 {dimension_numbers = #tpu.dot_dimension_numbers<[1], [0], [0], [1], [0, 0, 1, 1], [], []>} : vector<64x8xbf16>, vector<8x128xbf16>, vector<64x128xf32> -> vector<64x128xf32>
    %81 = arith.addf %74, %80 : vector<64x128xf32>
    %c0_73 = arith.constant 0 : index
    %c0_74 = arith.constant 0 : index
    %82 = vector.load %arg6[%c0_73, %c0_74] : memref<1x128xf32, #tpu.memory_space<vmem>>, vector<1x128xf32>
    %83 = vector.broadcast %82 : vector<1x128xf32> to vector<64x128xf32>
    %84 = arith.mulf %81, %83 : vector<64x128xf32>
    %c0_75 = arith.constant 0 : index
    %c0_76 = arith.constant 0 : index
    %85 = vector.load %arg7[%c0_75, %c0_76] : memref<1x128xf32, #tpu.memory_space<vmem>>, vector<1x128xf32>
    %86 = vector.broadcast %85 : vector<1x128xf32> to vector<64x128xf32>
    %87 = arith.addf %84, %86 : vector<64x128xf32>
    %cst_77 = arith.constant 0.000000e+00 : f32
    %88 = vector.broadcast %cst_77 : f32 to vector<64x128xf32>
    %89 = arith.maximumf %87, %88 : vector<64x128xf32>
    %90 = arith.addf %89, %3 : vector<64x128xf32>
    %cst_78 = arith.constant 0.000000e+00 : f32
    %91 = vector.broadcast %cst_78 : f32 to vector<64x128xf32>
    %92 = arith.maximumf %90, %91 : vector<64x128xf32>
    %93 = vector.shape_cast %92 : vector<64x128xf32> to vector<8x8x128xf32>
    %94 = arith.truncf %93 : vector<8x8x128xf32> to vector<8x8x128xbf16>
    %c0_79 = arith.constant 0 : index
    %c0_80 = arith.constant 0 : index
    %c0_81 = arith.constant 0 : index
    %c0_82 = arith.constant 0 : index
    %95 = vector.load %arg8[%c0_79, %c0_80, %c0_81, %c0_82] : memref<1x8x8x128xbf16, #tpu.memory_space<vmem>>, vector<1x8x8x128xbf16>
    %96 = vector.shape_cast %95 : vector<1x8x8x128xbf16> to vector<8x8x128xbf16>
    %97 = vector.shape_cast %94 : vector<8x8x128xbf16> to vector<1x8x8x128xbf16>
    tpu.vector_store %arg8[%c0_79, %c0_80, %c0_81, %c0_82], %97 {strides = array<i32>} : memref<1x8x8x128xbf16, #tpu.memory_space<vmem>>, vector<1x8x8x128xbf16>,
    return
  }
  func.func @transform_0(%arg0: i32) -> (i32, i32, i32, i32) {
    %c0_i32 = arith.constant 0 : i32
    %c0_i32_0 = arith.constant 0 : i32
    %c0_i32_1 = arith.constant 0 : i32
    %c0_i32_2 = arith.constant 0 : i32
    return %arg0, %c0_i32, %c0_i32_0, %c0_i32_1 : i32, i32, i32, i32
  }
  func.func @transform_1(%arg0: i32) -> (i32, i32) {
    %c0_i32 = arith.constant 0 : i32
    %c0_i32_0 = arith.constant 0 : i32
    %c0_i32_1 = arith.constant 0 : i32
    return %c0_i32, %c0_i32_0 : i32, i32
  }
  func.func @transform_2(%arg0: i32) -> (i32, i32) {
    %c0_i32 = arith.constant 0 : i32
    %c0_i32_0 = arith.constant 0 : i32
    %c0_i32_1 = arith.constant 0 : i32
    return %c0_i32, %c0_i32_0 : i32, i32
  }
  func.func @transform_3(%arg0: i32) -> (i32, i32) {
    %c0_i32 = arith.constant 0 : i32
    %c0_i32_0 = arith.constant 0 : i32
    %c0_i32_1 = arith.constant 0 : i32
    return %c0_i32, %c0_i32_0 : i32, i32
  }
  func.func @transform_4(%arg0: i32) -> (i32, i32, i32) {
    %c0_i32 = arith.constant 0 : i32
    %c0_i32_0 = arith.constant 0 : i32
    %c0_i32_1 = arith.constant 0 : i32
    %c0_i32_2 = arith.constant 0 : i32
    return %c0_i32, %c0_i32_0, %c0_i32_1 : i32, i32, i32
  }
  func.func @transform_5(%arg0: i32) -> (i32, i32) {
    %c0_i32 = arith.constant 0 : i32
    %c0_i32_0 = arith.constant 0 : i32
    %c0_i32_1 = arith.constant 0 : i32
    return %c0_i32, %c0_i32_0 : i32, i32
  }
  func.func @transform_6(%arg0: i32) -> (i32, i32) {
    %c0_i32 = arith.constant 0 : i32
    %c0_i32_0 = arith.constant 0 : i32
    %c0_i32_1 = arith.constant 0 : i32
    return %c0_i32, %c0_i32_0 : i32, i32
  }
  func.func @transform_7(%arg0: i32) -> (i32, i32, i32, i32) {
    %c0_i32 = arith.constant 0 : i32
    %c0_i32_0 = arith.constant 0 : i32
    %c0_i32_1 = arith.constant 0 : i32
    %c0_i32_2 = arith.constant 0 : i32
    return %arg0, %c0_i32, %c0_i32_0, %c0_i32_1 : i32, i32, i32, i32
  }
}

module attributes {stable_mosaic.version = 11 : i64} {
  func.func @_block_kernel(%arg0: i32, %arg1: memref<1x4x1x4x256xbf16, #tpu.memory_space<vmem>>, %arg2: memref<128x8xbf16, #tpu.memory_space<vmem>>, %arg3: memref<1x8xf32, #tpu.memory_space<vmem>>, %arg4: memref<1x8xf32, #tpu.memory_space<vmem>>, %arg5: memref<9x8x128xbf16, #tpu.memory_space<vmem>>, %arg6: memref<1x128xf32, #tpu.memory_space<vmem>>, %arg7: memref<1x128xf32, #tpu.memory_space<vmem>>, %arg8: memref<128x128xbf16, #tpu.memory_space<vmem>>, %arg9: memref<1x128xf32, #tpu.memory_space<vmem>>, %arg10: memref<1x128xf32, #tpu.memory_space<vmem>>, %arg11: memref<1x4x4x128xbf16, #tpu.memory_space<vmem>>, %arg12: memref<6x8x8xf32, #tpu.memory_space<vmem>>) attributes {dimension_semantics = [#tpu.dimension_semantics<parallel>], iteration_bounds = array<i64: 2>, scalar_prefetch = 0 : i64, scratch_operands = 1 : i64, tpu.core_type = #tpu.core_type<tc>, window_params = [{transform_indices = @transform_0, window_bounds = array<i64: 1, 4, 1, 4, 256>}, {pipeline_mode = #tpu.pipeline_mode<synchronous>, transform_indices = @transform_1, window_bounds = array<i64: 128, 8>}, {pipeline_mode = #tpu.pipeline_mode<synchronous>, transform_indices = @transform_2, window_bounds = array<i64: 1, 8>}, {pipeline_mode = #tpu.pipeline_mode<synchronous>, transform_indices = @transform_3, window_bounds = array<i64: 1, 8>}, {pipeline_mode = #tpu.pipeline_mode<synchronous>, transform_indices = @transform_4, window_bounds = array<i64: 9, 8, 128>}, {pipeline_mode = #tpu.pipeline_mode<synchronous>, transform_indices = @transform_5, window_bounds = array<i64: 1, 128>}, {pipeline_mode = #tpu.pipeline_mode<synchronous>, transform_indices = @transform_6, window_bounds = array<i64: 1, 128>}, {pipeline_mode = #tpu.pipeline_mode<synchronous>, transform_indices = @transform_7, window_bounds = array<i64: 128, 128>}, {pipeline_mode = #tpu.pipeline_mode<synchronous>, transform_indices = @transform_8, window_bounds = array<i64: 1, 128>}, {pipeline_mode = #tpu.pipeline_mode<synchronous>, transform_indices = @transform_9, window_bounds = array<i64: 1, 128>}, {transform_indices = @transform_10, window_bounds = array<i64: 1, 4, 4, 128>}]} {
    %c0 = arith.constant 0 : index
    %c0_0 = arith.constant 0 : index
    %c0_1 = arith.constant 0 : index
    %c0_2 = arith.constant 0 : index
    %c0_3 = arith.constant 0 : index
    %0 = vector.load %arg1[%c0, %c0_0, %c0_1, %c0_2, %c0_3] : memref<1x4x1x4x256xbf16, #tpu.memory_space<vmem>>, vector<1x4x1x4x256xbf16>
    %1 = vector.shape_cast %0 : vector<1x4x1x4x256xbf16> to vector<4x4x256xbf16>
    %2 = vector.extract_strided_slice %1 {offsets = [0, 0, 0], sizes = [4, 4, 128], strides = [1, 1, 1]} : vector<4x4x256xbf16> to vector<4x4x128xbf16>
    %3 = vector.shape_cast %2 : vector<4x4x128xbf16> to vector<16x128xbf16>
    %c0_4 = arith.constant 0 : index
    %c0_5 = arith.constant 0 : index
    %4 = vector.load %arg8[%c0_4, %c0_5] : memref<128x128xbf16, #tpu.memory_space<vmem>>, vector<128x128xbf16>
    %cst = arith.constant dense<0.000000e+00> : vector<16x128xf32>
    %5 = tpu.matmul %3, %4, %cst {dimension_numbers = #tpu.dot_dimension_numbers<[1], [0], [0], [1], [0, 0, 1, 1], [], []>} : vector<16x128xbf16>, vector<128x128xbf16>, vector<16x128xf32> -> vector<16x128xf32>
    %c0_6 = arith.constant 0 : index
    %c0_7 = arith.constant 0 : index
    %6 = vector.load %arg9[%c0_6, %c0_7] : memref<1x128xf32, #tpu.memory_space<vmem>>, vector<1x128xf32>
    %7 = vector.broadcast %6 : vector<1x128xf32> to vector<16x128xf32>
    %8 = arith.mulf %5, %7 : vector<16x128xf32>
    %c0_8 = arith.constant 0 : index
    %c0_9 = arith.constant 0 : index
    %9 = vector.load %arg10[%c0_8, %c0_9] : memref<1x128xf32, #tpu.memory_space<vmem>>, vector<1x128xf32>
    %10 = vector.broadcast %9 : vector<1x128xf32> to vector<16x128xf32>
    %11 = arith.addf %8, %10 : vector<16x128xf32>
    %c0_10 = arith.constant 0 : index
    %c0_11 = arith.constant 0 : index
    %12 = vector.load %arg2[%c0_10, %c0_11] : memref<128x8xbf16, #tpu.memory_space<vmem>>, vector<128x8xbf16>
    %cst_12 = arith.constant dense<0.000000e+00> : vector<16x8xf32>
    %13 = tpu.matmul %3, %12, %cst_12 {dimension_numbers = #tpu.dot_dimension_numbers<[1], [0], [0], [1], [0, 0, 1, 1], [], []>} : vector<16x128xbf16>, vector<128x8xbf16>, vector<16x8xf32> -> vector<16x8xf32>
    %c0_13 = arith.constant 0 : index
    %c0_14 = arith.constant 0 : index
    %14 = vector.load %arg3[%c0_13, %c0_14] : memref<1x8xf32, #tpu.memory_space<vmem>>, vector<1x8xf32>
    %15 = vector.broadcast %14 : vector<1x8xf32> to vector<16x8xf32>
    %16 = arith.mulf %13, %15 : vector<16x8xf32>
    %c0_15 = arith.constant 0 : index
    %c0_16 = arith.constant 0 : index
    %17 = vector.load %arg4[%c0_15, %c0_16] : memref<1x8xf32, #tpu.memory_space<vmem>>, vector<1x8xf32>
    %18 = vector.broadcast %17 : vector<1x8xf32> to vector<16x8xf32>
    %19 = arith.addf %16, %18 : vector<16x8xf32>
    %cst_17 = arith.constant 0.000000e+00 : f32
    %20 = vector.broadcast %cst_17 : f32 to vector<16x8xf32>
    %21 = arith.maximumf %19, %20 : vector<16x8xf32>
    %cst_18 = arith.constant 0.000000e+00 : f32
    %22 = vector.broadcast %cst_18 : f32 to vector<6x8x8xf32>
    %c0_19 = arith.constant 0 : index
    %c0_20 = arith.constant 0 : index
    %c0_21 = arith.constant 0 : index
    %23 = vector.load %arg12[%c0_19, %c0_20, %c0_21] : memref<6x8x8xf32, #tpu.memory_space<vmem>>, vector<6x8x8xf32>
    tpu.vector_store %arg12[%c0_19, %c0_20, %c0_21], %22 {strides = array<i32>} : memref<6x8x8xf32, #tpu.memory_space<vmem>>, vector<6x8x8xf32>,
    %24 = vector.shape_cast %21 : vector<16x8xf32> to vector<4x4x8xf32>
    %c1 = arith.constant 1 : index
    %c1_22 = arith.constant 1 : index
    %c0_23 = arith.constant 0 : index
    %25 = vector.load %arg12[%c1, %c1_22, %c0_23] : memref<6x8x8xf32, #tpu.memory_space<vmem>>, vector<4x4x8xf32>
    tpu.vector_store %arg12[%c1, %c1_22, %c0_23], %24 {strides = array<i32>} : memref<6x8x8xf32, #tpu.memory_space<vmem>>, vector<4x4x8xf32>,
    %cst_24 = arith.constant 0.000000e+00 : f32
    %26 = vector.broadcast %cst_24 : f32 to vector<16x128xf32>
    %c0_25 = arith.constant 0 : index
    %c0_26 = arith.constant 0 : index
    %c0_27 = arith.constant 0 : index
    %27 = vector.load %arg12[%c0_25, %c0_26, %c0_27] : memref<6x8x8xf32, #tpu.memory_space<vmem>>, vector<4x4x8xf32>
    %28 = vector.shape_cast %27 : vector<4x4x8xf32> to vector<16x8xf32>
    %29 = arith.truncf %28 : vector<16x8xf32> to vector<16x8xbf16>
    %c0_28 = arith.constant 0 : index
    %c0_29 = arith.constant 0 : index
    %c0_30 = arith.constant 0 : index
    %30 = vector.load %arg5[%c0_28, %c0_29, %c0_30] : memref<9x8x128xbf16, #tpu.memory_space<vmem>>, vector<1x8x128xbf16>
    %31 = vector.shape_cast %30 : vector<1x8x128xbf16> to vector<8x128xbf16>
    %cst_31 = arith.constant dense<0.000000e+00> : vector<16x128xf32>
    %32 = tpu.matmul %29, %31, %cst_31 {dimension_numbers = #tpu.dot_dimension_numbers<[1], [0], [0], [1], [0, 0, 1, 1], [], []>} : vector<16x8xbf16>, vector<8x128xbf16>, vector<16x128xf32> -> vector<16x128xf32>
    %33 = arith.addf %26, %32 : vector<16x128xf32>
    %c0_32 = arith.constant 0 : index
    %c1_33 = arith.constant 1 : index
    %c0_34 = arith.constant 0 : index
    %34 = vector.load %arg12[%c0_32, %c1_33, %c0_34] : memref<6x8x8xf32, #tpu.memory_space<vmem>>, vector<4x4x8xf32>
    %35 = vector.shape_cast %34 : vector<4x4x8xf32> to vector<16x8xf32>
    %36 = arith.truncf %35 : vector<16x8xf32> to vector<16x8xbf16>
    %c1_35 = arith.constant 1 : index
    %c0_36 = arith.constant 0 : index
    %c0_37 = arith.constant 0 : index
    %37 = vector.load %arg5[%c1_35, %c0_36, %c0_37] : memref<9x8x128xbf16, #tpu.memory_space<vmem>>, vector<1x8x128xbf16>
    %38 = vector.shape_cast %37 : vector<1x8x128xbf16> to vector<8x128xbf16>
    %cst_38 = arith.constant dense<0.000000e+00> : vector<16x128xf32>
    %39 = tpu.matmul %36, %38, %cst_38 {dimension_numbers = #tpu.dot_dimension_numbers<[1], [0], [0], [1], [0, 0, 1, 1], [], []>} : vector<16x8xbf16>, vector<8x128xbf16>, vector<16x128xf32> -> vector<16x128xf32>
    %40 = arith.addf %33, %39 : vector<16x128xf32>
    %c0_39 = arith.constant 0 : index
    %c2 = arith.constant 2 : index
    %c0_40 = arith.constant 0 : index
    %41 = vector.load %arg12[%c0_39, %c2, %c0_40] : memref<6x8x8xf32, #tpu.memory_space<vmem>>, vector<4x4x8xf32>
    %42 = vector.shape_cast %41 : vector<4x4x8xf32> to vector<16x8xf32>
    %43 = arith.truncf %42 : vector<16x8xf32> to vector<16x8xbf16>
    %c2_41 = arith.constant 2 : index
    %c0_42 = arith.constant 0 : index
    %c0_43 = arith.constant 0 : index
    %44 = vector.load %arg5[%c2_41, %c0_42, %c0_43] : memref<9x8x128xbf16, #tpu.memory_space<vmem>>, vector<1x8x128xbf16>
    %45 = vector.shape_cast %44 : vector<1x8x128xbf16> to vector<8x128xbf16>
    %cst_44 = arith.constant dense<0.000000e+00> : vector<16x128xf32>
    %46 = tpu.matmul %43, %45, %cst_44 {dimension_numbers = #tpu.dot_dimension_numbers<[1], [0], [0], [1], [0, 0, 1, 1], [], []>} : vector<16x8xbf16>, vector<8x128xbf16>, vector<16x128xf32> -> vector<16x128xf32>
    %47 = arith.addf %40, %46 : vector<16x128xf32>
    %c1_45 = arith.constant 1 : index
    %c0_46 = arith.constant 0 : index
    %c0_47 = arith.constant 0 : index
    %48 = vector.load %arg12[%c1_45, %c0_46, %c0_47] : memref<6x8x8xf32, #tpu.memory_space<vmem>>, vector<4x4x8xf32>
    %49 = vector.shape_cast %48 : vector<4x4x8xf32> to vector<16x8xf32>
    %50 = arith.truncf %49 : vector<16x8xf32> to vector<16x8xbf16>
    %c3 = arith.constant 3 : index
    %c0_48 = arith.constant 0 : index
    %c0_49 = arith.constant 0 : index
    %51 = vector.load %arg5[%c3, %c0_48, %c0_49] : memref<9x8x128xbf16, #tpu.memory_space<vmem>>, vector<1x8x128xbf16>
    %52 = vector.shape_cast %51 : vector<1x8x128xbf16> to vector<8x128xbf16>
    %cst_50 = arith.constant dense<0.000000e+00> : vector<16x128xf32>
    %53 = tpu.matmul %50, %52, %cst_50 {dimension_numbers = #tpu.dot_dimension_numbers<[1], [0], [0], [1], [0, 0, 1, 1], [], []>} : vector<16x8xbf16>, vector<8x128xbf16>, vector<16x128xf32> -> vector<16x128xf32>
    %54 = arith.addf %47, %53 : vector<16x128xf32>
    %c1_51 = arith.constant 1 : index
    %c1_52 = arith.constant 1 : index
    %c0_53 = arith.constant 0 : index
    %55 = vector.load %arg12[%c1_51, %c1_52, %c0_53] : memref<6x8x8xf32, #tpu.memory_space<vmem>>, vector<4x4x8xf32>
    %56 = vector.shape_cast %55 : vector<4x4x8xf32> to vector<16x8xf32>
    %57 = arith.truncf %56 : vector<16x8xf32> to vector<16x8xbf16>
    %c4 = arith.constant 4 : index
    %c0_54 = arith.constant 0 : index
    %c0_55 = arith.constant 0 : index
    %58 = vector.load %arg5[%c4, %c0_54, %c0_55] : memref<9x8x128xbf16, #tpu.memory_space<vmem>>, vector<1x8x128xbf16>
    %59 = vector.shape_cast %58 : vector<1x8x128xbf16> to vector<8x128xbf16>
    %cst_56 = arith.constant dense<0.000000e+00> : vector<16x128xf32>
    %60 = tpu.matmul %57, %59, %cst_56 {dimension_numbers = #tpu.dot_dimension_numbers<[1], [0], [0], [1], [0, 0, 1, 1], [], []>} : vector<16x8xbf16>, vector<8x128xbf16>, vector<16x128xf32> -> vector<16x128xf32>
    %61 = arith.addf %54, %60 : vector<16x128xf32>
    %c1_57 = arith.constant 1 : index
    %c2_58 = arith.constant 2 : index
    %c0_59 = arith.constant 0 : index
    %62 = vector.load %arg12[%c1_57, %c2_58, %c0_59] : memref<6x8x8xf32, #tpu.memory_space<vmem>>, vector<4x4x8xf32>
    %63 = vector.shape_cast %62 : vector<4x4x8xf32> to vector<16x8xf32>
    %64 = arith.truncf %63 : vector<16x8xf32> to vector<16x8xbf16>
    %c5 = arith.constant 5 : index
    %c0_60 = arith.constant 0 : index
    %c0_61 = arith.constant 0 : index
    %65 = vector.load %arg5[%c5, %c0_60, %c0_61] : memref<9x8x128xbf16, #tpu.memory_space<vmem>>, vector<1x8x128xbf16>
    %66 = vector.shape_cast %65 : vector<1x8x128xbf16> to vector<8x128xbf16>
    %cst_62 = arith.constant dense<0.000000e+00> : vector<16x128xf32>
    %67 = tpu.matmul %64, %66, %cst_62 {dimension_numbers = #tpu.dot_dimension_numbers<[1], [0], [0], [1], [0, 0, 1, 1], [], []>} : vector<16x8xbf16>, vector<8x128xbf16>, vector<16x128xf32> -> vector<16x128xf32>
    %68 = arith.addf %61, %67 : vector<16x128xf32>
    %c2_63 = arith.constant 2 : index
    %c0_64 = arith.constant 0 : index
    %c0_65 = arith.constant 0 : index
    %69 = vector.load %arg12[%c2_63, %c0_64, %c0_65] : memref<6x8x8xf32, #tpu.memory_space<vmem>>, vector<4x4x8xf32>
    %70 = vector.shape_cast %69 : vector<4x4x8xf32> to vector<16x8xf32>
    %71 = arith.truncf %70 : vector<16x8xf32> to vector<16x8xbf16>
    %c6 = arith.constant 6 : index
    %c0_66 = arith.constant 0 : index
    %c0_67 = arith.constant 0 : index
    %72 = vector.load %arg5[%c6, %c0_66, %c0_67] : memref<9x8x128xbf16, #tpu.memory_space<vmem>>, vector<1x8x128xbf16>
    %73 = vector.shape_cast %72 : vector<1x8x128xbf16> to vector<8x128xbf16>
    %cst_68 = arith.constant dense<0.000000e+00> : vector<16x128xf32>
    %74 = tpu.matmul %71, %73, %cst_68 {dimension_numbers = #tpu.dot_dimension_numbers<[1], [0], [0], [1], [0, 0, 1, 1], [], []>} : vector<16x8xbf16>, vector<8x128xbf16>, vector<16x128xf32> -> vector<16x128xf32>
    %75 = arith.addf %68, %74 : vector<16x128xf32>
    %c2_69 = arith.constant 2 : index
    %c1_70 = arith.constant 1 : index
    %c0_71 = arith.constant 0 : index
    %76 = vector.load %arg12[%c2_69, %c1_70, %c0_71] : memref<6x8x8xf32, #tpu.memory_space<vmem>>, vector<4x4x8xf32>
    %77 = vector.shape_cast %76 : vector<4x4x8xf32> to vector<16x8xf32>
    %78 = arith.truncf %77 : vector<16x8xf32> to vector<16x8xbf16>
    %c7 = arith.constant 7 : index
    %c0_72 = arith.constant 0 : index
    %c0_73 = arith.constant 0 : index
    %79 = vector.load %arg5[%c7, %c0_72, %c0_73] : memref<9x8x128xbf16, #tpu.memory_space<vmem>>, vector<1x8x128xbf16>
    %80 = vector.shape_cast %79 : vector<1x8x128xbf16> to vector<8x128xbf16>
    %cst_74 = arith.constant dense<0.000000e+00> : vector<16x128xf32>
    %81 = tpu.matmul %78, %80, %cst_74 {dimension_numbers = #tpu.dot_dimension_numbers<[1], [0], [0], [1], [0, 0, 1, 1], [], []>} : vector<16x8xbf16>, vector<8x128xbf16>, vector<16x128xf32> -> vector<16x128xf32>
    %82 = arith.addf %75, %81 : vector<16x128xf32>
    %c2_75 = arith.constant 2 : index
    %c2_76 = arith.constant 2 : index
    %c0_77 = arith.constant 0 : index
    %83 = vector.load %arg12[%c2_75, %c2_76, %c0_77] : memref<6x8x8xf32, #tpu.memory_space<vmem>>, vector<4x4x8xf32>
    %84 = vector.shape_cast %83 : vector<4x4x8xf32> to vector<16x8xf32>
    %85 = arith.truncf %84 : vector<16x8xf32> to vector<16x8xbf16>
    %c8 = arith.constant 8 : index
    %c0_78 = arith.constant 0 : index
    %c0_79 = arith.constant 0 : index
    %86 = vector.load %arg5[%c8, %c0_78, %c0_79] : memref<9x8x128xbf16, #tpu.memory_space<vmem>>, vector<1x8x128xbf16>
    %87 = vector.shape_cast %86 : vector<1x8x128xbf16> to vector<8x128xbf16>
    %cst_80 = arith.constant dense<0.000000e+00> : vector<16x128xf32>
    %88 = tpu.matmul %85, %87, %cst_80 {dimension_numbers = #tpu.dot_dimension_numbers<[1], [0], [0], [1], [0, 0, 1, 1], [], []>} : vector<16x8xbf16>, vector<8x128xbf16>, vector<16x128xf32> -> vector<16x128xf32>
    %89 = arith.addf %82, %88 : vector<16x128xf32>
    %c0_81 = arith.constant 0 : index
    %c0_82 = arith.constant 0 : index
    %90 = vector.load %arg6[%c0_81, %c0_82] : memref<1x128xf32, #tpu.memory_space<vmem>>, vector<1x128xf32>
    %91 = vector.broadcast %90 : vector<1x128xf32> to vector<16x128xf32>
    %92 = arith.mulf %89, %91 : vector<16x128xf32>
    %c0_83 = arith.constant 0 : index
    %c0_84 = arith.constant 0 : index
    %93 = vector.load %arg7[%c0_83, %c0_84] : memref<1x128xf32, #tpu.memory_space<vmem>>, vector<1x128xf32>
    %94 = vector.broadcast %93 : vector<1x128xf32> to vector<16x128xf32>
    %95 = arith.addf %92, %94 : vector<16x128xf32>
    %cst_85 = arith.constant 0.000000e+00 : f32
    %96 = vector.broadcast %cst_85 : f32 to vector<16x128xf32>
    %97 = arith.maximumf %95, %96 : vector<16x128xf32>
    %98 = arith.addf %97, %11 : vector<16x128xf32>
    %cst_86 = arith.constant 0.000000e+00 : f32
    %99 = vector.broadcast %cst_86 : f32 to vector<16x128xf32>
    %100 = arith.maximumf %98, %99 : vector<16x128xf32>
    %101 = vector.shape_cast %100 : vector<16x128xf32> to vector<4x4x128xf32>
    %102 = arith.truncf %101 : vector<4x4x128xf32> to vector<4x4x128xbf16>
    %c0_87 = arith.constant 0 : index
    %c0_88 = arith.constant 0 : index
    %c0_89 = arith.constant 0 : index
    %c0_90 = arith.constant 0 : index
    %103 = vector.load %arg11[%c0_87, %c0_88, %c0_89, %c0_90] : memref<1x4x4x128xbf16, #tpu.memory_space<vmem>>, vector<1x4x4x128xbf16>
    %104 = vector.shape_cast %103 : vector<1x4x4x128xbf16> to vector<4x4x128xbf16>
    %105 = vector.shape_cast %102 : vector<4x4x128xbf16> to vector<1x4x4x128xbf16>
    tpu.vector_store %arg11[%c0_87, %c0_88, %c0_89, %c0_90], %105 {strides = array<i32>} : memref<1x4x4x128xbf16, #tpu.memory_space<vmem>>, vector<1x4x4x128xbf16>,
    return
  }
  func.func @transform_0(%arg0: i32) -> (i32, i32, i32, i32, i32) {
    %c0_i32 = arith.constant 0 : i32
    %c0_i32_0 = arith.constant 0 : i32
    %c0_i32_1 = arith.constant 0 : i32
    %c0_i32_2 = arith.constant 0 : i32
    %c0_i32_3 = arith.constant 0 : i32
    return %arg0, %c0_i32, %c0_i32_0, %c0_i32_1, %c0_i32_2 : i32, i32, i32, i32, i32
  }
  func.func @transform_1(%arg0: i32) -> (i32, i32) {
    %c0_i32 = arith.constant 0 : i32
    %c0_i32_0 = arith.constant 0 : i32
    %c0_i32_1 = arith.constant 0 : i32
    return %c0_i32, %c0_i32_0 : i32, i32
  }
  func.func @transform_2(%arg0: i32) -> (i32, i32) {
    %c0_i32 = arith.constant 0 : i32
    %c0_i32_0 = arith.constant 0 : i32
    %c0_i32_1 = arith.constant 0 : i32
    return %c0_i32, %c0_i32_0 : i32, i32
  }
  func.func @transform_3(%arg0: i32) -> (i32, i32) {
    %c0_i32 = arith.constant 0 : i32
    %c0_i32_0 = arith.constant 0 : i32
    %c0_i32_1 = arith.constant 0 : i32
    return %c0_i32, %c0_i32_0 : i32, i32
  }
  func.func @transform_4(%arg0: i32) -> (i32, i32, i32) {
    %c0_i32 = arith.constant 0 : i32
    %c0_i32_0 = arith.constant 0 : i32
    %c0_i32_1 = arith.constant 0 : i32
    %c0_i32_2 = arith.constant 0 : i32
    return %c0_i32, %c0_i32_0, %c0_i32_1 : i32, i32, i32
  }
  func.func @transform_5(%arg0: i32) -> (i32, i32) {
    %c0_i32 = arith.constant 0 : i32
    %c0_i32_0 = arith.constant 0 : i32
    %c0_i32_1 = arith.constant 0 : i32
    return %c0_i32, %c0_i32_0 : i32, i32
  }
  func.func @transform_6(%arg0: i32) -> (i32, i32) {
    %c0_i32 = arith.constant 0 : i32
    %c0_i32_0 = arith.constant 0 : i32
    %c0_i32_1 = arith.constant 0 : i32
    return %c0_i32, %c0_i32_0 : i32, i32
  }
  func.func @transform_7(%arg0: i32) -> (i32, i32) {
    %c0_i32 = arith.constant 0 : i32
    %c0_i32_0 = arith.constant 0 : i32
    %c0_i32_1 = arith.constant 0 : i32
    return %c0_i32, %c0_i32_0 : i32, i32
  }
  func.func @transform_8(%arg0: i32) -> (i32, i32) {
    %c0_i32 = arith.constant 0 : i32
    %c0_i32_0 = arith.constant 0 : i32
    %c0_i32_1 = arith.constant 0 : i32
    return %c0_i32, %c0_i32_0 : i32, i32
  }
  func.func @transform_9(%arg0: i32) -> (i32, i32) {
    %c0_i32 = arith.constant 0 : i32
    %c0_i32_0 = arith.constant 0 : i32
    %c0_i32_1 = arith.constant 0 : i32
    return %c0_i32, %c0_i32_0 : i32, i32
  }
  func.func @transform_10(%arg0: i32) -> (i32, i32, i32, i32) {
    %c0_i32 = arith.constant 0 : i32
    %c0_i32_0 = arith.constant 0 : i32
    %c0_i32_1 = arith.constant 0 : i32
    %c0_i32_2 = arith.constant 0 : i32
    return %arg0, %c0_i32, %c0_i32_0, %c0_i32_1 : i32, i32, i32, i32
  }
}

module attributes {stable_mosaic.version = 11 : i64} {
  func.func @_block_kernel(%arg0: i32, %arg1: memref<1x4x4x128xbf16, #tpu.memory_space<vmem>>, %arg2: memref<128x16xbf16, #tpu.memory_space<vmem>>, %arg3: memref<1x16xf32, #tpu.memory_space<vmem>>, %arg4: memref<1x16xf32, #tpu.memory_space<vmem>>, %arg5: memref<9x16x128xbf16, #tpu.memory_space<vmem>>, %arg6: memref<1x128xf32, #tpu.memory_space<vmem>>, %arg7: memref<1x128xf32, #tpu.memory_space<vmem>>, %arg8: memref<1x4x4x128xbf16, #tpu.memory_space<vmem>>, %arg9: memref<6x8x16xf32, #tpu.memory_space<vmem>>) attributes {dimension_semantics = [#tpu.dimension_semantics<parallel>], iteration_bounds = array<i64: 2>, scalar_prefetch = 0 : i64, scratch_operands = 1 : i64, tpu.core_type = #tpu.core_type<tc>, window_params = [{transform_indices = @transform_0, window_bounds = array<i64: 1, 4, 4, 128>}, {pipeline_mode = #tpu.pipeline_mode<synchronous>, transform_indices = @transform_1, window_bounds = array<i64: 128, 16>}, {pipeline_mode = #tpu.pipeline_mode<synchronous>, transform_indices = @transform_2, window_bounds = array<i64: 1, 16>}, {pipeline_mode = #tpu.pipeline_mode<synchronous>, transform_indices = @transform_3, window_bounds = array<i64: 1, 16>}, {pipeline_mode = #tpu.pipeline_mode<synchronous>, transform_indices = @transform_4, window_bounds = array<i64: 9, 16, 128>}, {pipeline_mode = #tpu.pipeline_mode<synchronous>, transform_indices = @transform_5, window_bounds = array<i64: 1, 128>}, {pipeline_mode = #tpu.pipeline_mode<synchronous>, transform_indices = @transform_6, window_bounds = array<i64: 1, 128>}, {transform_indices = @transform_7, window_bounds = array<i64: 1, 4, 4, 128>}]} {
    %c0 = arith.constant 0 : index
    %c0_0 = arith.constant 0 : index
    %c0_1 = arith.constant 0 : index
    %c0_2 = arith.constant 0 : index
    %0 = vector.load %arg1[%c0, %c0_0, %c0_1, %c0_2] : memref<1x4x4x128xbf16, #tpu.memory_space<vmem>>, vector<1x4x4x128xbf16>
    %1 = vector.shape_cast %0 : vector<1x4x4x128xbf16> to vector<4x4x128xbf16>
    %2 = vector.shape_cast %1 : vector<4x4x128xbf16> to vector<16x128xbf16>
    %3 = arith.extf %2 : vector<16x128xbf16> to vector<16x128xf32>
    %c0_3 = arith.constant 0 : index
    %c0_4 = arith.constant 0 : index
    %4 = vector.load %arg2[%c0_3, %c0_4] : memref<128x16xbf16, #tpu.memory_space<vmem>>, vector<128x16xbf16>
    %cst = arith.constant dense<0.000000e+00> : vector<16x16xf32>
    %5 = tpu.matmul %2, %4, %cst {dimension_numbers = #tpu.dot_dimension_numbers<[1], [0], [0], [1], [0, 0, 1, 1], [], []>} : vector<16x128xbf16>, vector<128x16xbf16>, vector<16x16xf32> -> vector<16x16xf32>
    %c0_5 = arith.constant 0 : index
    %c0_6 = arith.constant 0 : index
    %6 = vector.load %arg3[%c0_5, %c0_6] : memref<1x16xf32, #tpu.memory_space<vmem>>, vector<1x16xf32>
    %7 = vector.broadcast %6 : vector<1x16xf32> to vector<16x16xf32>
    %8 = arith.mulf %5, %7 : vector<16x16xf32>
    %c0_7 = arith.constant 0 : index
    %c0_8 = arith.constant 0 : index
    %9 = vector.load %arg4[%c0_7, %c0_8] : memref<1x16xf32, #tpu.memory_space<vmem>>, vector<1x16xf32>
    %10 = vector.broadcast %9 : vector<1x16xf32> to vector<16x16xf32>
    %11 = arith.addf %8, %10 : vector<16x16xf32>
    %cst_9 = arith.constant 0.000000e+00 : f32
    %12 = vector.broadcast %cst_9 : f32 to vector<16x16xf32>
    %13 = arith.maximumf %11, %12 : vector<16x16xf32>
    %cst_10 = arith.constant 0.000000e+00 : f32
    %14 = vector.broadcast %cst_10 : f32 to vector<6x8x16xf32>
    %c0_11 = arith.constant 0 : index
    %c0_12 = arith.constant 0 : index
    %c0_13 = arith.constant 0 : index
    %15 = vector.load %arg9[%c0_11, %c0_12, %c0_13] : memref<6x8x16xf32, #tpu.memory_space<vmem>>, vector<6x8x16xf32>
    tpu.vector_store %arg9[%c0_11, %c0_12, %c0_13], %14 {strides = array<i32>} : memref<6x8x16xf32, #tpu.memory_space<vmem>>, vector<6x8x16xf32>,
    %16 = vector.shape_cast %13 : vector<16x16xf32> to vector<4x4x16xf32>
    %c1 = arith.constant 1 : index
    %c1_14 = arith.constant 1 : index
    %c0_15 = arith.constant 0 : index
    %17 = vector.load %arg9[%c1, %c1_14, %c0_15] : memref<6x8x16xf32, #tpu.memory_space<vmem>>, vector<4x4x16xf32>
    tpu.vector_store %arg9[%c1, %c1_14, %c0_15], %16 {strides = array<i32>} : memref<6x8x16xf32, #tpu.memory_space<vmem>>, vector<4x4x16xf32>,
    %cst_16 = arith.constant 0.000000e+00 : f32
    %18 = vector.broadcast %cst_16 : f32 to vector<16x128xf32>
    %c0_17 = arith.constant 0 : index
    %c0_18 = arith.constant 0 : index
    %c0_19 = arith.constant 0 : index
    %19 = vector.load %arg9[%c0_17, %c0_18, %c0_19] : memref<6x8x16xf32, #tpu.memory_space<vmem>>, vector<4x4x16xf32>
    %20 = vector.shape_cast %19 : vector<4x4x16xf32> to vector<16x16xf32>
    %21 = arith.truncf %20 : vector<16x16xf32> to vector<16x16xbf16>
    %c0_20 = arith.constant 0 : index
    %c0_21 = arith.constant 0 : index
    %c0_22 = arith.constant 0 : index
    %22 = vector.load %arg5[%c0_20, %c0_21, %c0_22] : memref<9x16x128xbf16, #tpu.memory_space<vmem>>, vector<1x16x128xbf16>
    %23 = vector.shape_cast %22 : vector<1x16x128xbf16> to vector<16x128xbf16>
    %cst_23 = arith.constant dense<0.000000e+00> : vector<16x128xf32>
    %24 = tpu.matmul %21, %23, %cst_23 {dimension_numbers = #tpu.dot_dimension_numbers<[1], [0], [0], [1], [0, 0, 1, 1], [], []>} : vector<16x16xbf16>, vector<16x128xbf16>, vector<16x128xf32> -> vector<16x128xf32>
    %25 = arith.addf %18, %24 : vector<16x128xf32>
    %c0_24 = arith.constant 0 : index
    %c1_25 = arith.constant 1 : index
    %c0_26 = arith.constant 0 : index
    %26 = vector.load %arg9[%c0_24, %c1_25, %c0_26] : memref<6x8x16xf32, #tpu.memory_space<vmem>>, vector<4x4x16xf32>
    %27 = vector.shape_cast %26 : vector<4x4x16xf32> to vector<16x16xf32>
    %28 = arith.truncf %27 : vector<16x16xf32> to vector<16x16xbf16>
    %c1_27 = arith.constant 1 : index
    %c0_28 = arith.constant 0 : index
    %c0_29 = arith.constant 0 : index
    %29 = vector.load %arg5[%c1_27, %c0_28, %c0_29] : memref<9x16x128xbf16, #tpu.memory_space<vmem>>, vector<1x16x128xbf16>
    %30 = vector.shape_cast %29 : vector<1x16x128xbf16> to vector<16x128xbf16>
    %cst_30 = arith.constant dense<0.000000e+00> : vector<16x128xf32>
    %31 = tpu.matmul %28, %30, %cst_30 {dimension_numbers = #tpu.dot_dimension_numbers<[1], [0], [0], [1], [0, 0, 1, 1], [], []>} : vector<16x16xbf16>, vector<16x128xbf16>, vector<16x128xf32> -> vector<16x128xf32>
    %32 = arith.addf %25, %31 : vector<16x128xf32>
    %c0_31 = arith.constant 0 : index
    %c2 = arith.constant 2 : index
    %c0_32 = arith.constant 0 : index
    %33 = vector.load %arg9[%c0_31, %c2, %c0_32] : memref<6x8x16xf32, #tpu.memory_space<vmem>>, vector<4x4x16xf32>
    %34 = vector.shape_cast %33 : vector<4x4x16xf32> to vector<16x16xf32>
    %35 = arith.truncf %34 : vector<16x16xf32> to vector<16x16xbf16>
    %c2_33 = arith.constant 2 : index
    %c0_34 = arith.constant 0 : index
    %c0_35 = arith.constant 0 : index
    %36 = vector.load %arg5[%c2_33, %c0_34, %c0_35] : memref<9x16x128xbf16, #tpu.memory_space<vmem>>, vector<1x16x128xbf16>
    %37 = vector.shape_cast %36 : vector<1x16x128xbf16> to vector<16x128xbf16>
    %cst_36 = arith.constant dense<0.000000e+00> : vector<16x128xf32>
    %38 = tpu.matmul %35, %37, %cst_36 {dimension_numbers = #tpu.dot_dimension_numbers<[1], [0], [0], [1], [0, 0, 1, 1], [], []>} : vector<16x16xbf16>, vector<16x128xbf16>, vector<16x128xf32> -> vector<16x128xf32>
    %39 = arith.addf %32, %38 : vector<16x128xf32>
    %c1_37 = arith.constant 1 : index
    %c0_38 = arith.constant 0 : index
    %c0_39 = arith.constant 0 : index
    %40 = vector.load %arg9[%c1_37, %c0_38, %c0_39] : memref<6x8x16xf32, #tpu.memory_space<vmem>>, vector<4x4x16xf32>
    %41 = vector.shape_cast %40 : vector<4x4x16xf32> to vector<16x16xf32>
    %42 = arith.truncf %41 : vector<16x16xf32> to vector<16x16xbf16>
    %c3 = arith.constant 3 : index
    %c0_40 = arith.constant 0 : index
    %c0_41 = arith.constant 0 : index
    %43 = vector.load %arg5[%c3, %c0_40, %c0_41] : memref<9x16x128xbf16, #tpu.memory_space<vmem>>, vector<1x16x128xbf16>
    %44 = vector.shape_cast %43 : vector<1x16x128xbf16> to vector<16x128xbf16>
    %cst_42 = arith.constant dense<0.000000e+00> : vector<16x128xf32>
    %45 = tpu.matmul %42, %44, %cst_42 {dimension_numbers = #tpu.dot_dimension_numbers<[1], [0], [0], [1], [0, 0, 1, 1], [], []>} : vector<16x16xbf16>, vector<16x128xbf16>, vector<16x128xf32> -> vector<16x128xf32>
    %46 = arith.addf %39, %45 : vector<16x128xf32>
    %c1_43 = arith.constant 1 : index
    %c1_44 = arith.constant 1 : index
    %c0_45 = arith.constant 0 : index
    %47 = vector.load %arg9[%c1_43, %c1_44, %c0_45] : memref<6x8x16xf32, #tpu.memory_space<vmem>>, vector<4x4x16xf32>
    %48 = vector.shape_cast %47 : vector<4x4x16xf32> to vector<16x16xf32>
    %49 = arith.truncf %48 : vector<16x16xf32> to vector<16x16xbf16>
    %c4 = arith.constant 4 : index
    %c0_46 = arith.constant 0 : index
    %c0_47 = arith.constant 0 : index
    %50 = vector.load %arg5[%c4, %c0_46, %c0_47] : memref<9x16x128xbf16, #tpu.memory_space<vmem>>, vector<1x16x128xbf16>
    %51 = vector.shape_cast %50 : vector<1x16x128xbf16> to vector<16x128xbf16>
    %cst_48 = arith.constant dense<0.000000e+00> : vector<16x128xf32>
    %52 = tpu.matmul %49, %51, %cst_48 {dimension_numbers = #tpu.dot_dimension_numbers<[1], [0], [0], [1], [0, 0, 1, 1], [], []>} : vector<16x16xbf16>, vector<16x128xbf16>, vector<16x128xf32> -> vector<16x128xf32>
    %53 = arith.addf %46, %52 : vector<16x128xf32>
    %c1_49 = arith.constant 1 : index
    %c2_50 = arith.constant 2 : index
    %c0_51 = arith.constant 0 : index
    %54 = vector.load %arg9[%c1_49, %c2_50, %c0_51] : memref<6x8x16xf32, #tpu.memory_space<vmem>>, vector<4x4x16xf32>
    %55 = vector.shape_cast %54 : vector<4x4x16xf32> to vector<16x16xf32>
    %56 = arith.truncf %55 : vector<16x16xf32> to vector<16x16xbf16>
    %c5 = arith.constant 5 : index
    %c0_52 = arith.constant 0 : index
    %c0_53 = arith.constant 0 : index
    %57 = vector.load %arg5[%c5, %c0_52, %c0_53] : memref<9x16x128xbf16, #tpu.memory_space<vmem>>, vector<1x16x128xbf16>
    %58 = vector.shape_cast %57 : vector<1x16x128xbf16> to vector<16x128xbf16>
    %cst_54 = arith.constant dense<0.000000e+00> : vector<16x128xf32>
    %59 = tpu.matmul %56, %58, %cst_54 {dimension_numbers = #tpu.dot_dimension_numbers<[1], [0], [0], [1], [0, 0, 1, 1], [], []>} : vector<16x16xbf16>, vector<16x128xbf16>, vector<16x128xf32> -> vector<16x128xf32>
    %60 = arith.addf %53, %59 : vector<16x128xf32>
    %c2_55 = arith.constant 2 : index
    %c0_56 = arith.constant 0 : index
    %c0_57 = arith.constant 0 : index
    %61 = vector.load %arg9[%c2_55, %c0_56, %c0_57] : memref<6x8x16xf32, #tpu.memory_space<vmem>>, vector<4x4x16xf32>
    %62 = vector.shape_cast %61 : vector<4x4x16xf32> to vector<16x16xf32>
    %63 = arith.truncf %62 : vector<16x16xf32> to vector<16x16xbf16>
    %c6 = arith.constant 6 : index
    %c0_58 = arith.constant 0 : index
    %c0_59 = arith.constant 0 : index
    %64 = vector.load %arg5[%c6, %c0_58, %c0_59] : memref<9x16x128xbf16, #tpu.memory_space<vmem>>, vector<1x16x128xbf16>
    %65 = vector.shape_cast %64 : vector<1x16x128xbf16> to vector<16x128xbf16>
    %cst_60 = arith.constant dense<0.000000e+00> : vector<16x128xf32>
    %66 = tpu.matmul %63, %65, %cst_60 {dimension_numbers = #tpu.dot_dimension_numbers<[1], [0], [0], [1], [0, 0, 1, 1], [], []>} : vector<16x16xbf16>, vector<16x128xbf16>, vector<16x128xf32> -> vector<16x128xf32>
    %67 = arith.addf %60, %66 : vector<16x128xf32>
    %c2_61 = arith.constant 2 : index
    %c1_62 = arith.constant 1 : index
    %c0_63 = arith.constant 0 : index
    %68 = vector.load %arg9[%c2_61, %c1_62, %c0_63] : memref<6x8x16xf32, #tpu.memory_space<vmem>>, vector<4x4x16xf32>
    %69 = vector.shape_cast %68 : vector<4x4x16xf32> to vector<16x16xf32>
    %70 = arith.truncf %69 : vector<16x16xf32> to vector<16x16xbf16>
    %c7 = arith.constant 7 : index
    %c0_64 = arith.constant 0 : index
    %c0_65 = arith.constant 0 : index
    %71 = vector.load %arg5[%c7, %c0_64, %c0_65] : memref<9x16x128xbf16, #tpu.memory_space<vmem>>, vector<1x16x128xbf16>
    %72 = vector.shape_cast %71 : vector<1x16x128xbf16> to vector<16x128xbf16>
    %cst_66 = arith.constant dense<0.000000e+00> : vector<16x128xf32>
    %73 = tpu.matmul %70, %72, %cst_66 {dimension_numbers = #tpu.dot_dimension_numbers<[1], [0], [0], [1], [0, 0, 1, 1], [], []>} : vector<16x16xbf16>, vector<16x128xbf16>, vector<16x128xf32> -> vector<16x128xf32>
    %74 = arith.addf %67, %73 : vector<16x128xf32>
    %c2_67 = arith.constant 2 : index
    %c2_68 = arith.constant 2 : index
    %c0_69 = arith.constant 0 : index
    %75 = vector.load %arg9[%c2_67, %c2_68, %c0_69] : memref<6x8x16xf32, #tpu.memory_space<vmem>>, vector<4x4x16xf32>
    %76 = vector.shape_cast %75 : vector<4x4x16xf32> to vector<16x16xf32>
    %77 = arith.truncf %76 : vector<16x16xf32> to vector<16x16xbf16>
    %c8 = arith.constant 8 : index
    %c0_70 = arith.constant 0 : index
    %c0_71 = arith.constant 0 : index
    %78 = vector.load %arg5[%c8, %c0_70, %c0_71] : memref<9x16x128xbf16, #tpu.memory_space<vmem>>, vector<1x16x128xbf16>
    %79 = vector.shape_cast %78 : vector<1x16x128xbf16> to vector<16x128xbf16>
    %cst_72 = arith.constant dense<0.000000e+00> : vector<16x128xf32>
    %80 = tpu.matmul %77, %79, %cst_72 {dimension_numbers = #tpu.dot_dimension_numbers<[1], [0], [0], [1], [0, 0, 1, 1], [], []>} : vector<16x16xbf16>, vector<16x128xbf16>, vector<16x128xf32> -> vector<16x128xf32>
    %81 = arith.addf %74, %80 : vector<16x128xf32>
    %c0_73 = arith.constant 0 : index
    %c0_74 = arith.constant 0 : index
    %82 = vector.load %arg6[%c0_73, %c0_74] : memref<1x128xf32, #tpu.memory_space<vmem>>, vector<1x128xf32>
    %83 = vector.broadcast %82 : vector<1x128xf32> to vector<16x128xf32>
    %84 = arith.mulf %81, %83 : vector<16x128xf32>
    %c0_75 = arith.constant 0 : index
    %c0_76 = arith.constant 0 : index
    %85 = vector.load %arg7[%c0_75, %c0_76] : memref<1x128xf32, #tpu.memory_space<vmem>>, vector<1x128xf32>
    %86 = vector.broadcast %85 : vector<1x128xf32> to vector<16x128xf32>
    %87 = arith.addf %84, %86 : vector<16x128xf32>
    %cst_77 = arith.constant 0.000000e+00 : f32
    %88 = vector.broadcast %cst_77 : f32 to vector<16x128xf32>
    %89 = arith.maximumf %87, %88 : vector<16x128xf32>
    %90 = arith.addf %89, %3 : vector<16x128xf32>
    %cst_78 = arith.constant 0.000000e+00 : f32
    %91 = vector.broadcast %cst_78 : f32 to vector<16x128xf32>
    %92 = arith.maximumf %90, %91 : vector<16x128xf32>
    %93 = vector.shape_cast %92 : vector<16x128xf32> to vector<4x4x128xf32>
    %94 = arith.truncf %93 : vector<4x4x128xf32> to vector<4x4x128xbf16>
    %c0_79 = arith.constant 0 : index
    %c0_80 = arith.constant 0 : index
    %c0_81 = arith.constant 0 : index
    %c0_82 = arith.constant 0 : index
    %95 = vector.load %arg8[%c0_79, %c0_80, %c0_81, %c0_82] : memref<1x4x4x128xbf16, #tpu.memory_space<vmem>>, vector<1x4x4x128xbf16>
    %96 = vector.shape_cast %95 : vector<1x4x4x128xbf16> to vector<4x4x128xbf16>
    %97 = vector.shape_cast %94 : vector<4x4x128xbf16> to vector<1x4x4x128xbf16>
    tpu.vector_store %arg8[%c0_79, %c0_80, %c0_81, %c0_82], %97 {strides = array<i32>} : memref<1x4x4x128xbf16, #tpu.memory_space<vmem>>, vector<1x4x4x128xbf16>,
    return
  }
  func.func @transform_0(%arg0: i32) -> (i32, i32, i32, i32) {
    %c0_i32 = arith.constant 0 : i32
    %c0_i32_0 = arith.constant 0 : i32
    %c0_i32_1 = arith.constant 0 : i32
    %c0_i32_2 = arith.constant 0 : i32
    return %arg0, %c0_i32, %c0_i32_0, %c0_i32_1 : i32, i32, i32, i32
  }
  func.func @transform_1(%arg0: i32) -> (i32, i32) {
    %c0_i32 = arith.constant 0 : i32
    %c0_i32_0 = arith.constant 0 : i32
    %c0_i32_1 = arith.constant 0 : i32
    return %c0_i32, %c0_i32_0 : i32, i32
  }
  func.func @transform_2(%arg0: i32) -> (i32, i32) {
    %c0_i32 = arith.constant 0 : i32
    %c0_i32_0 = arith.constant 0 : i32
    %c0_i32_1 = arith.constant 0 : i32
    return %c0_i32, %c0_i32_0 : i32, i32
  }
  func.func @transform_3(%arg0: i32) -> (i32, i32) {
    %c0_i32 = arith.constant 0 : i32
    %c0_i32_0 = arith.constant 0 : i32
    %c0_i32_1 = arith.constant 0 : i32
    return %c0_i32, %c0_i32_0 : i32, i32
  }
  func.func @transform_4(%arg0: i32) -> (i32, i32, i32) {
    %c0_i32 = arith.constant 0 : i32
    %c0_i32_0 = arith.constant 0 : i32
    %c0_i32_1 = arith.constant 0 : i32
    %c0_i32_2 = arith.constant 0 : i32
    return %c0_i32, %c0_i32_0, %c0_i32_1 : i32, i32, i32
  }
  func.func @transform_5(%arg0: i32) -> (i32, i32) {
    %c0_i32 = arith.constant 0 : i32
    %c0_i32_0 = arith.constant 0 : i32
    %c0_i32_1 = arith.constant 0 : i32
    return %c0_i32, %c0_i32_0 : i32, i32
  }
  func.func @transform_6(%arg0: i32) -> (i32, i32) {
    %c0_i32 = arith.constant 0 : i32
    %c0_i32_0 = arith.constant 0 : i32
    %c0_i32_1 = arith.constant 0 : i32
    return %c0_i32, %c0_i32_0 : i32, i32
  }
  func.func @transform_7(%arg0: i32) -> (i32, i32, i32, i32) {
    %c0_i32 = arith.constant 0 : i32
    %c0_i32_0 = arith.constant 0 : i32
    %c0_i32_1 = arith.constant 0 : i32
    %c0_i32_2 = arith.constant 0 : i32
    return %arg0, %c0_i32, %c0_i32_0, %c0_i32_1 : i32, i32, i32, i32
  }
}

</mosaic_0001>

<bundles_post_ra>
// kernel: resnet_forward.7
= control target key start
LH: loop header
LB: loop body
LE: loop exit
PB: predicated region body
PF: predicated region fallthrough
CT: control target
= control target key end

     0   :  { %s1959_s24 = smov 0   ;;  %s2164_s0 = inlined_call_operand.vmem [shape: bf16[2,8,8,128], index: 0, kind: input, shape index: {}]   ;;  %s2165_s1 = inlined_call_operand.vmem [shape: bf16[128,8], index: 1, kind: input, shape index: {}]   ;;  %s2166_s2 = inlined_call_operand.vmem [shape: f32[1,8], index: 2, kind: input, shape index: {}]   ;;  %s2167_s3 = inlined_call_operand.vmem [shape: f32[1,8], index: 3, kind: input, shape index: {}]   ;;  %s2168_s4 = inlined_call_operand.vmem [shape: bf16[9,8,128], index: 4, kind: input, shape index: {}]   ;;  %s2169_s5 = inlined_call_operand.vmem [shape: f32[1,128], index: 5, kind: input, shape index: {}]   ;;  %s2170_s6 = inlined_call_operand.vmem [shape: f32[1,128], index: 6, kind: input, shape index: {}]   ;;  %s2171_s7 = inlined_call_operand.vmem [shape: bf16[2,8,8,128], index: 7, kind: output, shape index: {}]  }
   0x1 LB: > { %s1545_s25 = sadd.s32 4294967295, %s1916_s24   ;;  %p1549_p0 = scmp.ge.s32.totalorder %s1916_s24, 1  ;;  %s1916_s24 = sphi %s1959_s24, %s17_s24  }
   0x2   : > { %p237_p1 = scmp.lt.s32.totalorder %s1916_s24, 3 }
   0x4   : > { %p238_p2 = pnand %p1549_p0, %p237_p1 }
   0x5   : > { %v1894_v0 = vld [vmem:[%s2165_s1] sm:$0xff] (!%p238_p2)   ;;  %p269_p3 = scmp.lt.s32.totalorder (!%p238_p2), %s1545_s25, 1  ;;  %v1895_v1 = vld [vmem:[%s2165_s1 + $0x8] sm:$0xff] (!%p238_p2)   ;;  %v1896_v2 = vld [vmem:[%s2165_s1 + $0x10] sm:$0xff] (!%p238_p2)   ;;  %vm487_vm0 = vcmask (!%p238_p2), 64512   ;;  %v1918_v12 = vmov (!%p238_p2), 0.0  }
   0x6   : > { %241 = sbr.rel (%p238_p2) target bundleno = 589 (0x24d), region = 48  ;;  %1698 = vmatprep.subr.bf16.mxu0 (!%p238_p2), %v1894_v0  ;;  %v1897_v3 = vld [vmem:[%s2165_s1 + $0x18] sm:$0xff] (!%p238_p2)   ;;  %v1898_v5 = vld [vmem:[%s2165_s1 + $0x20] sm:$0xff] (!%p238_p2)   ;;  %v1899_v6 = vld [vmem:[%s2165_s1 + $0x28] sm:$0xff] (!%p238_p2)   ;;  %494 = vst.msk [vmem:[#allocation2 + $0x30] sm:$0xff] (!%p238_p2), %vm487_vm0, %v1918_v12  ;;  %vm556_vm1 = vcmask (!%p238_p2), 1043456  }
   0x7   : > { %1699 = vmatpush3.bf16.msra.mxu0 (!%p238_p2), %v1894_v0  ;;  %v1900_v7 = vld [vmem:[%s2165_s1 + $0x30] sm:$0xff] (!%p238_p2)   ;;  %v1901_v8 = vld [vmem:[%s2165_s1 + $0x38] sm:$0xff] (!%p238_p2)   ;;  %495 = vst.msk [vmem:[#allocation2 + $0x38] sm:$0xff] (!%p238_p2), %vm487_vm0, %v1918_v12  ;;  %488 = vst.msk [vmem:[#allocation2] sm:$0xff] (!%p238_p2), %vm487_vm0, %v1918_v12 }
   0x8   : > { %1700 = vmatprep.subr.bf16.mxu0 (!%p238_p2), %v1895_v1  ;;  %489 = vst.msk [vmem:[#allocation2 + $0x8] sm:$0xff] (!%p238_p2), %vm487_vm0, %v1918_v12  ;;  %490 = vst.msk [vmem:[#allocation2 + $0x10] sm:$0xff] (!%p238_p2), %vm487_vm0, %v1918_v12  ;;  %v1568_v13 = vld [vmem:[%s2168_s4 + $0x4] sm:$0xf] (!%p238_p2)  ;;  %v1582_v14 = vld [vmem:[%s2168_s4 + $0xc] sm:$0xf] (!%p238_p2) }
   0x9   : > { %491 = vst.msk [vmem:[#allocation2 + $0x18] sm:$0xff] (!%p238_p2), %vm487_vm0, %v1918_v12  ;;  %492 = vst.msk [vmem:[#allocation2 + $0x20] sm:$0xff] (!%p238_p2), %vm487_vm0, %v1918_v12  ;;  %v558_v15 = vsel (!%p238_p2), %vm556_vm1, %v1568_v13, 0  ;;  %1879 = vmatprep.subr.msk.bf16.mxu1 (!%p238_p2), %vm556_vm1, %v1582_v14  ;;  %v834_v16 = vsel (!%p238_p2), %vm556_vm1, %v1582_v14, 0  ;;  %v1587_v17 = vld [vmem:[%s2168_s4 + $0x10] sm:$0xf] (!%p238_p2) }
   0xa   : > { %493 = vst.msk [vmem:[#allocation2 + $0x28] sm:$0xff] (!%p238_p2), %vm487_vm0, %v1918_v12  ;;  %496 = vst.msk [vmem:[#allocation2 + $0x40] sm:$0xff] (!%p238_p2), %vm487_vm0, %v1918_v12  ;;  %1753 = vmatpush3.bf16.msra.mxu1 (!%p238_p2), %v834_v16  ;;  %v529_v18 = vld [vmem:[%s2168_s4] sm:$0xf] (!%p238_p2) }
   0xb   : > { %1701 = vmatpush3.bf16.msra.mxu0 (!%p238_p2), %v1895_v1  ;;  %497 = vst.msk [vmem:[#allocation2 + $0x48] sm:$0xff] (!%p238_p2), %vm487_vm0, %v1918_v12  ;;  %498 = vst.msk [vmem:[#allocation2 + $0x50] sm:$0xff] (!%p238_p2), %vm487_vm0, %v1918_v12  ;;  %1880 = vmatprep.subr.msk.bf16.mxu1 (!%p238_p2), %vm556_vm1, %v1587_v17  ;;  %v1566_v19 = vld [vmem:[%s2166_s2] ss:$0 sm:$0xff] (!%p238_p2)  ;;  %v638_v0 = vsel (!%p238_p2), %vm556_vm1, %v529_v18, 0 }
   0xc   : > { %1702 = vmatprep.subr.bf16.mxu0 (!%p238_p2), %v1896_v2  ;;  %499 = vst.msk [vmem:[#allocation2 + $0x58] sm:$0xff] (!%p238_p2), %vm487_vm0, %v1918_v12  ;;  %500 = vst.msk [vmem:[#allocation2 + $0x60] sm:$0xff] (!%p238_p2), %vm487_vm0, %v1918_v12  ;;  %v1567_v21 = vld [vmem:[%s2167_s3] ss:$0 sm:$0xff] (!%p238_p2) }
   0xd   : > { %s2173_s25 = smov (!%p269_p3, %s1545_s25), 1  ;;  %501 = vst.msk [vmem:[#allocation2 + $0x68] sm:$0xff] %vm487_vm0, %v1918_v12  ;;  %502 = vst.msk [vmem:[#allocation2 + $0x70] sm:$0xff] %vm487_vm0, %v1918_v12 }
   0xe   : > { %s1616_s9 = sshll.u32 %s2173_s25, 5  ;;  %503 = vst.msk [vmem:[#allocation2 + $0x78] sm:$0xff] %vm487_vm0, %v1918_v12  ;;  %504 = vst.msk [vmem:[#allocation2 + $0x80] sm:$0xff] %vm487_vm0, %v1918_v12 }
   0xf   : > { %s273_s12 = scalar_lea.vmem %s2164_s0, %s1616_s9  ;;  %1703 = vmatpush3.bf16.msra.mxu0 %v1896_v2  ;;  %505 = vst.msk [vmem:[#allocation2 + $0x88] sm:$0xff] %vm487_vm0, %v1918_v12  ;;  %506 = vst.msk [vmem:[#allocation2 + $0x90] sm:$0xff] %vm487_vm0, %v1918_v12  ;;  %v530_v49 = vld [vmem:[#allocation2 + $0x1] sm:$0xff]  ;;  %v936_v2 = vsel %vm556_vm1, %v1587_v17, 0  ;;  %s278_s11 = scalar_lea.vmem %s2171_s7, %s1616_s9 }
  0x10   : > { %v1987_v4 = vld [vmem:[%s273_s12] sm:$0xff]   ;;  %1704 = vmatprep.subr.bf16.mxu0 %v1897_v3  ;;  %v2002_v9 = vld [vmem:[%s273_s12 + $0x8] sm:$0xff]   ;;  %v2004_v10 = vld [vmem:[%s273_s12 + $0x10] sm:$0xff]   ;;  %507 = vst.msk [vmem:[#allocation2 + $0x98] sm:$0xff] %vm487_vm0, %v1918_v12 }
  0x11   : > { %1714 = vmatprep.mubr.bf16.mxu0 %v1987_v4  ;;  %v2008_v11 = vld [vmem:[%s273_s12 + $0x18] sm:$0xff]  }
  0x13   : > { %1705 = vmatpush3.bf16.msra.mxu0 %v1897_v3  ;;  %v1577_v3 = vld [vmem:[%s2168_s4 + $0x8] sm:$0xf] }
  0x14   : > { %1706 = vmatprep.subr.bf16.mxu0 %v1898_v5 }
  0x17   : > { %1707 = vmatpush3.bf16.msra.mxu0 %v1898_v5  ;;  %v1592_v5 = vld [vmem:[%s2168_s4 + $0x14] sm:$0xf] }
  0x18   : > { %1708 = vmatprep.subr.bf16.mxu0 %v1899_v6 }
  0x1b   : > { %1709 = vmatpush3.bf16.msra.mxu0 %v1899_v6 }
  0x1c   : > { %1710 = vmatprep.subr.bf16.mxu0 %v1900_v7 }
  0x1f   : > { %1711 = vmatpush3.bf16.msra.mxu0 %v1900_v7 }
  0x20   : > { %1712 = vmatprep.subr.bf16.mxu0 %v1901_v8 }
  0x23   : > { %1713 = vmatpush3.bf16.msra.mxu0 %v1901_v8 }
  0x24   : > { %1876 = vmatprep.subr.msk.bf16.mxu0 %vm556_vm1, %v1568_v13  ;;  %v517_v13 = vld [vmem:[#allocation2] sm:$0xff] }
  0x26   : > { %1715 = vmatmul.mubr.bf16.vlgmr.msra.gmra.mrb[0].mxu0 %v2002_v9 }
  0x27   : > { %1718 = vmatprep.mubr.bf16.mxu0 %v2004_v10  ;;  %1723 = vmatpush3.bf16.msra.mxu0 %v558_v15 }
  0x28   : > { %1877 = vmatprep.subr.msk.bf16.mxu0 %vm556_vm1, %v529_v18 }
  0x2e   : > { %1719 = vmatmul.mubr.bf16.gmra.mrb[4].mxu0 %v2008_v11 }
  0xf9   : > { %v1716_v20 = vpop.f32.mrb[0].mxu0 }
  0xfa   : > { %v458_v22 = vmul.f32 %v1716_v20, %v1566_v19  ;;  %v418_v23 = vpop.f32.mrb[1].mxu0 }
  0xfb   : > { %v456_v24 = vmul.f32 %v1566_v19, %v418_v23  ;;  %v1717_v25 = vpop.f32.mrb[2].mxu0 }
  0xfc   : > { %v473_v26 = vadd.f32 %v1567_v21, %v458_v22  ;;  %v459_v27 = vmul.f32 %v1717_v25, %v1566_v19  ;;  %v421_v28 = vpop.f32.mrb[3].mxu0 }
  0xfd   : > { %v471_v29 = vadd.f32 %v1567_v21, %v456_v24  ;;  %v457_v30 = vmul.f32 %v1566_v19, %v421_v28 }
  0xfe   : > { %v481_v31 = vmax.f32 %v473_v26, 0.0  ;;  %v474_v32 = vadd.f32 %v1567_v21, %v459_v27  ;;  %v1038_v27 = vsel %vm556_vm1, %v1592_v5, 0 }
  0xff   : > { %v479_v33 = vmax.f32 %v471_v29, 0.0  ;;  %v472_v34 = vadd.f32 %v1567_v21, %v457_v30  ;;  %v732_v29 = vsel %vm556_vm1, %v1577_v3, 0  ;;  %v1597_v30 = vld [vmem:[%s2168_s4 + $0x18] sm:$0xf] }
 0x100   : > { %511 = vst.msk [vmem:[#allocation2 + $0x31] sm:$0xff] %vm487_vm0, %v481_v31  ;;  %v482_v35 = vmax.f32 %v474_v32, 0.0  ;;  %v705_v31 = vld [vmem:[#allocation2 + $0x2] sm:$0xff] }
 0x101   : > { %509 = vst.msk [vmem:[#allocation2 + $0x11] sm:$0xff] %vm487_vm0, %v479_v33  ;;  %v480_v36 = vmax.f32 %v472_v34, 0.0  ;;  %v1720_v37 = vpop.f32.mrb[4].mxu0 }
 0x102   : > { %512 = vst.msk [vmem:[#allocation2 + $0x41] sm:$0xff] %vm487_vm0, %v482_v35  ;;  %v462_v38 = vmul.f32 %v1720_v37, %v1566_v19  ;;  %v434_v39 = vpop.f32.mrb[5].mxu0 }
 0x103   : > { %510 = vst.msk [vmem:[#allocation2 + $0x21] sm:$0xff] %vm487_vm0, %v480_v36  ;;  %v460_v40 = vmul.f32 %v1566_v19, %v434_v39  ;;  %v1721_v41 = vpop.f32.mrb[6].mxu0 }
 0x104   : > { %v477_v42 = vadd.f32 %v1567_v21, %v462_v38  ;;  %v463_v43 = vmul.f32 %v1721_v41, %v1566_v19  ;;  %v437_v44 = vpop.f32.mrb[7].mxu0 }
 0x105   : > { %v475_v45 = vadd.f32 %v1567_v21, %v460_v40  ;;  %v461_v46 = vmul.f32 %v1566_v19, %v437_v44 }
 0x106   : > { %v485_v47 = vmax.f32 %v477_v42, 0.0  ;;  %v478_v48 = vadd.f32 %v1567_v21, %v463_v43 }
 0x107   : > { %v483_v50 = vmax.f32 %v475_v45, 0.0  ;;  %v476_v51 = vadd.f32 %v1567_v21, %v461_v46  ;;  %v533_v56 = vld [vmem:[#allocation2 + $0x31] sm:$0xff]  ;;  %v1141_v46 = vsel %vm556_vm1, %v1597_v30, 0 }
 0x108   : > { %515 = vst.msk [vmem:[#allocation2 + $0x71] sm:$0xff] %vm487_vm0, %v485_v47  ;;  %v486_v52 = vmax.f32 %v478_v48, 0.0  ;;  %v531_v53 = vld [vmem:[#allocation2 + $0x11] sm:$0xff]  ;;  %v1602_v48 = vld [vmem:[%s2168_s4 + $0x1c] sm:$0xf] }
 0x109   : > { %513 = vst.msk [vmem:[#allocation2 + $0x51] sm:$0xff] %vm487_vm0, %v483_v50  ;;  %v484_v54 = vmax.f32 %v476_v51, 0.0  ;;  %v538_v55 = vpack.c.bf16 %v531_v53, %v530_v49  ;;  %v810_v57 = vld [vmem:[#allocation2 + $0x40] sm:$0xff]  ;;  %v807_v59 = vld [vmem:[#allocation2 + $0x10] sm:$0xff] }
 0x10a   : > { %516 = vst.msk [vmem:[#allocation2 + $0x81] sm:$0xff] %vm487_vm0, %v486_v52  ;;  %v532_v58 = vld [vmem:[#allocation2 + $0x21] sm:$0xff]  ;;  %v809_v63 = vld [vmem:[#allocation2 + $0x30] sm:$0xff]  ;;  %v525_v21 = vpack.c.bf16 %v807_v59, %v517_v13 }
 0x10b   : > { %v808_v60 = vld [vmem:[#allocation2 + $0x20] sm:$0xff]  ;;  %514 = vst.msk [vmem:[#allocation2 + $0x61] sm:$0xff] %vm487_vm0, %v484_v54  ;;  %1724 = vmatprep.mubr.msk.bf16.mxu0 %vm487_vm0, %v538_v55  ;;  %v2064_v61 = vpack.c.bf16 %v533_v56, %v532_v58  ;;  %v816_v1 = vpack.c.bf16 %v810_v57, %v809_v63  ;;  %v917_v23 = vpack.c.bf16 %v532_v58, %v531_v53  ;;  %v706_v32 = vld [vmem:[#allocation2 + $0x12] sm:$0xff]  ;;  %v1243_v53 = vsel %vm556_vm1, %v1602_v48, 0 }
 0x10c   : > { %v815_v62 = vpack.c.bf16 %v808_v60, %v807_v59  ;;  %v534_v6 = vld [vmem:[#allocation2 + $0x41] sm:$0xff]  ;;  %v526_v24 = vpack.c.bf16 %v809_v63, %v808_v60  ;;  %v713_v36 = vpack.c.bf16 %v706_v32, %v705_v31  ;;  %v708_v41 = vld [vmem:[#allocation2 + $0x32] sm:$0xff]  ;;  %v289_v31 = vunpack.c.h.bf16 %v1987_v4 }
 0x10d   : > { %1725 = vmatmul.mubr.msk.bf16.vlgmr.msra.gmra.mrb[8].mxu0 %vm487_vm0, %v2064_v61  ;;  %v918_v26 = vpack.c.bf16 %v534_v6, %v533_v56  ;;  %v1012_v34 = vld [vmem:[#allocation2 + $0x22] sm:$0xff]  ;;  %v1121_v55 = vld [vmem:[#allocation2 + $0x90] sm:$0xff] }
 0x10e   : > { %1754 = vmatprep.mubr.msk.bf16.mxu1 %vm487_vm0, %v815_v62  ;;  %1733 = vmatpush3.bf16.msra.mxu0 %v638_v0  ;;  %v1019_v38 = vpack.c.bf16 %v1012_v34, %v706_v32  ;;  %v709_v39 = vld [vmem:[#allocation2 + $0x42] sm:$0xff]  ;;  %v714_v43 = vpack.c.bf16 %v708_v41, %v1012_v34  ;;  %v1223_v58 = vld [vmem:[#allocation2 + $0x91] sm:$0xff] }
 0x10f   : > { %1755 = vmatmul.mubr.msk.bf16.vlgmr.msra.gmra.mrb[0].mxu1 %vm487_vm0, %v816_v1  ;;  %1878 = vmatprep.subr.msk.bf16.mxu0 %vm556_vm1, %v1577_v3  ;;  %v537_v12 = vld [vmem:[#allocation2 + $0x71] sm:$0xff]  ;;  %v1020_v45 = vpack.c.bf16 %v709_v39, %v708_v41  ;;  %v1607_v54 = vld [vmem:[%s2168_s4 + $0x20] sm:$0xf] }
 0x110   : > { %1763 = vmatpush3.bf16.msra.mxu1 %v936_v2  ;;  %v535_v7 = vld [vmem:[#allocation2 + $0x51] sm:$0xff] }
 0x111   : > { %1881 = vmatprep.subr.msk.bf16.mxu1 %vm556_vm1, %v1592_v5  ;;  %v2080_v8 = vpack.c.bf16 %v535_v7, %v534_v6  ;;  %v2082_v14 = vld [vmem:[#allocation2 + $0x80] sm:$0xff]  ;;  %v811_v16 = vld [vmem:[#allocation2 + $0x50] sm:$0xff] }
 0x112   : > { %v536_v15 = vld [vmem:[#allocation2 + $0x61] sm:$0xff]  ;;  %v813_v20 = vld [vmem:[#allocation2 + $0x70] sm:$0xff]  ;;  %v527_v25 = vpack.c.bf16 %v811_v16, %v810_v57  ;;  %v1125_v56 = vpack.c.bf16 %v1121_v55, %v2082_v14  ;;  %v1345_v57 = vsel %vm556_vm1, %v1607_v54, 0 }
 0x113   : > { %v812_v17 = vld [vmem:[#allocation2 + $0x60] sm:$0xff]  ;;  %1728 = vmatprep.mubr.msk.bf16.mxu0 %vm487_vm0, %v2080_v8  ;;  %v2086_v18 = vpack.c.bf16 %v537_v12, %v536_v15  ;;  %v818_v22 = vpack.c.bf16 %v2082_v14, %v813_v20  ;;  %v919_v28 = vpack.c.bf16 %v536_v15, %v535_v7  ;;  %v710_v40 = vld [vmem:[#allocation2 + $0x52] sm:$0xff] }
 0x114   : > { %v817_v19 = vpack.c.bf16 %v812_v17, %v811_v16  ;;  %v916_v33 = vld [vmem:[#allocation2 + $0x81] sm:$0xff]  ;;  %v528_v35 = vpack.c.bf16 %v813_v20, %v812_v17  ;;  %v715_v44 = vpack.c.bf16 %v710_v40, %v709_v39  ;;  %v712_v50 = vld [vmem:[#allocation2 + $0x72] sm:$0xff]  ;;  %v1613_v14 = vld [vmem:[%s2170_s6] ss:$0 sm:$0xff] }
 0x115   : > { %1729 = vmatmul.mubr.msk.bf16.gmra.mrb[12].mxu0 %vm487_vm0, %v2086_v18  ;;  %v920_v37 = vpack.c.bf16 %v916_v33, %v537_v12  ;;  %v1016_v42 = vld [vmem:[#allocation2 + $0x62] sm:$0xff]  ;;  %v1227_v59 = vpack.c.bf16 %v1223_v58, %v916_v33  ;;  %v1325_v60 = vld [vmem:[#allocation2 + $0x92] sm:$0xff]  ;;  %v295_v58 = vunpack.c.h.bf16 %v2008_v11 }
 0x116   : > { %1758 = vmatprep.mubr.msk.bf16.mxu1 %vm487_vm0, %v817_v19  ;;  %1734 = vmatprep.mubr.msk.bf16.mxu0 %vm487_vm0, %v525_v21  ;;  %v1021_v47 = vpack.c.bf16 %v1016_v42, %v710_v40  ;;  %v1018_v49 = vld [vmem:[#allocation2 + $0x82] sm:$0xff]  ;;  %v716_v51 = vpack.c.bf16 %v712_v50, %v1016_v42 }
 0x117   : > { %1759 = vmatmul.mubr.msk.bf16.gmra.mrb[4].mxu1 %vm487_vm0, %v818_v22  ;;  %v1022_v52 = vpack.c.bf16 %v1018_v49, %v712_v50  ;;  %v290_v22 = vunpack.c.l.bf16 %v2002_v9 }
 0x118   : > { %1764 = vmatprep.mubr.msk.bf16.mxu1 %vm487_vm0, %v917_v23 }
 0x11d   : > { %1735 = vmatmul.mubr.msk.bf16.vlgmr.msra.gmra.mrb[8].mxu0 %vm487_vm0, %v526_v24 }
 0x11e   : > { %1738 = vmatprep.mubr.msk.bf16.mxu0 %vm487_vm0, %v527_v25  ;;  %1743 = vmatpush3.bf16.msra.mxu0 %v732_v29 }
 0x11f   : > { %1765 = vmatmul.mubr.msk.bf16.vlgmr.msra.gmra.mrb[0].mxu1 %vm487_vm0, %v918_v26 }
 0x120   : > { %1773 = vmatpush3.bf16.msra.mxu1 %v1038_v27  ;;  %1768 = vmatprep.mubr.msk.bf16.mxu1 %vm487_vm0, %v919_v28  ;;  %v291_v28 = vunpack.c.h.bf16 %v2002_v9 }
 0x121   : > { %1882 = vmatprep.subr.msk.bf16.mxu1 %vm556_vm1, %v1597_v30 }
 0x125   : > { %1739 = vmatmul.mubr.msk.bf16.gmra.mrb[12].mxu0 %vm487_vm0, %v528_v35 }
 0x126   : > { %1744 = vmatprep.mubr.msk.bf16.mxu0 %vm487_vm0, %v713_v36 }
 0x127   : > { %1769 = vmatmul.mubr.msk.bf16.gmra.mrb[4].mxu1 %vm487_vm0, %v920_v37 }
 0x128   : > { %1774 = vmatprep.mubr.msk.bf16.mxu1 %vm487_vm0, %v1019_v38 }
 0x12d   : > { %1745 = vmatmul.mubr.msk.bf16.vlgmr.msra.gmra.mrb[8].mxu0 %vm487_vm0, %v714_v43 }
 0x12e   : > { %1748 = vmatprep.mubr.msk.bf16.mxu0 %vm487_vm0, %v715_v44 }
 0x12f   : > { %1775 = vmatmul.mubr.msk.bf16.vlgmr.msra.gmra.mrb[0].mxu1 %vm487_vm0, %v1020_v45 }
 0x130   : > { %1783 = vmatpush3.bf16.msra.mxu1 %v1141_v46  ;;  %1778 = vmatprep.mubr.msk.bf16.mxu1 %vm487_vm0, %v1021_v47 }
 0x131   : > { %1883 = vmatprep.subr.msk.bf16.mxu1 %vm556_vm1, %v1602_v48 }
 0x135   : > { %1749 = vmatmul.mubr.msk.bf16.gmra.mrb[12].mxu0 %vm487_vm0, %v716_v51 }
 0x137   : > { %1779 = vmatmul.mubr.msk.bf16.gmra.mrb[4].mxu1 %vm487_vm0, %v1022_v52 }
 0x138   : > { %1784 = vmatprep.mubr.msk.bf16.mxu1 %vm487_vm0, %v526_v24 }
 0x13f   : > { %1785 = vmatmul.mubr.msk.bf16.vlgmr.msra.gmra.mrb[0].mxu1 %vm487_vm0, %v527_v25  ;;  %v288_v25 = vunpack.c.l.bf16 %v1987_v4  ;;  %v294_v4 = vunpack.c.l.bf16 %v2008_v11 }
 0x140   : > { %1793 = vmatpush3.bf16.msra.mxu1 %v1243_v53  ;;  %1788 = vmatprep.mubr.msk.bf16.mxu1 %vm487_vm0, %v528_v35 }
 0x141   : > { %1884 = vmatprep.subr.msk.bf16.mxu1 %vm556_vm1, %v1607_v54 }
 0x147   : > { %1789 = vmatmul.mubr.msk.bf16.gmra.mrb[4].mxu1 %vm487_vm0, %v1125_v56 }
 0x148   : > { %1794 = vmatprep.mubr.msk.bf16.mxu1 %vm487_vm0, %v2064_v61  ;;  %v1329_v61 = vpack.c.bf16 %v1325_v60, %v1018_v49 }
 0x14f   : > { %1795 = vmatmul.mubr.msk.bf16.vlgmr.msra.gmra.mrb[0].mxu1 %vm487_vm0, %v2080_v8  ;;  %v1612_v8 = vld [vmem:[%s2169_s5] ss:$0 sm:$0xff] }
 0x150   : > { %1803 = vmatpush3.bf16.msra.mxu1 %v1345_v57  ;;  %1798 = vmatprep.mubr.msk.bf16.mxu1 %vm487_vm0, %v2086_v18 }
 0x157   : > { %1799 = vmatmul.mubr.msk.bf16.gmra.mrb[4].mxu1 %vm487_vm0, %v1227_v59 }
 0x158   : > { %1804 = vmatprep.mubr.msk.bf16.mxu1 %vm487_vm0, %v714_v43  ;;  %v292_v43 = vunpack.c.l.bf16 %v2004_v10 }
 0x15f   : > { %1805 = vmatmul.mubr.msk.bf16.vlgmr.msra.gmra.mrb[0].mxu1 %vm487_vm0, %v715_v44 }
 0x160   : > { %1808 = vmatprep.mubr.msk.bf16.mxu1 %vm487_vm0, %v716_v51 }
 0x167   : > { %1809 = vmatmul.mubr.msk.bf16.gmra.mrb[4].mxu1 %vm487_vm0, %v1329_v61 }
 0x200   : > { %v1746_v62 = vpop.f32.mrb[8].mxu0 }
 0x201   : > { %v768_v63 = vpop.f32.mrb[9].mxu0 }
 0x202   : > { %v1747_v0 = vpop.f32.mrb[10].mxu0 }
 0x203   : > { %v771_v1 = vpop.f32.mrb[11].mxu0 }
 0x208   : > { %v1750_v2 = vpop.f32.mrb[12].mxu0 }
 0x209   : > { %v784_v3 = vpop.f32.mrb[13].mxu0 }
 0x20a   : > { %v1751_v5 = vpop.f32.mrb[14].mxu0 }
 0x20b   : > { %v787_v6 = vpop.f32.mrb[15].mxu0 }
 0x232   : > { %v1806_v7 = vpop.f32.mrb[0].mxu1 }
 0x233   : > { %v1812_v12 = vadd.f32 %v1806_v7, %v1746_v62  ;;  %v1381_v13 = vpop.f32.mrb[1].mxu1  ;;  %v293_v62 = vunpack.c.h.bf16 %v2004_v10 }
 0x234   : > { %v1813_v15 = vadd.f32 %v1381_v13, %v768_v63  ;;  %v1807_v16 = vpop.f32.mrb[2].mxu1 }
 0x235   : > { %v1429_v17 = vmul.f32 %v1812_v12, %v1612_v8  ;;  %v1814_v18 = vadd.f32 %v1807_v16, %v1747_v0  ;;  %v1384_v19 = vpop.f32.mrb[3].mxu1 }
 0x236   : > { %v1427_v20 = vmul.f32 %v1813_v15, %v1612_v8  ;;  %v1815_v21 = vadd.f32 %v1384_v19, %v771_v1 }
 0x237   : > { %v1444_v23 = vadd.f32 %v1613_v14, %v1429_v17  ;;  %v1430_v24 = vmul.f32 %v1814_v18, %v1612_v8 }
 0x238   : > { %v1442_v26 = vadd.f32 %v1613_v14, %v1427_v20  ;;  %v1428_v27 = vmul.f32 %v1815_v21, %v1612_v8 }
 0x239   : > { %v1452_v29 = vmax.f32 %v1444_v23, 0.0  ;;  %v1445_v30 = vadd.f32 %v1613_v14, %v1430_v24 }
 0x23a   : > { %v1450_v32 = vmax.f32 %v1442_v26, 0.0  ;;  %v1443_v33 = vadd.f32 %v1613_v14, %v1428_v27  ;;  %v1810_v34 = vpop.f32.mrb[4].mxu1 }
 0x23b   : > { %v1460_v35 = vadd.f32 %v1452_v29, %v290_v22  ;;  %v1453_v36 = vmax.f32 %v1445_v30, 0.0  ;;  %v1816_v37 = vadd.f32 %v1810_v34, %v1750_v2  ;;  %v1397_v38 = vpop.f32.mrb[5].mxu1 }
 0x23c   : > { %v1458_v39 = vadd.f32 %v1450_v32, %v288_v25  ;;  %v1451_v40 = vmax.f32 %v1443_v33, 0.0  ;;  %v1817_v41 = vadd.f32 %v1397_v38, %v784_v3  ;;  %v1811_v42 = vpop.f32.mrb[6].mxu1 }
 0x23d   : > { %v1461_v44 = vadd.f32 %v1453_v36, %v291_v28  ;;  %v1433_v9 = vmul.f32 %v1816_v37, %v1612_v8  ;;  %v1818_v45 = vadd.f32 %v1811_v42, %v1751_v5  ;;  %v1400_v46 = vpop.f32.mrb[7].mxu1  ;;  %v1468_v50 = vmax.f32 %v1460_v35, 0.0 }
 0x23e   : > { %v1459_v47 = vadd.f32 %v1451_v40, %v289_v31  ;;  %v1431_v48 = vmul.f32 %v1817_v41, %v1612_v8  ;;  %v1819_v49 = vadd.f32 %v1400_v46, %v787_v6  ;;  %v1466_v54 = vmax.f32 %v1458_v39, 0.0 }
 0x23f   : > { %v1469_v51 = vmax.f32 %v1461_v44, 0.0  ;;  %v1448_v52 = vadd.f32 %v1613_v14, %v1433_v9  ;;  %v1434_v53 = vmul.f32 %v1818_v45, %v1612_v8 }
 0x240   : > { %v1467_v55 = vmax.f32 %v1459_v47, 0.0  ;;  %v1446_v56 = vadd.f32 %v1613_v14, %v1431_v48  ;;  %v1432_v57 = vmul.f32 %v1819_v49, %v1612_v8 }
 0x241   : > { %v1626_v59 = vpack.c.bf16 %v1469_v51, %v1468_v50  ;;  %v1456_v60 = vmax.f32 %v1448_v52, 0.0  ;;  %v1449_v61 = vadd.f32 %v1613_v14, %v1434_v53 }
 0x242   : > { %v1621_v63 = vpack.c.bf16 %v1467_v55, %v1466_v54  ;;  %v1454_v0 = vmax.f32 %v1446_v56, 0.0  ;;  %v1447_v1 = vadd.f32 %v1613_v14, %v1432_v57 }
 0x243   : > { %1638 = vst [vmem:[%s278_s11 + $0x8] sm:$0xff] %v1626_v59   ;;  %v1464_v2 = vadd.f32 %v1456_v60, %v294_v4  ;;  %v1457_v3 = vmax.f32 %v1449_v61, 0.0 }
 0x244   : > { %1622 = vst [vmem:[%s278_s11] sm:$0xff] %v1621_v63   ;;  %v1462_v5 = vadd.f32 %v1454_v0, %v292_v43  ;;  %v1455_v6 = vmax.f32 %v1447_v1, 0.0 }
 0x245   : > { %v1465_v7 = vadd.f32 %v1457_v3, %v295_v58  ;;  %v1472_v13 = vmax.f32 %v1464_v2, 0.0 }
 0x246   : > { %v1463_v12 = vadd.f32 %v1455_v6, %v293_v62  ;;  %v1470_v15 = vmax.f32 %v1462_v5, 0.0 }
 0x247   : > { %v1473_v8 = vmax.f32 %v1465_v7, 0.0 }
 0x248   : > { %v1471_v11 = vmax.f32 %v1463_v12, 0.0 }
 0x249   : > { %v1636_v16 = vpack.c.bf16 %v1473_v8, %v1472_v13 }
 0x24a   : > { %v1631_v17 = vpack.c.bf16 %v1471_v11, %v1470_v15 }
 0x24b   : > { %1640 = vst [vmem:[%s278_s11 + $0x18] sm:$0xff] %v1636_v16  }
 0x24c   : > { %1639 = vst [vmem:[%s278_s11 + $0x10] sm:$0xff] %v1631_v17  }
 0x24d PF: > { %s17_s24 = sadd.s32 1, %s1916_s24  }
 0x24e   : > { %p14_p4 = scmp.ge.s32.totalorder %s17_s24, 4  }
 0x250   :  { %16 = sbr.rel (!%p14_p4) target bundleno = 1 (0x1), region = 88 }

// kernel: resnet_forward.6
= control target key start
LH: loop header
LB: loop body
LE: loop exit
PB: predicated region body
PF: predicated region fallthrough
CT: control target
= control target key end

     0   :  { %s2584_s17 = smov 0   ;;  %s2586_s18 = smov 0   ;;  %s2953_s0 = inlined_call_operand.vmem [shape: bf16[2,8,2,8,256], index: 0, kind: input, shape index: {}, may-alias: {0,1}]   ;;  %s2954_s1 = inlined_call_operand.vmem [shape: bf16[2,8,2,8,256], index: 1, kind: input, shape index: {}, may-alias: {0,1}]   ;;  %s2955_s2 = inlined_call_operand.vmem [shape: bf16[128,8], index: 2, kind: input, shape index: {}]   ;;  %s2956_s3 = inlined_call_operand.vmem [shape: f32[1,8], index: 3, kind: input, shape index: {}]   ;;  %s2957_s4 = inlined_call_operand.vmem [shape: f32[1,8], index: 4, kind: input, shape index: {}]   ;;  %s2958_s5 = inlined_call_operand.vmem [shape: bf16[9,8,128], index: 5, kind: input, shape index: {}]   ;;  %s2959_s6 = inlined_call_operand.vmem [shape: f32[1,128], index: 6, kind: input, shape index: {}]   ;;  %s2960_s7 = inlined_call_operand.vmem [shape: f32[1,128], index: 7, kind: input, shape index: {}]   ;;  %s2961_s8 = inlined_call_operand.vmem [shape: bf16[128,128], index: 8, kind: input, shape index: {}]   ;;  %s2962_s9 = inlined_call_operand.vmem [shape: f32[1,128], index: 9, kind: input, shape index: {}]   ;;  %s2963_s10 = inlined_call_operand.vmem [shape: f32[1,128], index: 10, kind: input, shape index: {}]   ;;  %s2964_s11 = inlined_call_operand.vmem [shape: bf16[2,8,8,128], index: 11, kind: output, shape index: {}]  }
   0x1   :  { %s2588_s19 = smov 0  }
   0x2 LB: > { %s2057_s20 = sadd.s32 4294967295, %s2521_s19   ;;  %s2601_s21 = sadd.s32 1, %s2521_s19   ;;  %s2521_s19 = sphi %s2588_s19, %s2969_s19   ;;  %s2517_s18 = sphi %s2586_s18, %s2968_s18   ;;  %s2513_s17 = sphi %s2584_s17, %s2967_s17  }
   0x3   : > { %s25_s22 = ssub.s32 %s2521_s19, %s2601_s21  ;;  %s28_s23 = sadd.s32 1, %s2517_s18 }
   0x4   : > { %p26_p0 = scmp.eq.s32.totalorder %s25_s22, 0  ;;  %p35_p1 = scmp.ne.s32.totalorder %s2517_s18, %s2513_s17 }
   0x5   : > { %p36_p2 = scmp.eq.s32.totalorder %s2521_s19, 0  ;;  %p2060_p4 = scmp.ge.s32.totalorder %s2521_s19, 2 }
   0x6   : > { %s2610_s24 = scalar_select %p26_p0, %s2517_s18, %s28_s23  }
   0x7   : > { %p2612_p3 = por %p36_p2, %p35_p1  ;;  %329 = sbr.rel (%p2060_p4) target bundleno = 30 (0x1e), region = 52 }
   0xe   : > { %332 = sbr.rel (!%p2612_p3) target bundleno = 22 (0x16), region = 56  ;;  %s334_s26 = sand.u32 (%p2612_p3), 1, %s2517_s18  }
   0xf   : > { %s2152_s27 = sshll.u32 (%p2612_p3), %s2521_s19, 7  ;;  %s2061_s28 = sshll.u32 (%p2612_p3), %s334_s26, 6 }
  0x10   : > { %s339_s12 = scalar_lea.vmem (%p2612_p3), %s2953_s0, %s2152_s27  ;;  %s336_s13 = scalar_lea.vmem (%p2612_p3), [#allocation3], %s2061_s28 }
  0x11   : > { %v381_v0 = vld [vmem:[%s339_s12] sm:$0xff] (%p2612_p3)  ;;  %v383_v1 = vld [vmem:[%s339_s12 + $0x10] sm:$0xff] (%p2612_p3) }
  0x12   : > { %v385_v2 = vld [vmem:[%s339_s12 + $0x20] sm:$0xff] (%p2612_p3)  ;;  %382 = vst [vmem:[%s336_s13] sm:$0xff] (%p2612_p3), %v381_v0  ;;  %384 = vst [vmem:[%s336_s13 + $0x8] sm:$0xff] (%p2612_p3), %v383_v1  ;;  %v387_v3 = vld [vmem:[%s339_s12 + $0x30] sm:$0xff] (%p2612_p3) }
  0x13   : > { %386 = vst [vmem:[%s336_s13 + $0x10] sm:$0xff] (%p2612_p3), %v385_v2  ;;  %v389_v4 = vld [vmem:[%s339_s12 + $0x40] sm:$0xff] (%p2612_p3)  ;;  %v391_v5 = vld [vmem:[%s339_s12 + $0x50] sm:$0xff] (%p2612_p3)  ;;  %388 = vst [vmem:[%s336_s13 + $0x18] sm:$0xff] (%p2612_p3), %v387_v3 }
  0x14   : > { %390 = vst [vmem:[%s336_s13 + $0x20] sm:$0xff] (%p2612_p3), %v389_v4  ;;  %392 = vst [vmem:[%s336_s13 + $0x28] sm:$0xff] (%p2612_p3), %v391_v5  ;;  %v393_v6 = vld [vmem:[%s339_s12 + $0x60] sm:$0xff] (%p2612_p3)  ;;  %v395_v7 = vld [vmem:[%s339_s12 + $0x70] sm:$0xff] (%p2612_p3) }
  0x15   : > { %394 = vst [vmem:[%s336_s13 + $0x30] sm:$0xff] %v393_v6  ;;  %396 = vst [vmem:[%s336_s13 + $0x38] sm:$0xff] %v395_v7 }
  0x16 PF: > { %402 = sbr.rel (!%p2612_p3) target bundleno = 30 (0x1e), region = 94  ;;  %s404_s14 = sand.u32 (%p2612_p3), 1, %s2517_s18  }
  0x17   : > { %s2153_s15 = sshll.u32 (%p2612_p3), %s2521_s19, 7  ;;  %s2064_s16 = sshll.u32 (%p2612_p3), %s404_s14, 6 }
  0x18   : > { %s2005_s26 = scalar_lea.vmem (%p2612_p3), %s2954_s1, %s2153_s15  ;;  %s406_s27 = scalar_lea.vmem (%p2612_p3), [#allocation4], %s2064_s16 }
  0x19   : > { %v2067_v8 = vld [vmem:[%s2005_s26 + $0x8] sm:$0xff] (%p2612_p3)  ;;  %v2068_v9 = vld [vmem:[%s2005_s26 + $0x18] sm:$0xff] (%p2612_p3) }
  0x1a   : > { %v2069_v10 = vld [vmem:[%s2005_s26 + $0x28] sm:$0xff] (%p2612_p3)  ;;  %453 = vst [vmem:[%s406_s27] sm:$0xff] (%p2612_p3), %v2067_v8  ;;  %455 = vst [vmem:[%s406_s27 + $0x8] sm:$0xff] (%p2612_p3), %v2068_v9  ;;  %v2070_v11 = vld [vmem:[%s2005_s26 + $0x38] sm:$0xff] (%p2612_p3) }
  0x1b   : > { %457 = vst [vmem:[%s406_s27 + $0x10] sm:$0xff] (%p2612_p3), %v2069_v10  ;;  %v2071_v12 = vld [vmem:[%s2005_s26 + $0x48] sm:$0xff] (%p2612_p3)  ;;  %v2072_v13 = vld [vmem:[%s2005_s26 + $0x58] sm:$0xff] (%p2612_p3)  ;;  %459 = vst [vmem:[%s406_s27 + $0x18] sm:$0xff] (%p2612_p3), %v2070_v11 }
  0x1c   : > { %461 = vst [vmem:[%s406_s27 + $0x20] sm:$0xff] (%p2612_p3), %v2071_v12  ;;  %463 = vst [vmem:[%s406_s27 + $0x28] sm:$0xff] (%p2612_p3), %v2072_v13  ;;  %v2073_v14 = vld [vmem:[%s2005_s26 + $0x68] sm:$0xff] (%p2612_p3)  ;;  %v2074_v15 = vld [vmem:[%s2005_s26 + $0x78] sm:$0xff] (%p2612_p3) }
  0x1d   : > { %465 = vst [vmem:[%s406_s27 + $0x30] sm:$0xff] %v2073_v14  ;;  %467 = vst [vmem:[%s406_s27 + $0x38] sm:$0xff] %v2074_v15 }
  0x1e PF: > { %p2075_p5 = scmp.ge.s32.totalorder %s2521_s19, 1  ;;  %p472_p6 = scmp.lt.s32.totalorder %s2521_s19, 3 }
  0x20   : > { %p473_p7 = pnand %p2075_p5, %p472_p6 }
  0x21   : > { %v2483_v16 = vld [vmem:[%s2961_s8] sm:$0xff] (!%p473_p7)   ;;  %s479_s29 = sand.u32 (!%p473_p7), 1, %s2513_s17   ;;  %v2484_v17 = vld [vmem:[%s2961_s8 + $0x8] sm:$0xff] (!%p473_p7)   ;;  %v2485_v18 = vld [vmem:[%s2961_s8 + $0x10] sm:$0xff] (!%p473_p7)   ;;  %vm973_vm0 = vcmask (!%p473_p7), 64512   ;;  %vm1042_vm1 = vcmask (!%p473_p7), 1043456  }
  0x22   : > { %476 = sbr.rel (%p473_p7) target bundleno = 664 (0x298), region = 132  ;;  %2247 = vmatprep.subr.bf16.mxu1 (!%p473_p7), %v2483_v16  ;;  %s2076_s13 = sshll.u32 (!%p473_p7), %s479_s29, 6  ;;  %v2486_v19 = vld [vmem:[%s2961_s8 + $0x18] sm:$0xff] (!%p473_p7)   ;;  %v2487_v28 = vld [vmem:[%s2961_s8 + $0x20] sm:$0xff] (!%p473_p7)   ;;  %v2488_v39 = vld [vmem:[%s2961_s8 + $0x28] sm:$0xff] (!%p473_p7)  }
  0x23   : > { %2248 = vmatpush3.bf16.msra.mxu1 (!%p473_p7), %v2483_v16  ;;  %s2646_s23 = scalar_lea.vmem (!%p473_p7), [#allocation3], %s2076_s13  ;;  %s2650_s17 = scalar_lea.vmem (!%p473_p7), [#allocation4], %s2076_s13  ;;  %v2489_v53 = vld [vmem:[%s2961_s8 + $0x30] sm:$0xff] (!%p473_p7)   ;;  %v2490_v2 = vld [vmem:[%s2961_s8 + $0x38] sm:$0xff] (!%p473_p7)   ;;  %v2491_v11 = vld [vmem:[%s2955_s2] sm:$0xff] (!%p473_p7)  }
  0x24   : > { %2249 = vmatprep.subr.bf16.mxu1 (!%p473_p7), %v2484_v17  ;;  %v535_v20 = vld [vmem:[%s2646_s23] sm:$0xff] (!%p473_p7)  ;;  %v536_v21 = vld [vmem:[%s2646_s23 + $0x8] sm:$0xff] (!%p473_p7)  ;;  %v537_v33 = vld [vmem:[%s2646_s23 + $0x10] sm:$0xff] (!%p473_p7)  ;;  %p2912_p8 = scmp.lt.s32.totalorder (!%p473_p7), %s2057_s20, 1 }
  0x25   : > { %v543_v22 = vld [vmem:[%s2650_s17] sm:$0xff] (!%p473_p7)  ;;  %v544_v23 = vld [vmem:[%s2650_s17 + $0x8] sm:$0xff] (!%p473_p7)  ;;  %v559_v24 = vrot.slane (!%p473_p7), %v535_v20, 4  ;;  %v560_v25 = vrot.slane (!%p473_p7), %v536_v21, 4  ;;  %v538_v34 = vld [vmem:[%s2646_s23 + $0x18] sm:$0xff] (!%p473_p7)  ;;  %v561_v45 = vrot.slane (!%p473_p7), %v537_v33, 4 }
  0x26   : > { %v591_v26 = vrot.slane (!%p473_p7), %v543_v22, 4  ;;  %v592_v27 = vrot.slane (!%p473_p7), %v544_v23, 4  ;;  %v545_v35 = vld [vmem:[%s2650_s17 + $0x10] sm:$0xff] (!%p473_p7)  ;;  %v546_v38 = vld [vmem:[%s2650_s17 + $0x18] sm:$0xff] (!%p473_p7)  ;;  %v539_v40 = vld [vmem:[%s2646_s23 + $0x20] sm:$0xff] (!%p473_p7)  ;;  %v562_v46 = vrot.slane (!%p473_p7), %v538_v34, 4 }
  0x27   : > { %2250 = vmatpush3.bf16.msra.mxu1 (!%p473_p7), %v2484_v17  ;;  %v575_v29 = vmax.bf16 (!%p473_p7), %v559_v24, %v535_v20  ;;  %v576_v30 = vmax.bf16 (!%p473_p7), %v560_v25, %v536_v21  ;;  %v540_v42 = vld [vmem:[%s2646_s23 + $0x28] sm:$0xff] (!%p473_p7)  ;;  %v547_v43 = vld [vmem:[%s2650_s17 + $0x20] sm:$0xff] (!%p473_p7)  ;;  %v593_v47 = vrot.slane (!%p473_p7), %v545_v35, 4  ;;  %v594_v48 = vrot.slane (!%p473_p7), %v546_v38, 4  ;;  %v541_v58 = vld [vmem:[%s2646_s23 + $0x30] sm:$0xff] (!%p473_p7) }
  0x28   : > { %2251 = vmatprep.subr.bf16.mxu1 (!%p473_p7), %v2485_v18  ;;  %v607_v31 = vmax.bf16 (!%p473_p7), %v591_v26, %v543_v22  ;;  %v608_v32 = vmax.bf16 (!%p473_p7), %v592_v27, %v544_v23  ;;  %v548_v44 = vld [vmem:[%s2650_s17 + $0x28] sm:$0xff] (!%p473_p7)  ;;  %v563_v49 = vrot.slane (!%p473_p7), %v539_v40, 4  ;;  %v564_v50 = vrot.slane (!%p473_p7), %v540_v42, 4  ;;  %v542_v63 = vld [vmem:[%s2646_s23 + $0x38] sm:$0xff] (!%p473_p7)  ;;  %v549_v0 = vld [vmem:[%s2650_s17 + $0x30] sm:$0xff] (!%p473_p7) }
  0x29   : > { %v595_v51 = vrot.slane %v547_v43, 4  ;;  %v596_v52 = vrot.slane %v548_v44, 4  ;;  %v577_v54 = vmax.bf16 %v561_v45, %v537_v33  ;;  %v578_v55 = vmax.bf16 %v562_v46, %v538_v34  ;;  %v550_v1 = vld [vmem:[%s2650_s17 + $0x38] sm:$0xff]  ;;  %v2493_v21 = vld [vmem:[%s2955_s2 + $0x10] sm:$0xff]   ;;  %v2495_v24 = vld [vmem:[%s2955_s2 + $0x20] sm:$0xff]   ;;  %s2971_s20 = smov (!%p2912_p8, %s2057_s20), 1 }
  0x2a   : > { %v615_v36 = vmax.bf16 %v607_v31, %v575_v29  ;;  %v616_v37 = vmax.bf16 %v608_v32, %v576_v30  ;;  %v609_v56 = vmax.bf16 %v593_v47, %v545_v35  ;;  %v610_v57 = vmax.bf16 %v594_v48, %v546_v38  ;;  %v2494_v23 = vld [vmem:[%s2955_s2 + $0x18] sm:$0xff]   ;;  %v2496_v25 = vld [vmem:[%s2955_s2 + $0x28] sm:$0xff]   ;;  %v2497_v26 = vld [vmem:[%s2955_s2 + $0x30] sm:$0xff]   ;;  %s2154_s19 = sshll.u32 %s2971_s20, 5 }
  0x2b   : > { %2252 = vmatpush3.bf16.msra.mxu1 %v2485_v18  ;;  %v579_v59 = vmax.bf16 %v563_v49, %v539_v40  ;;  %v580_v60 = vmax.bf16 %v564_v50, %v540_v42  ;;  %v611_v61 = vmax.bf16 %v595_v51, %v547_v43  ;;  %v612_v62 = vmax.bf16 %v596_v52, %v548_v44  ;;  %v2492_v18 = vld [vmem:[%s2955_s2 + $0x8] sm:$0xff]   ;;  %v2498_v27 = vld [vmem:[%s2955_s2 + $0x38] sm:$0xff]   ;;  %v2104_v30 = vld [vmem:[%s2958_s5 + $0x4] sm:$0xf]  ;;  %s533_s27 = scalar_lea.vmem %s2964_s11, %s2154_s19 }
  0x2c   : > { %2253 = vmatprep.subr.bf16.mxu1 %v2486_v19  ;;  %v2665_v41 = vcombine.low %v615_v36, %v616_v37  ;;  %v617_v3 = vmax.bf16 %v609_v56, %v577_v54  ;;  %v618_v4 = vmax.bf16 %v610_v57, %v578_v55  ;;  %v565_v5 = vrot.slane %v541_v58, 4  ;;  %v2113_v29 = vld [vmem:[%s2958_s5 + $0x8] sm:$0xf]  ;;  %v2739_v33 = vld [vmem:[%s2958_s5 + $0xc] sm:$0xf] }
  0x2d   : > { %v566_v6 = vrot.slane %v542_v63, 4  ;;  %v597_v7 = vrot.slane %v549_v0, 4  ;;  %v598_v8 = vrot.slane %v550_v1, 4  ;;  %v619_v9 = vmax.bf16 %v611_v61, %v579_v59  ;;  %2451 = vmatprep.subr.msk.bf16.mxu0 %vm1042_vm1, %v2113_v29  ;;  %v2746_v34 = vld [vmem:[%s2958_s5] sm:$0xf] }
  0x2e   : > { %2263 = vmatprep.mubr.bf16.mxu1 %v2665_v41  ;;  %v620_v10 = vmax.bf16 %v612_v62, %v580_v60  ;;  %v2081_v12 = vcombine.low %v617_v3, %v618_v4  ;;  %v581_v13 = vmax.bf16 %v565_v5, %v541_v58  ;;  %v1218_v31 = vsel %vm1042_vm1, %v2113_v29, 0  ;;  %v2102_v43 = vld [vmem:[%s2956_s3] ss:$0 sm:$0xff] }
  0x2f   : > { %2254 = vmatpush3.bf16.msra.mxu1 %v2486_v19  ;;  %v582_v14 = vmax.bf16 %v566_v6, %v542_v63  ;;  %v613_v15 = vmax.bf16 %v597_v7, %v549_v0  ;;  %v614_v16 = vmax.bf16 %v598_v8, %v550_v1  ;;  %v1044_v32 = vsel %vm1042_vm1, %v2104_v30, 0  ;;  %2316 = vmatpush3.bf16.msra.mxu0 %v1218_v31  ;;  %v2103_v45 = vld [vmem:[%s2957_s4] ss:$0 sm:$0xff] }
  0x30   : > { %2255 = vmatprep.subr.bf16.mxu1 %v2487_v28  ;;  %v2082_v17 = vcombine.low %v619_v9, %v620_v10  ;;  %2452 = vmatprep.subr.msk.bf16.mxu0 %vm1042_vm1, %v2739_v33 }
  0x31   : > { %v621_v19 = vmax.bf16 %v613_v15, %v581_v13  ;;  %v622_v20 = vmax.bf16 %v614_v16, %v582_v14 }
  0x33   : > { %2256 = vmatpush3.bf16.msra.mxu1 %v2487_v28  ;;  %v2083_v22 = vcombine.low %v621_v19, %v622_v20  ;;  %v2523_v28 = vmov 0.0  }
  0x34   : > { %2257 = vmatprep.subr.bf16.mxu1 %v2488_v39  ;;  %980 = vst.msk [vmem:[#allocation2 + $0x30] sm:$0xff] %vm973_vm0, %v2523_v28  ;;  %981 = vst.msk [vmem:[#allocation2 + $0x38] sm:$0xff] %vm973_vm0, %v2523_v28 }
  0x35   : > { %974 = vst.msk [vmem:[#allocation2] sm:$0xff] %vm973_vm0, %v2523_v28  ;;  %975 = vst.msk [vmem:[#allocation2 + $0x8] sm:$0xff] %vm973_vm0, %v2523_v28 }
  0x36   : > { %976 = vst.msk [vmem:[#allocation2 + $0x10] sm:$0xff] %vm973_vm0, %v2523_v28  ;;  %977 = vst.msk [vmem:[#allocation2 + $0x18] sm:$0xff] %vm973_vm0, %v2523_v28 }
  0x37   : > { %2258 = vmatpush3.bf16.msra.mxu1 %v2488_v39  ;;  %978 = vst.msk [vmem:[#allocation2 + $0x20] sm:$0xff] %vm973_vm0, %v2523_v28  ;;  %979 = vst.msk [vmem:[#allocation2 + $0x28] sm:$0xff] %vm973_vm0, %v2523_v28 }
  0x38   : > { %2259 = vmatprep.subr.bf16.mxu1 %v2489_v53  ;;  %982 = vst.msk [vmem:[#allocation2 + $0x40] sm:$0xff] %vm973_vm0, %v2523_v28  ;;  %983 = vst.msk [vmem:[#allocation2 + $0x48] sm:$0xff] %vm973_vm0, %v2523_v28 }
  0x39   : > { %984 = vst.msk [vmem:[#allocation2 + $0x50] sm:$0xff] %vm973_vm0, %v2523_v28  ;;  %985 = vst.msk [vmem:[#allocation2 + $0x58] sm:$0xff] %vm973_vm0, %v2523_v28 }
  0x3a   : > { %986 = vst.msk [vmem:[#allocation2 + $0x60] sm:$0xff] %vm973_vm0, %v2523_v28  ;;  %987 = vst.msk [vmem:[#allocation2 + $0x68] sm:$0xff] %vm973_vm0, %v2523_v28 }
  0x3b   : > { %2260 = vmatpush3.bf16.msra.mxu1 %v2489_v53  ;;  %988 = vst.msk [vmem:[#allocation2 + $0x70] sm:$0xff] %vm973_vm0, %v2523_v28  ;;  %989 = vst.msk [vmem:[#allocation2 + $0x78] sm:$0xff] %vm973_vm0, %v2523_v28 }
  0x3c   : > { %2261 = vmatprep.subr.bf16.mxu1 %v2490_v2  ;;  %990 = vst.msk [vmem:[#allocation2 + $0x80] sm:$0xff] %vm973_vm0, %v2523_v28  ;;  %991 = vst.msk [vmem:[#allocation2 + $0x88] sm:$0xff] %vm973_vm0, %v2523_v28  ;;  %v1016_v9 = vld [vmem:[#allocation2 + $0x1] sm:$0xff] }
  0x3d   : > { %992 = vst.msk [vmem:[#allocation2 + $0x90] sm:$0xff] %vm973_vm0, %v2523_v28  ;;  %993 = vst.msk [vmem:[#allocation2 + $0x98] sm:$0xff] %vm973_vm0, %v2523_v28  ;;  %v1191_v10 = vld [vmem:[#allocation2 + $0x2] sm:$0xff] }
  0x3e   : > { %v1003_v29 = vld [vmem:[#allocation2] sm:$0xff] }
  0x3f   : > { %2262 = vmatpush3.bf16.msra.mxu1 %v2490_v2 }
  0x40   : > { %2271 = vmatprep.subr.bf16.mxu1 %v2491_v11 }
  0x42   : > { %2264 = vmatmul.mubr.bf16.vlgmr.msra.gmra.mrb[0].mxu1 %v2081_v12 }
  0x43   : > { %2272 = vmatpush3.bf16.msra.mxu1 %v2491_v11  ;;  %2267 = vmatprep.mubr.bf16.mxu1 %v2082_v17 }
  0x44   : > { %2273 = vmatprep.subr.bf16.mxu1 %v2492_v18 }
  0x47   : > { %2274 = vmatpush3.bf16.msra.mxu1 %v2492_v18 }
  0x48   : > { %2275 = vmatprep.subr.bf16.mxu1 %v2493_v21 }
  0x4a   : > { %2268 = vmatmul.mubr.bf16.gmra.mrb[4].mxu1 %v2083_v22 }
  0x4b   : > { %2276 = vmatpush3.bf16.msra.mxu1 %v2493_v21  ;;  %2287 = vmatprep.mubr.bf16.mxu1 %v2665_v41 }
  0x4c   : > { %2277 = vmatprep.subr.bf16.mxu1 %v2494_v23 }
  0x4f   : > { %2278 = vmatpush3.bf16.msra.mxu1 %v2494_v23 }
  0x50   : > { %2279 = vmatprep.subr.bf16.mxu1 %v2495_v24 }
  0x53   : > { %2280 = vmatpush3.bf16.msra.mxu1 %v2495_v24 }
  0x54   : > { %2281 = vmatprep.subr.bf16.mxu1 %v2496_v25 }
  0x57   : > { %2282 = vmatpush3.bf16.msra.mxu1 %v2496_v25  ;;  %v1320_v25 = vsel %vm1042_vm1, %v2739_v33, 0 }
  0x58   : > { %2283 = vmatprep.subr.bf16.mxu1 %v2497_v26 }
  0x5b   : > { %2284 = vmatpush3.bf16.msra.mxu1 %v2497_v26  ;;  %v1124_v26 = vsel %vm1042_vm1, %v2746_v34, 0 }
  0x5c   : > { %2285 = vmatprep.subr.bf16.mxu1 %v2498_v27 }
  0x5f   : > { %2286 = vmatpush3.bf16.msra.mxu1 %v2498_v27  ;;  %v2123_v27 = vld [vmem:[%s2958_s5 + $0x10] sm:$0xf] }
  0x60   : > { %2449 = vmatprep.subr.msk.bf16.mxu1 %vm1042_vm1, %v2104_v30 }
  0x62   : > { %2288 = vmatmul.mubr.bf16.vlgmr.msra.gmra.mrb[8].mxu1 %v2081_v12 }
  0x63   : > { %2291 = vmatprep.mubr.bf16.mxu1 %v2082_v17  ;;  %2296 = vmatpush3.bf16.msra.mxu1 %v1044_v32 }
  0x64   : > { %2450 = vmatprep.subr.msk.bf16.mxu1 %vm1042_vm1, %v2746_v34 }
  0x6a   : > { %2292 = vmatmul.mubr.bf16.gmra.mrb[12].mxu1 %v2083_v22 }
 0x115   : > { %v2750_v35 = vpop.f32.mrb[0].mxu1 }
 0x116   : > { %v2752_v36 = vpop.f32.mrb[1].mxu1 }
 0x117   : > { %v2754_v37 = vpop.f32.mrb[2].mxu1 }
 0x118   : > { %v2756_v38 = vpop.f32.mrb[3].mxu1 }
 0x11d   : > { %v2758_v39 = vpop.f32.mrb[4].mxu1 }
 0x11e   : > { %v2760_v40 = vpop.f32.mrb[5].mxu1 }
 0x11f   : > { %v2762_v41 = vpop.f32.mrb[6].mxu1 }
 0x120   : > { %v2764_v42 = vpop.f32.mrb[7].mxu1 }
 0x135   : > { %v2289_v44 = vpop.f32.mrb[8].mxu1 }
 0x136   : > { %v944_v46 = vmul.f32 %v2289_v44, %v2102_v43  ;;  %v904_v47 = vpop.f32.mrb[9].mxu1 }
 0x137   : > { %v942_v48 = vmul.f32 %v2102_v43, %v904_v47  ;;  %v2290_v49 = vpop.f32.mrb[10].mxu1 }
 0x138   : > { %v959_v50 = vadd.f32 %v2103_v45, %v944_v46  ;;  %v945_v51 = vmul.f32 %v2290_v49, %v2102_v43  ;;  %v907_v52 = vpop.f32.mrb[11].mxu1 }
 0x139   : > { %v957_v53 = vadd.f32 %v2103_v45, %v942_v48  ;;  %v943_v54 = vmul.f32 %v2102_v43, %v907_v52 }
 0x13a   : > { %v967_v55 = vmax.f32 %v959_v50, 0.0  ;;  %v960_v56 = vadd.f32 %v2103_v45, %v945_v51 }
 0x13b   : > { %v965_v57 = vmax.f32 %v957_v53, 0.0  ;;  %v958_v58 = vadd.f32 %v2103_v45, %v943_v54 }
 0x13c   : > { %997 = vst.msk [vmem:[#allocation2 + $0x31] sm:$0xff] %vm973_vm0, %v967_v55  ;;  %v968_v59 = vmax.f32 %v960_v56, 0.0 }
 0x13d   : > { %995 = vst.msk [vmem:[#allocation2 + $0x11] sm:$0xff] %vm973_vm0, %v965_v57  ;;  %v966_v60 = vmax.f32 %v958_v58, 0.0  ;;  %v2293_v61 = vpop.f32.mrb[12].mxu1 }
 0x13e   : > { %998 = vst.msk [vmem:[#allocation2 + $0x41] sm:$0xff] %vm973_vm0, %v968_v59  ;;  %v948_v62 = vmul.f32 %v2293_v61, %v2102_v43  ;;  %v920_v63 = vpop.f32.mrb[13].mxu1  ;;  %v1422_v59 = vsel %vm1042_vm1, %v2123_v27, 0  ;;  %v2128_v61 = vld [vmem:[%s2958_s5 + $0x14] sm:$0xf] }
 0x13f   : > { %996 = vst.msk [vmem:[#allocation2 + $0x21] sm:$0xff] %vm973_vm0, %v966_v60  ;;  %v946_v0 = vmul.f32 %v2102_v43, %v920_v63  ;;  %v2294_v1 = vpop.f32.mrb[14].mxu1 }
 0x140   : > { %v963_v2 = vadd.f32 %v2103_v45, %v948_v62  ;;  %v949_v3 = vmul.f32 %v2294_v1, %v2102_v43  ;;  %v923_v4 = vpop.f32.mrb[15].mxu1 }
 0x141   : > { %v961_v5 = vadd.f32 %v2103_v45, %v946_v0  ;;  %v947_v6 = vmul.f32 %v2102_v43, %v923_v4 }
 0x142   : > { %v971_v7 = vmax.f32 %v963_v2, 0.0  ;;  %v964_v8 = vadd.f32 %v2103_v45, %v949_v3 }
 0x143   : > { %v969_v11 = vmax.f32 %v961_v5, 0.0  ;;  %v962_v12 = vadd.f32 %v2103_v45, %v947_v6  ;;  %v2784_v19 = vld [vmem:[#allocation2 + $0x31] sm:$0xff]  ;;  %v1524_v5 = vsel %vm1042_vm1, %v2128_v61, 0 }
 0x144   : > { %1001 = vst.msk [vmem:[#allocation2 + $0x71] sm:$0xff] %vm973_vm0, %v971_v7  ;;  %v972_v13 = vmax.f32 %v964_v8, 0.0  ;;  %v2777_v14 = vld [vmem:[#allocation2 + $0x11] sm:$0xff] }
 0x145   : > { %v2779_v15 = vld [vmem:[#allocation2 + $0x12] sm:$0xff]  ;;  %999 = vst.msk [vmem:[#allocation2 + $0x51] sm:$0xff] %vm973_vm0, %v969_v11  ;;  %v970_v16 = vmax.f32 %v962_v12, 0.0  ;;  %v1024_v17 = vpack.c.bf16 %v2777_v14, %v1016_v9  ;;  %v1020_v28 = vld [vmem:[#allocation2 + $0x41] sm:$0xff] }
 0x146   : > { %v1199_v18 = vpack.c.bf16 %v2779_v15, %v1191_v10  ;;  %1002 = vst.msk [vmem:[#allocation2 + $0x81] sm:$0xff] %vm973_vm0, %v972_v13  ;;  %v2787_v20 = vld [vmem:[#allocation2 + $0x21] sm:$0xff]  ;;  %v2791_v22 = vld [vmem:[#allocation2 + $0x32] sm:$0xff]  ;;  %v1404_v4 = vpack.c.bf16 %v1020_v28, %v2784_v19 }
 0x147   : > { %v2789_v21 = vld [vmem:[#allocation2 + $0x22] sm:$0xff]  ;;  %1000 = vst.msk [vmem:[#allocation2 + $0x61] sm:$0xff] %vm973_vm0, %v970_v16  ;;  %2297 = vmatprep.mubr.msk.bf16.mxu1 %vm973_vm0, %v1024_v17  ;;  %v2798_v23 = vpack.c.bf16 %v2784_v19, %v2787_v20  ;;  %v1004_v44 = vld [vmem:[#allocation2 + $0x10] sm:$0xff]  ;;  %v1403_v3 = vpack.c.bf16 %v2787_v20, %v2777_v14  ;;  %v2133_v7 = vld [vmem:[%s2958_s5 + $0x18] sm:$0xf] }
 0x148   : > { %2317 = vmatprep.mubr.msk.bf16.mxu0 %vm973_vm0, %v1199_v18  ;;  %v2802_v24 = vpack.c.bf16 %v2791_v22, %v2789_v21  ;;  %v1195_v31 = vld [vmem:[#allocation2 + $0x42] sm:$0xff]  ;;  %v1011_v51 = vpack.c.bf16 %v1004_v44, %v1003_v29  ;;  %v1006_v55 = vld [vmem:[#allocation2 + $0x30] sm:$0xff]  ;;  %v1505_v10 = vpack.c.bf16 %v2789_v21, %v2779_v15  ;;  %v1627_v12 = vsel %vm1042_vm1, %v2133_v7, 0  ;;  %v2138_v14 = vld [vmem:[%s2958_s5 + $0x1c] sm:$0xf] }
 0x149   : > { %2298 = vmatmul.mubr.msk.bf16.vlgmr.msra.gmra.mrb[16].mxu1 %vm973_vm0, %v2798_v23  ;;  %v1294_v45 = vld [vmem:[#allocation2 + $0x20] sm:$0xff]  ;;  %v1506_v11 = vpack.c.bf16 %v1195_v31, %v2791_v22  ;;  %v1729_v17 = vsel %vm1042_vm1, %v2138_v14, 0  ;;  %v1607_v19 = vld [vmem:[#allocation2 + $0x90] sm:$0xff] }
 0x14a   : > { %2318 = vmatmul.mubr.msk.bf16.vlgmr.msra.gmra.mrb[0].mxu0 %vm973_vm0, %v2802_v24  ;;  %2306 = vmatpush3.bf16.msra.mxu1 %v1124_v26  ;;  %v1301_v52 = vpack.c.bf16 %v1294_v45, %v1004_v44  ;;  %v1296_v53 = vld [vmem:[#allocation2 + $0x40] sm:$0xff]  ;;  %v1012_v57 = vpack.c.bf16 %v1006_v55, %v1294_v45  ;;  %v1709_v22 = vld [vmem:[#allocation2 + $0x91] sm:$0xff] }
 0x14b   : > { %2326 = vmatpush3.bf16.msra.mxu0 %v1320_v25  ;;  %v1023_v43 = vld [vmem:[#allocation2 + $0x71] sm:$0xff]  ;;  %v1302_v58 = vpack.c.bf16 %v1296_v53, %v1006_v55  ;;  %v2143_v18 = vld [vmem:[%s2958_s5 + $0x20] sm:$0xf] }
 0x14c   : > { %2453 = vmatprep.subr.msk.bf16.mxu0 %vm1042_vm1, %v2123_v27  ;;  %v1021_v30 = vld [vmem:[#allocation2 + $0x51] sm:$0xff]  ;;  %v1831_v21 = vsel %vm1042_vm1, %v2143_v18, 0  ;;  %v2148_v44 = vld [vmem:[%s2959_s6] ss:$0 sm:$0xff] }
 0x14d   : > { %v2816_v32 = vld [vmem:[#allocation2 + $0x52] sm:$0xff]  ;;  %v2818_v33 = vpack.c.bf16 %v1021_v30, %v1020_v28  ;;  %v1300_v63 = vld [vmem:[#allocation2 + $0x80] sm:$0xff] }
 0x14e   : > { %v2821_v34 = vpack.c.bf16 %v2816_v32, %v1195_v31  ;;  %v1022_v46 = vld [vmem:[#allocation2 + $0x61] sm:$0xff]  ;;  %v1198_v48 = vld [vmem:[#allocation2 + $0x72] sm:$0xff]  ;;  %v1611_v20 = vpack.c.bf16 %v1607_v19, %v1300_v63  ;;  %v2093_v55 = vld [vmem:[%s2963_s10] ss:$0 sm:$0xff] }
 0x14f   : > { %v1197_v47 = vld [vmem:[#allocation2 + $0x62] sm:$0xff]  ;;  %2301 = vmatprep.mubr.msk.bf16.mxu1 %vm973_vm0, %v2818_v33  ;;  %v2827_v49 = vpack.c.bf16 %v1023_v43, %v1022_v46  ;;  %v1008_v54 = vld [vmem:[#allocation2 + $0x50] sm:$0xff]  ;;  %v1405_v6 = vpack.c.bf16 %v1022_v46, %v1021_v30 }
 0x150   : > { %2321 = vmatprep.mubr.msk.bf16.mxu0 %vm973_vm0, %v2821_v34  ;;  %v2829_v50 = vpack.c.bf16 %v1198_v48, %v1197_v47  ;;  %v1298_v56 = vld [vmem:[#allocation2 + $0x60] sm:$0xff]  ;;  %v1013_v60 = vpack.c.bf16 %v1008_v54, %v1296_v53  ;;  %v1010_v0 = vld [vmem:[#allocation2 + $0x70] sm:$0xff]  ;;  %v1507_v13 = vpack.c.bf16 %v1197_v47, %v2816_v32 }
 0x151   : > { %2302 = vmatmul.mubr.msk.bf16.gmra.mrb[20].mxu1 %vm973_vm0, %v2827_v49  ;;  %v1303_v62 = vpack.c.bf16 %v1298_v56, %v1008_v54  ;;  %v1014_v1 = vpack.c.bf16 %v1010_v0, %v1298_v56  ;;  %v1304_v2 = vpack.c.bf16 %v1300_v63, %v1010_v0  ;;  %v1402_v8 = vld [vmem:[#allocation2 + $0x81] sm:$0xff]  ;;  %v2906_v47 = vld [vmem:[%s2960_s7] ss:$0 sm:$0xff] }
 0x152   : > { %2322 = vmatmul.mubr.msk.bf16.gmra.mrb[4].mxu0 %vm973_vm0, %v2829_v50  ;;  %2307 = vmatprep.mubr.msk.bf16.mxu1 %vm973_vm0, %v1011_v51  ;;  %v1406_v9 = vpack.c.bf16 %v1402_v8, %v1023_v43  ;;  %v1504_v15 = vld [vmem:[#allocation2 + $0x82] sm:$0xff]  ;;  %v1713_v25 = vpack.c.bf16 %v1709_v22, %v1402_v8 }
 0x153   : > { %2327 = vmatprep.mubr.msk.bf16.mxu0 %vm973_vm0, %v1301_v52  ;;  %v1508_v16 = vpack.c.bf16 %v1504_v15, %v1198_v48 }
 0x159   : > { %2308 = vmatmul.mubr.msk.bf16.vlgmr.msra.gmra.mrb[16].mxu1 %vm973_vm0, %v1012_v57 }
 0x15a   : > { %2328 = vmatmul.mubr.msk.bf16.vlgmr.msra.gmra.mrb[0].mxu0 %vm973_vm0, %v1302_v58  ;;  %2311 = vmatprep.mubr.msk.bf16.mxu1 %vm973_vm0, %v1013_v60 }
 0x15b   : > { %2336 = vmatpush3.bf16.msra.mxu0 %v1422_v59  ;;  %2331 = vmatprep.mubr.msk.bf16.mxu0 %vm973_vm0, %v1303_v62 }
 0x15c   : > { %2454 = vmatprep.subr.msk.bf16.mxu0 %vm1042_vm1, %v2128_v61 }
 0x161   : > { %2312 = vmatmul.mubr.msk.bf16.gmra.mrb[20].mxu1 %vm973_vm0, %v1014_v1 }
 0x162   : > { %2332 = vmatmul.mubr.msk.bf16.gmra.mrb[4].mxu0 %vm973_vm0, %v1304_v2 }
 0x163   : > { %2337 = vmatprep.mubr.msk.bf16.mxu0 %vm973_vm0, %v1403_v3 }
 0x16a   : > { %2338 = vmatmul.mubr.msk.bf16.vlgmr.msra.gmra.mrb[0].mxu0 %vm973_vm0, %v1404_v4 }
 0x16b   : > { %2346 = vmatpush3.bf16.msra.mxu0 %v1524_v5  ;;  %2341 = vmatprep.mubr.msk.bf16.mxu0 %vm973_vm0, %v1405_v6 }
 0x16c   : > { %2455 = vmatprep.subr.msk.bf16.mxu0 %vm1042_vm1, %v2133_v7 }
 0x172   : > { %2342 = vmatmul.mubr.msk.bf16.gmra.mrb[4].mxu0 %vm973_vm0, %v1406_v9 }
 0x173   : > { %2347 = vmatprep.mubr.msk.bf16.mxu0 %vm973_vm0, %v1505_v10 }
 0x17a   : > { %2348 = vmatmul.mubr.msk.bf16.vlgmr.msra.gmra.mrb[0].mxu0 %vm973_vm0, %v1506_v11 }
 0x17b   : > { %2356 = vmatpush3.bf16.msra.mxu0 %v1627_v12  ;;  %2351 = vmatprep.mubr.msk.bf16.mxu0 %vm973_vm0, %v1507_v13 }
 0x17c   : > { %2456 = vmatprep.subr.msk.bf16.mxu0 %vm1042_vm1, %v2138_v14 }
 0x182   : > { %2352 = vmatmul.mubr.msk.bf16.gmra.mrb[4].mxu0 %vm973_vm0, %v1508_v16 }
 0x183   : > { %2357 = vmatprep.mubr.msk.bf16.mxu0 %vm973_vm0, %v1012_v57 }
 0x18a   : > { %2358 = vmatmul.mubr.msk.bf16.vlgmr.msra.gmra.mrb[0].mxu0 %vm973_vm0, %v1013_v60 }
 0x18b   : > { %2366 = vmatpush3.bf16.msra.mxu0 %v1729_v17  ;;  %2361 = vmatprep.mubr.msk.bf16.mxu0 %vm973_vm0, %v1014_v1 }
 0x18c   : > { %2457 = vmatprep.subr.msk.bf16.mxu0 %vm1042_vm1, %v2143_v18 }
 0x192   : > { %2362 = vmatmul.mubr.msk.bf16.gmra.mrb[4].mxu0 %vm973_vm0, %v1611_v20 }
 0x193   : > { %2367 = vmatprep.mubr.msk.bf16.mxu0 %vm973_vm0, %v2798_v23  ;;  %v1811_v23 = vld [vmem:[#allocation2 + $0x92] sm:$0xff] }
 0x194   : > { %v1815_v26 = vpack.c.bf16 %v1811_v23, %v1504_v15 }
 0x19a   : > { %2368 = vmatmul.mubr.msk.bf16.vlgmr.msra.gmra.mrb[0].mxu0 %vm973_vm0, %v2818_v33 }
 0x19b   : > { %2376 = vmatpush3.bf16.msra.mxu0 %v1831_v21  ;;  %2371 = vmatprep.mubr.msk.bf16.mxu0 %vm973_vm0, %v2827_v49 }
 0x1a2   : > { %2372 = vmatmul.mubr.msk.bf16.gmra.mrb[4].mxu0 %vm973_vm0, %v1713_v25 }
 0x1a3   : > { %2377 = vmatprep.mubr.msk.bf16.mxu0 %vm973_vm0, %v2802_v24  ;;  %v2092_v24 = vld [vmem:[%s2962_s9] ss:$0 sm:$0xff] }
 0x1a4   : > { %v783_v51 = vmul.f32 %v2092_v24, %v2752_v36  ;;  %v786_v56 = vmul.f32 %v2754_v37, %v2092_v24  ;;  %v789_v5 = vmul.f32 %v2758_v39, %v2092_v24  ;;  %v787_v10 = vmul.f32 %v2092_v24, %v2760_v40 }
 0x1a5   : > { %v790_v15 = vmul.f32 %v2762_v41, %v2092_v24  ;;  %v788_v20 = vmul.f32 %v2092_v24, %v2764_v42 }
 0x1a6   : > { %v798_v63 = vadd.f32 %v2093_v55, %v783_v51  ;;  %v801_v37 = vadd.f32 %v2093_v55, %v786_v56 }
 0x1aa   : > { %2378 = vmatmul.mubr.msk.bf16.vlgmr.msra.gmra.mrb[0].mxu0 %vm973_vm0, %v2821_v34 }
 0x1ab   : > { %2381 = vmatprep.mubr.msk.bf16.mxu0 %vm973_vm0, %v2829_v50  ;;  %v785_v50 = vmul.f32 %v2750_v35, %v2092_v24  ;;  %v784_v35 = vmul.f32 %v2092_v24, %v2756_v38 }
 0x1ad   : > { %v800_v62 = vadd.f32 %v2093_v55, %v785_v50  ;;  %v799_v38 = vadd.f32 %v2093_v55, %v784_v35 }
 0x1b2   : > { %2382 = vmatmul.mubr.msk.bf16.gmra.mrb[4].mxu0 %vm973_vm0, %v1815_v26 }
 0x22c   : > { %v2309_v27 = vpop.f32.mrb[16].mxu1 }
 0x22d   : > { %v1160_v28 = vpop.f32.mrb[17].mxu1 }
 0x22e   : > { %v2310_v29 = vpop.f32.mrb[18].mxu1 }
 0x22f   : > { %v1163_v30 = vpop.f32.mrb[19].mxu1 }
 0x234   : > { %v2313_v31 = vpop.f32.mrb[20].mxu1 }
 0x235   : > { %v1176_v32 = vpop.f32.mrb[21].mxu1 }
 0x236   : > { %v2314_v33 = vpop.f32.mrb[22].mxu1 }
 0x237   : > { %v1179_v43 = vpop.f32.mrb[23].mxu1 }
 0x27d   : > { %v2379_v34 = vpop.f32.mrb[0].mxu0 }
 0x27e   : > { %v2385_v45 = vadd.f32 %v2379_v34, %v2309_v27  ;;  %v1867_v46 = vpop.f32.mrb[1].mxu0 }
 0x27f   : > { %v2386_v48 = vadd.f32 %v1867_v46, %v1160_v28  ;;  %v2380_v49 = vpop.f32.mrb[2].mxu0 }
 0x280   : > { %v1915_v52 = vmul.f32 %v2385_v45, %v2148_v44  ;;  %v2387_v53 = vadd.f32 %v2380_v49, %v2310_v29  ;;  %v1870_v54 = vpop.f32.mrb[3].mxu0  ;;  %v805_v45 = vadd.f32 %v2093_v55, %v790_v15  ;;  %v803_v49 = vadd.f32 %v2093_v55, %v788_v20 }
 0x281   : > { %v1913_v57 = vmul.f32 %v2386_v48, %v2148_v44  ;;  %v2388_v36 = vadd.f32 %v1870_v54, %v1163_v30  ;;  %v804_v30 = vadd.f32 %v2093_v55, %v789_v5 }
 0x282   : > { %v1930_v58 = vadd.f32 %v2906_v47, %v1915_v52  ;;  %v1916_v59 = vmul.f32 %v2387_v53, %v2148_v44 }
 0x283   : > { %v1928_v60 = vadd.f32 %v2906_v47, %v1913_v57  ;;  %v1914_v61 = vmul.f32 %v2388_v36, %v2148_v44 }
 0x284   : > { %v1938_v0 = vmax.f32 %v1930_v58, 0.0  ;;  %v1931_v1 = vadd.f32 %v2906_v47, %v1916_v59 }
 0x285   : > { %v1936_v2 = vmax.f32 %v1928_v60, 0.0  ;;  %v1929_v3 = vadd.f32 %v2906_v47, %v1914_v61  ;;  %v2383_v4 = vpop.f32.mrb[4].mxu0 }
 0x286   : > { %v1946_v6 = vadd.f32 %v1938_v0, %v800_v62  ;;  %v1939_v7 = vmax.f32 %v1931_v1, 0.0  ;;  %v2389_v8 = vadd.f32 %v2383_v4, %v2313_v31  ;;  %v1883_v9 = vpop.f32.mrb[5].mxu0 }
 0x287   : > { %v1944_v11 = vadd.f32 %v1936_v2, %v798_v63  ;;  %v1937_v12 = vmax.f32 %v1929_v3, 0.0  ;;  %v2390_v13 = vadd.f32 %v1883_v9, %v1176_v32  ;;  %v2384_v14 = vpop.f32.mrb[6].mxu0 }
 0x288   : > { %v1947_v16 = vadd.f32 %v1939_v7, %v801_v37  ;;  %v1919_v17 = vmul.f32 %v2389_v8, %v2148_v44  ;;  %v2391_v18 = vadd.f32 %v2384_v14, %v2314_v33  ;;  %v1886_v19 = vpop.f32.mrb[7].mxu0  ;;  %v1954_v25 = vmax.f32 %v1946_v6, 0.0 }
 0x289   : > { %v1945_v39 = vadd.f32 %v1937_v12, %v799_v38  ;;  %v1917_v21 = vmul.f32 %v2390_v13, %v2148_v44  ;;  %v2392_v22 = vadd.f32 %v1886_v19, %v1179_v43  ;;  %v1952_v27 = vmax.f32 %v1944_v11, 0.0 }
 0x28a   : > { %v1955_v23 = vmax.f32 %v1947_v16, 0.0  ;;  %v1934_v40 = vadd.f32 %v2906_v47, %v1919_v17  ;;  %v1920_v26 = vmul.f32 %v2391_v18, %v2148_v44  ;;  %v802_v33 = vadd.f32 %v2093_v55, %v787_v10 }
 0x28b   : > { %v1953_v41 = vmax.f32 %v1945_v39, 0.0  ;;  %v1932_v28 = vadd.f32 %v2906_v47, %v1917_v21  ;;  %v1918_v29 = vmul.f32 %v2392_v22, %v2148_v44 }
 0x28c   : > { %v2163_v31 = vpack.c.bf16 %v1955_v23, %v1954_v25  ;;  %v1942_v42 = vmax.f32 %v1934_v40, 0.0  ;;  %v1935_v32 = vadd.f32 %v2906_v47, %v1920_v26 }
 0x28d   : > { %v2158_v43 = vpack.c.bf16 %v1953_v41, %v1952_v27  ;;  %v1940_v24 = vmax.f32 %v1932_v28, 0.0  ;;  %v1933_v34 = vadd.f32 %v2906_v47, %v1918_v29 }
 0x28e   : > { %2175 = vst [vmem:[%s533_s27 + $0x8] sm:$0xff] %v2163_v31   ;;  %v1950_v46 = vadd.f32 %v1942_v42, %v804_v30  ;;  %v1943_v48 = vmax.f32 %v1935_v32, 0.0 }
 0x28f   : > { %2159 = vst [vmem:[%s533_s27] sm:$0xff] %v2158_v43   ;;  %v1948_v50 = vadd.f32 %v1940_v24, %v802_v33  ;;  %v1941_v51 = vmax.f32 %v1933_v34, 0.0 }
 0x290   : > { %v1951_v52 = vadd.f32 %v1943_v48, %v805_v45  ;;  %v1958_v53 = vmax.f32 %v1950_v46, 0.0 }
 0x291   : > { %v1949_v44 = vadd.f32 %v1941_v51, %v803_v49  ;;  %v1956_v56 = vmax.f32 %v1948_v50, 0.0 }
 0x292   : > { %v1959_v54 = vmax.f32 %v1951_v52, 0.0 }
 0x293   : > { %v1957_v35 = vmax.f32 %v1949_v44, 0.0 }
 0x294   : > { %v2173_v57 = vpack.c.bf16 %v1959_v54, %v1958_v53 }
 0x295   : > { %v2168_v36 = vpack.c.bf16 %v1957_v35, %v1956_v56 }
 0x296   : > { %2177 = vst [vmem:[%s533_s27 + $0x18] sm:$0xff] %v2173_v57  }
 0x297   : > { %2176 = vst [vmem:[%s533_s27 + $0x10] sm:$0xff] %v2168_v36  }
 0x298 PF: > { %p18_p9 = scmp.ge.s32.totalorder %s2601_s21, 4   ;;  %s2967_s17 = smov %s2517_s18 }
 0x299   : > { %s2968_s18 = smov %s2610_s24  ;;  %s2969_s19 = smov %s2601_s21 }
 0x29a   :  { %20 = sbr.rel (!%p18_p9) target bundleno = 2 (0x2), region = 193 }

// kernel: resnet_forward.8
= control target key start
LH: loop header
LB: loop body
LE: loop exit
PB: predicated region body
PF: predicated region fallthrough
CT: control target
= control target key end

     0   :  { %s1742_s13 = smov 0   ;;  %s1744_s14 = smov 0   ;;  %s1972_s0 = inlined_call_operand.vmem [shape: bf16[2,4,2,4,256], index: 0, kind: input, shape index: {}]   ;;  %s1973_s1 = inlined_call_operand.vmem [shape: bf16[128,8], index: 1, kind: input, shape index: {}]   ;;  %s1974_s2 = inlined_call_operand.vmem [shape: f32[1,8], index: 2, kind: input, shape index: {}]   ;;  %s1975_s3 = inlined_call_operand.vmem [shape: f32[1,8], index: 3, kind: input, shape index: {}]   ;;  %s1976_s4 = inlined_call_operand.vmem [shape: bf16[9,8,128], index: 4, kind: input, shape index: {}]   ;;  %s1977_s5 = inlined_call_operand.vmem [shape: f32[1,128], index: 5, kind: input, shape index: {}]   ;;  %s1978_s6 = inlined_call_operand.vmem [shape: f32[1,128], index: 6, kind: input, shape index: {}]   ;;  %s1979_s7 = inlined_call_operand.vmem [shape: bf16[128,128], index: 7, kind: input, shape index: {}]   ;;  %s1980_s8 = inlined_call_operand.vmem [shape: f32[1,128], index: 8, kind: input, shape index: {}]   ;;  %s1981_s9 = inlined_call_operand.vmem [shape: f32[1,128], index: 9, kind: input, shape index: {}]   ;;  %s1982_s10 = inlined_call_operand.vmem [shape: bf16[2,4,4,128], index: 10, kind: output, shape index: {}]  }
   0x1   :  { %s1746_s15 = smov 0  }
   0x2 LB: > { %s1380_s16 = sadd.s32 4294967295, %s1683_s15   ;;  %s1759_s17 = sadd.s32 1, %s1683_s15   ;;  %s1683_s15 = sphi %s1746_s15, %s1985_s15   ;;  %s1679_s14 = sphi %s1744_s14, %s1984_s14   ;;  %s1675_s13 = sphi %s1742_s13, %s1983_s13  }
   0x3   : > { %s24_s18 = ssub.s32 %s1683_s15, %s1759_s17  ;;  %s27_s19 = sadd.s32 1, %s1679_s14 }
   0x4   : > { %p25_p0 = scmp.eq.s32.totalorder %s24_s18, 0  ;;  %p34_p1 = scmp.ne.s32.totalorder %s1679_s14, %s1675_s13 }
   0x5   : > { %p35_p2 = scmp.eq.s32.totalorder %s1683_s15, 0  ;;  %p1383_p4 = scmp.ge.s32.totalorder %s1683_s15, 2 }
   0x6   : > { %s1768_s20 = scalar_select %p25_p0, %s1679_s14, %s27_s19  }
   0x7   : > { %p36_p3 = por %p35_p2, %p34_p1  ;;  %302 = sbr.rel (%p1383_p4) target bundleno = 21 (0x15), region = 52 }
   0xe   : > { %305 = sbr.rel (!%p36_p3) target bundleno = 21 (0x15), region = 56  ;;  %s307_s21 = sand.u32 (%p36_p3), 1, %s1679_s14  }
   0xf   : > { %s1432_s22 = sshll.u32 (%p36_p3), %s1683_s15, 5  ;;  %s1384_s23 = sshll.u32 (%p36_p3), %s307_s21, 4 }
  0x10   : > { %s312_s26 = scalar_lea.vmem (%p36_p3), %s1972_s0, %s1432_s22  ;;  %s309_s27 = scalar_lea.vmem (%p36_p3), [#allocation3], %s1384_s23 }
  0x11   : > { %v328_v0 = vld [vmem:[%s312_s26] sm:$0xf] (%p36_p3)  ;;  %v330_v1 = vld [vmem:[%s312_s26 + $0x8] sm:$0xf] (%p36_p3)  ;;  %v332_v2 = vld [vmem:[%s312_s26 + $0x10] sm:$0xf] (%p36_p3) }
  0x12   : > { %329 = vst [vmem:[%s309_s27] sm:$0xf] (%p36_p3), %v328_v0  ;;  %331 = vst [vmem:[%s309_s27 + $0x4] sm:$0xf] (%p36_p3), %v330_v1  ;;  %v334_v3 = vld [vmem:[%s312_s26 + $0x18] sm:$0xf] (%p36_p3) }
  0x13   : > { %333 = vst [vmem:[%s309_s27 + $0x8] sm:$0xf] (%p36_p3), %v332_v2  ;;  %335 = vst [vmem:[%s309_s27 + $0xc] sm:$0xf] (%p36_p3), %v334_v3 }
  0x15 PF: > { %p1387_p5 = scmp.ge.s32.totalorder %s1683_s15, 1  ;;  %p365_p6 = scmp.lt.s32.totalorder %s1683_s15, 3 }
  0x17   : > { %p366_p7 = pnand %p1387_p5, %p365_p6 }
  0x18   : > { %v1623_v4 = vld [vmem:[%s1979_s7] sm:$0xff] (!%p366_p7)   ;;  %v1685_v5 = vmov (!%p366_p7), 0.0   ;;  %v1624_v6 = vld [vmem:[%s1979_s7 + $0x8] sm:$0xff] (!%p366_p7)   ;;  %vm1686_vm0 = vmmov (!%p366_p7), 0   ;;  %s372_s12 = sand.u32 (!%p366_p7), 1, %s1675_s13   ;;  %v1625_v7 = vld [vmem:[%s1979_s7 + $0x10] sm:$0xff] (!%p366_p7)  }
  0x19   : > { %369 = sbr.rel (%p366_p7) target bundleno = 644 (0x284), region = 97  ;;  %1470 = vmatprep.subr.bf16.mxu1 (!%p366_p7), %v1685_v5  ;;  %1510 = vmatprep.subr.bf16.mxu0 (!%p366_p7), %v1685_v5  ;;  %s1388_s18 = sshll.u32 (!%p366_p7), %s372_s12, 4  ;;  %v1626_v8 = vld [vmem:[%s1979_s7 + $0x18] sm:$0xff] (!%p366_p7)   ;;  %v1627_v9 = vld [vmem:[%s1979_s7 + $0x20] sm:$0xff] (!%p366_p7)   ;;  %v1628_v10 = vld [vmem:[%s1979_s7 + $0x28] sm:$0xff] (!%p366_p7)   ;;  %vm689_vm1 = vcmask (!%p366_p7), 64512  }
  0x1a   : > { %1471 = vmatpush3.bf16.msra.mxu1 (!%p366_p7), %v1623_v4  ;;  %1486 = vmatprep.mubr.msk.bf16.mxu1 (!%p366_p7), %vm1686_vm0, %v1685_v5  ;;  %s374_s22 = scalar_lea.vmem (!%p366_p7), [#allocation3], %s1388_s18  ;;  %v1629_v13 = vld [vmem:[%s1979_s7 + $0x30] sm:$0xff] (!%p366_p7)   ;;  %v1630_v14 = vld [vmem:[%s1979_s7 + $0x38] sm:$0xff] (!%p366_p7)   ;;  %v1633_v16 = vld [vmem:[%s1973_s1] sm:$0xff] (!%p366_p7)   ;;  %691 = vst.msk [vmem:[#allocation2 + $0x8] sm:$0xff] (!%p366_p7), %vm689_vm1, %v1685_v5  ;;  %vm740_vm2 = vcmask (!%p366_p7), 1043456  }
  0x1b   : > { %1472 = vmatprep.subr.bf16.mxu1 (!%p366_p7), %v1685_v5  ;;  %1512 = vmatprep.mubr.msk.bf16.mxu0 (!%p366_p7), %vm1686_vm0, %v1685_v5  ;;  %v1659_v11 = vld.sshfl [vmem:[%s374_s22] sm:$0xff pattern:$0x76325410] (!%p366_p7)  ;;  %v1660_v12 = vld.sshfl [vmem:[%s374_s22 + $0x8] sm:$0xff pattern:$0x76325410] (!%p366_p7) }
  0x1c   : > { %v455_v15 = vcombine.low (!%p366_p7), %v1659_v11, %v1660_v12  ;;  %v1634_v17 = vld [vmem:[%s1973_s1 + $0x8] sm:$0xff] (!%p366_p7)   ;;  %v1635_v18 = vld [vmem:[%s1973_s1 + $0x10] sm:$0xff] (!%p366_p7)   ;;  %v1636_v19 = vld [vmem:[%s1973_s1 + $0x18] sm:$0xff] (!%p366_p7)   ;;  %692 = vst.msk [vmem:[#allocation2 + $0x10] sm:$0xff] (!%p366_p7), %vm689_vm1, %v1685_v5  ;;  %vm703_vm3 = vcmask (!%p366_p7), 60416   ;;  %p409_p8 = scmp.lt.s32.totalorder (!%p366_p7), %s1380_s16, 1 }
  0x1d   : > { %v1637_v20 = vld [vmem:[%s1973_s1 + $0x20] sm:$0xff] (!%p366_p7)   ;;  %v1638_v21 = vld [vmem:[%s1973_s1 + $0x28] sm:$0xff] (!%p366_p7)   ;;  %v1639_v22 = vld [vmem:[%s1973_s1 + $0x30] sm:$0xff] (!%p366_p7)   ;;  %690 = vst.msk [vmem:[#allocation2] sm:$0xff] (!%p366_p7), %vm689_vm1, %v1685_v5 }
  0x1e   : > { %1473 = vmatpush3.bf16.msra.mxu1 (!%p366_p7), %v1624_v6  ;;  %v1640_v23 = vld [vmem:[%s1973_s1 + $0x38] sm:$0xff] (!%p366_p7)   ;;  %693 = vst.msk [vmem:[#allocation2 + $0x18] sm:$0xff] (!%p366_p7), %vm689_vm1, %v1685_v5  ;;  %694 = vst.msk [vmem:[#allocation2 + $0x20] sm:$0xff] (!%p366_p7), %vm689_vm1, %v1685_v5  ;;  %v1411_v24 = vld [vmem:[%s1976_s4 + $0x4] sm:$0xf] (!%p366_p7) }
  0x1f   : > { %1474 = vmatprep.subr.bf16.mxu1 (!%p366_p7), %v1685_v5  ;;  %695 = vst.msk [vmem:[#allocation2 + $0x28] sm:$0xff] (!%p366_p7), %vm689_vm1, %v1685_v5  ;;  %v742_v25 = vsel (!%p366_p7), %vm740_vm2, %v1411_v24, 0  ;;  %v1409_v30 = vld [vmem:[%s1974_s2] ss:$0 sm:$0xff] (!%p366_p7)  ;;  %v1414_v50 = vld [vmem:[%s1976_s4 + $0x8] sm:$0xf] (!%p366_p7) }
  0x20   : > { %1511 = vmatpush3.bf16.msra.mxu0 %v742_v25  ;;  %v1410_v32 = vld [vmem:[%s1975_s3] ss:$0 sm:$0xff]  ;;  %v851_v53 = vsel %vm740_vm2, %v1414_v50, 0  ;;  %v1416_v55 = vld [vmem:[%s1976_s4 + $0xc] sm:$0xf]  ;;  %s1987_s16 = smov (!%p409_p8, %s1380_s16), 1 }
  0x21   : > { %1516 = vmatprep.subr.bf16.mxu0 %v1685_v5  ;;  %v721_v45 = vld [vmem:[%s1976_s4] sm:$0xf]  ;;  %v915_v58 = vsel %vm740_vm2, %v1416_v55, 0  ;;  %v1418_v60 = vld [vmem:[%s1976_s4 + $0x10] sm:$0xf]  ;;  %s1433_s18 = sshll.u32 %s1987_s16, 3 }
  0x22   : > { %1475 = vmatpush3.bf16.msra.mxu1 %v1625_v7  ;;  %v789_v48 = vsel %vm740_vm2, %v721_v45, 0  ;;  %v979_v63 = vsel %vm740_vm2, %v1418_v60, 0  ;;  %v1420_v1 = vld [vmem:[%s1976_s4 + $0x14] sm:$0xf]  ;;  %v1422_v7 = vld [vmem:[%s1976_s4 + $0x18] sm:$0xf]  ;;  %s413_s22 = scalar_lea.vmem %s1982_s10, %s1433_s18 }
  0x23   : > { %1476 = vmatprep.subr.bf16.mxu1 %v1685_v5  ;;  %v1043_v4 = vsel %vm740_vm2, %v1420_v1, 0  ;;  %v1424_v12 = vld [vmem:[%s1976_s4 + $0x1c] sm:$0xf]  ;;  %v1399_v24 = vld [vmem:[%s1980_s8] ss:$0 sm:$0xff] }
  0x24   : > { %v1428_v25 = vld [vmem:[%s1977_s5] ss:$0 sm:$0xff] }
  0x26   : > { %1477 = vmatpush3.bf16.msra.mxu1 %v1626_v8 }
  0x27   : > { %1478 = vmatprep.subr.bf16.mxu1 %v1685_v5 }
  0x2a   : > { %1479 = vmatpush3.bf16.msra.mxu1 %v1627_v9 }
  0x2b   : > { %1480 = vmatprep.subr.bf16.mxu1 %v1685_v5 }
  0x2e   : > { %1481 = vmatpush3.bf16.msra.mxu1 %v1628_v10  ;;  %v1108_v10 = vsel %vm740_vm2, %v1422_v7, 0 }
  0x2f   : > { %1482 = vmatprep.subr.bf16.mxu1 %v1685_v5 }
  0x32   : > { %1483 = vmatpush3.bf16.msra.mxu1 %v1629_v13 }
  0x33   : > { %1484 = vmatprep.subr.bf16.mxu1 %v1685_v5 }
  0x36   : > { %1485 = vmatpush3.bf16.msra.mxu1 %v1630_v14 }
  0x37   : > { %1490 = vmatprep.subr.bf16.mxu1 %v1685_v5 }
  0x39   : > { %1487 = vmatmul.mubr.bf16.vlgmr.msra.gmra.mrb[0].mxu1 %v455_v15 }
  0x3a   : > { %1491 = vmatpush3.bf16.msra.mxu1 %v1633_v16  ;;  %1506 = vmatprep.mubr.msk.bf16.mxu1 %vm1686_vm0, %v1685_v5 }
  0x3b   : > { %1492 = vmatprep.subr.bf16.mxu1 %v1685_v5 }
  0x3e   : > { %1493 = vmatpush3.bf16.msra.mxu1 %v1634_v17  ;;  %v1426_v17 = vld [vmem:[%s1976_s4 + $0x20] sm:$0xf] }
  0x3f   : > { %1494 = vmatprep.subr.bf16.mxu1 %v1685_v5 }
  0x42   : > { %1495 = vmatpush3.bf16.msra.mxu1 %v1635_v18 }
  0x43   : > { %1496 = vmatprep.subr.bf16.mxu1 %v1685_v5 }
  0x46   : > { %1497 = vmatpush3.bf16.msra.mxu1 %v1636_v19 }
  0x47   : > { %1498 = vmatprep.subr.bf16.mxu1 %v1685_v5 }
  0x4a   : > { %1499 = vmatpush3.bf16.msra.mxu1 %v1637_v20  ;;  %v1236_v20 = vsel %vm740_vm2, %v1426_v17, 0 }
  0x4b   : > { %1500 = vmatprep.subr.bf16.mxu1 %v1685_v5 }
  0x4e   : > { %1501 = vmatpush3.bf16.msra.mxu1 %v1638_v21 }
  0x4f   : > { %1502 = vmatprep.subr.bf16.mxu1 %v1685_v5 }
  0x52   : > { %1503 = vmatpush3.bf16.msra.mxu1 %v1639_v22 }
  0x53   : > { %1504 = vmatprep.subr.bf16.mxu1 %v1685_v5 }
  0x56   : > { %1505 = vmatpush3.bf16.msra.mxu1 %v1640_v23 }
  0x59   : > { %1507 = vmatmul.mubr.bf16.vlgmr.msra.gmra.mrb[4].mxu1 %v455_v15  ;;  %v1172_v15 = vsel %vm740_vm2, %v1424_v12, 0 }
 0x10c   : > { %v1867_v26 = vpop.f32.mrb[0].mxu1 }
 0x10d   : > { %v1488_v27 = vpop.f32.mrb[1].mxu1 }
 0x10e   : > { %v1869_v28 = vpop.f32.mrb[2].mxu1 }
 0x10f   : > { %v1489_v29 = vpop.f32.mrb[3].mxu1 }
 0x110   : > { %v553_v29 = vmul.f32 %v1399_v24, %v1867_v26 }
 0x12c   : > { %v662_v31 = vpop.f32.mrb[4].mxu1 }
 0x12d   : > { %v676_v33 = vmul.f32 %v1409_v30, %v662_v31  ;;  %v1508_v34 = vpop.f32.mrb[5].mxu1 }
 0x12e   : > { %v665_v35 = vpop.f32.mrb[6].mxu1  ;;  %v554_v34 = vmul.f32 %v1399_v24, %v1869_v28 }
 0x12f   : > { %v685_v36 = vadd.f32 %v1410_v32, %v676_v33  ;;  %v677_v37 = vmul.f32 %v1409_v30, %v665_v35  ;;  %v1509_v38 = vpop.f32.mrb[7].mxu1 }
 0x131   : > { %v687_v39 = vmax.f32 %v685_v36, 0.0  ;;  %v686_v40 = vadd.f32 %v1410_v32, %v677_v37  ;;  %v1400_v32 = vld [vmem:[%s1981_s9] ss:$0 sm:$0xff] }
 0x132   : > { %v562_v38 = vadd.f32 %v1400_v32, %v553_v29 }
 0x133   : > { %v698_v41 = vcombine.high %v687_v39, %v687_v39  ;;  %704 = vst.msk [vmem:[#allocation2 + $0x9] sm:$0xf] %vm703_vm3, %v687_v39  ;;  %v688_v42 = vmax.f32 %v686_v40, 0.0 }
 0x135   : > { %705 = vst.msk [vmem:[#allocation2 + $0x11] sm:$0xf] %vm703_vm3, %v698_v41  ;;  %v699_v43 = vcombine.high %v688_v42, %v688_v42  ;;  %706 = vst.msk [vmem:[#allocation2 + $0x19] sm:$0xf] %vm703_vm3, %v688_v42  ;;  %v563_v41 = vadd.f32 %v1400_v32, %v554_v34 }
 0x137   : > { %707 = vst.msk [vmem:[#allocation2 + $0x21] sm:$0xf] %vm703_vm3, %v699_v43 }
 0x13a   : > { %v1641_v44 = vld [vmem:[#allocation2 + $0x1] ss:$8 sps:$4 sm:$0xff]  }
 0x13b   : > { %v1643_v51 = vld [vmem:[#allocation2] ss:$8 sps:$4 sm:$0xff]  }
 0x13c   : > { %v1642_v46 = vld [vmem:[#allocation2 + $0x11] ss:$8 sps:$4 sm:$0xff]   ;;  %v1645_v56 = vld [vmem:[#allocation2 + $0x2] ss:$8 sps:$4 sm:$0xff]  }
 0x13d   : > { %v734_v47 = vpack.c.bf16 %v1642_v46, %v1641_v44  ;;  %v1644_v49 = vld [vmem:[#allocation2 + $0x10] ss:$8 sps:$4 sm:$0xff]  }
 0x13e   : > { %v720_v52 = vpack.c.bf16 %v1644_v49, %v1643_v51  ;;  %v1646_v54 = vld [vmem:[#allocation2 + $0x12] ss:$8 sps:$4 sm:$0xff]   ;;  %v1654_v11 = vld [vmem:[#allocation2 + $0x20] ss:$8 sps:$4 sm:$0xff]  }
 0x13f   : > { %1513 = vmatmul.mubr.msk.bf16.vlgmr.msra.gmra.mrb[0].mxu0 %vm689_vm1, %v734_v47  ;;  %v844_v57 = vpack.c.bf16 %v1646_v54, %v1645_v56  ;;  %v1648_v59 = vld [vmem:[#allocation2 + $0x18] ss:$8 sps:$4 sm:$0xff]   ;;  %v1647_v61 = vld [vmem:[#allocation2 + $0x8] ss:$8 sps:$4 sm:$0xff]  }
 0x140   : > { %1517 = vmatpush3.bf16.msra.mxu0 %v789_v48  ;;  %1518 = vmatprep.mubr.msk.bf16.mxu0 %vm1686_vm0, %v1685_v5  ;;  %v908_v62 = vpack.c.bf16 %v1648_v59, %v1647_v61  ;;  %v1650_v0 = vld [vmem:[#allocation2 + $0x19] ss:$8 sps:$4 sm:$0xff]   ;;  %v1649_v2 = vld [vmem:[#allocation2 + $0x9] ss:$8 sps:$4 sm:$0xff]  }
 0x141   : > { %1522 = vmatprep.subr.bf16.mxu0 %v1685_v5  ;;  %v972_v3 = vpack.c.bf16 %v1650_v0, %v1649_v2  ;;  %v1652_v6 = vld [vmem:[#allocation2 + $0x1a] ss:$8 sps:$4 sm:$0xff]   ;;  %v1651_v8 = vld [vmem:[#allocation2 + $0xa] ss:$8 sps:$4 sm:$0xff]  }
 0x142   : > { %v1036_v9 = vpack.c.bf16 %v1652_v6, %v1651_v8  ;;  %v1653_v13 = vld [vmem:[#allocation2 + $0x10] ss:$8 sps:$4 sm:$0xff]   ;;  %v1656_v16 = vld [vmem:[#allocation2 + $0x21] ss:$8 sps:$4 sm:$0xff]  }
 0x143   : > { %v1101_v14 = vpack.c.bf16 %v1654_v11, %v1653_v13  ;;  %v1655_v18 = vld [vmem:[#allocation2 + $0x11] ss:$8 sps:$4 sm:$0xff]   ;;  %v1658_v21 = vld [vmem:[#allocation2 + $0x22] ss:$8 sps:$4 sm:$0xff]  }
 0x144   : > { %v1165_v19 = vpack.c.bf16 %v1656_v16, %v1655_v18  ;;  %v1657_v22 = vld [vmem:[#allocation2 + $0x12] ss:$8 sps:$4 sm:$0xff]  }
 0x145   : > { %v1229_v23 = vpack.c.bf16 %v1658_v21, %v1657_v22 }
 0x14b   : > { %1519 = vmatmul.mubr.msk.bf16.vlgmr.msra.gmra.mrb[0].mxu0 %vm689_vm1, %v720_v52 }
 0x14c   : > { %1523 = vmatpush3.bf16.msra.mxu0 %v851_v53  ;;  %1524 = vmatprep.mubr.msk.bf16.mxu0 %vm1686_vm0, %v1685_v5 }
 0x14d   : > { %1528 = vmatprep.subr.bf16.mxu0 %v1685_v5 }
 0x157   : > { %1525 = vmatmul.mubr.msk.bf16.vlgmr.msra.gmra.mrb[0].mxu0 %vm689_vm1, %v844_v57 }
 0x158   : > { %1529 = vmatpush3.bf16.msra.mxu0 %v915_v58  ;;  %1530 = vmatprep.mubr.msk.bf16.mxu0 %vm1686_vm0, %v1685_v5 }
 0x159   : > { %1534 = vmatprep.subr.bf16.mxu0 %v1685_v5 }
 0x163   : > { %1531 = vmatmul.mubr.msk.bf16.vlgmr.msra.gmra.mrb[0].mxu0 %vm689_vm1, %v908_v62 }
 0x164   : > { %1535 = vmatpush3.bf16.msra.mxu0 %v979_v63  ;;  %1536 = vmatprep.mubr.msk.bf16.mxu0 %vm1686_vm0, %v1685_v5 }
 0x165   : > { %1540 = vmatprep.subr.bf16.mxu0 %v1685_v5 }
 0x16f   : > { %1537 = vmatmul.mubr.msk.bf16.vlgmr.msra.gmra.mrb[0].mxu0 %vm689_vm1, %v972_v3 }
 0x170   : > { %1541 = vmatpush3.bf16.msra.mxu0 %v1043_v4  ;;  %1542 = vmatprep.mubr.msk.bf16.mxu0 %vm1686_vm0, %v1685_v5 }
 0x171   : > { %1546 = vmatprep.subr.bf16.mxu0 %v1685_v5 }
 0x17b   : > { %1543 = vmatmul.mubr.msk.bf16.vlgmr.msra.gmra.mrb[0].mxu0 %vm689_vm1, %v1036_v9 }
 0x17c   : > { %1547 = vmatpush3.bf16.msra.mxu0 %v1108_v10  ;;  %1548 = vmatprep.mubr.msk.bf16.mxu0 %vm1686_vm0, %v1685_v5 }
 0x17d   : > { %1552 = vmatprep.subr.bf16.mxu0 %v1685_v5 }
 0x187   : > { %1549 = vmatmul.mubr.msk.bf16.vlgmr.msra.gmra.mrb[0].mxu0 %vm689_vm1, %v1101_v14 }
 0x188   : > { %1553 = vmatpush3.bf16.msra.mxu0 %v1172_v15  ;;  %1554 = vmatprep.mubr.msk.bf16.mxu0 %vm1686_vm0, %v1685_v5 }
 0x189   : > { %1558 = vmatprep.subr.bf16.mxu0 %v1685_v5 }
 0x193   : > { %1555 = vmatmul.mubr.msk.bf16.vlgmr.msra.gmra.mrb[0].mxu0 %vm689_vm1, %v1165_v19 }
 0x194   : > { %1559 = vmatpush3.bf16.msra.mxu0 %v1236_v20  ;;  %1560 = vmatprep.mubr.msk.bf16.mxu0 %vm1686_vm0, %v1685_v5  ;;  %v1429_v5 = vld [vmem:[%s1978_s6] ss:$0 sm:$0xff] }
 0x19f   : > { %1561 = vmatmul.mubr.msk.bf16.vlgmr.msra.gmra.mrb[0].mxu0 %vm689_vm1, %v1229_v23 }
 0x272   : > { %v1272_v27 = vpop.f32.mrb[0].mxu0 }
 0x273   : > { %v1288_v30 = vmul.f32 %v1428_v25, %v1272_v27  ;;  %v1562_v31 = vpop.f32.mrb[1].mxu0 }
 0x274   : > { %v1275_v33 = vpop.f32.mrb[2].mxu0 }
 0x275   : > { %v1297_v35 = vadd.f32 %v1429_v5, %v1288_v30  ;;  %v1289_v36 = vmul.f32 %v1428_v25, %v1275_v33  ;;  %v1563_v37 = vpop.f32.mrb[3].mxu0 }
 0x277   : > { %v1299_v39 = vmax.f32 %v1297_v35, 0.0  ;;  %v1298_v40 = vadd.f32 %v1429_v5, %v1289_v36 }
 0x279   : > { %v1301_v26 = vadd.f32 %v1299_v39, %v562_v38  ;;  %v1300_v42 = vmax.f32 %v1298_v40, 0.0 }
 0x27b   : > { %v1303_v43 = vmax.f32 %v1301_v26, 0.0  ;;  %v1302_v44 = vadd.f32 %v1300_v42, %v563_v41 }
 0x27d   : > { %v1307_v45 = vcombine.high %v1303_v43, %v1303_v43  ;;  %v1311_v28 = vpack.c.bf16 %v1303_v43, %v1303_v43  ;;  %v1304_v46 = vmax.f32 %v1302_v44, 0.0 }
 0x27f   : > { %v1312_v47 = vpack.c.bf16 %v1307_v45, %v1307_v45  ;;  %1315 = vst [vmem:[%s413_s22] sm:$0x3] %v1311_v28  ;;  %v1308_v48 = vcombine.high %v1304_v46, %v1304_v46  ;;  %v1313_v49 = vpack.c.bf16 %v1304_v46, %v1304_v46 }
 0x281   : > { %1316 = vst [vmem:[%s413_s22 + $0x2] sm:$0x3] %v1312_v47  ;;  %v1314_v50 = vpack.c.bf16 %v1308_v48, %v1308_v48  ;;  %1317 = vst [vmem:[%s413_s22 + $0x4] sm:$0x3] %v1313_v49 }
 0x283   : > { %1318 = vst [vmem:[%s413_s22 + $0x6] sm:$0x3] %v1314_v50 }
 0x284 PF: > { %p17_p9 = scmp.ge.s32.totalorder %s1759_s17, 4   ;;  %s1983_s13 = smov %s1679_s14 }
 0x285   : > { %s1984_s14 = smov %s1768_s20  ;;  %s1985_s15 = smov %s1759_s17 }
 0x286   :  { %19 = sbr.rel (!%p17_p9) target bundleno = 2 (0x2), region = 146 }

// kernel: resnet_forward.5
= control target key start
LH: loop header
LB: loop body
LE: loop exit
PB: predicated region body
PF: predicated region fallthrough
CT: control target
= control target key end

     0   :  { %s4434_s15 = smov 0   ;;  %s5124_s0 = inlined_call_operand.vmem [shape: bf16[2,16,16,8], index: 0, kind: input, shape index: {}]   ;;  %s5125_s1 = inlined_call_operand.vmem [shape: bf16[9,8,128], index: 1, kind: input, shape index: {}]   ;;  %s5126_s2 = inlined_call_operand.vmem [shape: f32[1,128], index: 2, kind: input, shape index: {}]   ;;  %s5127_s3 = inlined_call_operand.vmem [shape: f32[1,128], index: 3, kind: input, shape index: {}]   ;;  %s5128_s4 = inlined_call_operand.vmem [shape: bf16[2,16,16,128], index: 4, kind: output, shape index: {}]  }
   0x1 LB: > { %s3259_s16 = sadd.s32 4294967295, %s4406_s15   ;;  %p3263_p0 = scmp.ge.s32.totalorder %s4406_s15, 1  ;;  %s4406_s15 = sphi %s4434_s15, %s14_s15  }
   0x2   : > { %p162_p1 = scmp.lt.s32.totalorder %s4406_s15, 3 }
   0x4   : > { %p163_p2 = pnand %p3263_p0, %p162_p1 }
   0x5   : > { %v3268_v0 = vld [vmem:[%s5125_s1 + $0x4] sm:$0xf] (!%p163_p2)  ;;  %vm498_vm0 = vcmask (!%p163_p2), 1043456   ;;  %v4448_v1 = vld [vmem:[%s5125_s1 + $0x10] sm:$0xf] (!%p163_p2)  ;;  %vm199_vm1 = vcmask (!%p163_p2), 64512  }
   0x6   : > { %166 = sbr.rel (%p163_p2) target bundleno = 552 (0x228), region = 36  ;;  %4381 = vmatprep.subr.msk.bf16.mxu1 (!%p163_p2), %vm498_vm0, %v3268_v0  ;;  %4385 = vmatprep.subr.msk.bf16.mxu0 (!%p163_p2), %vm498_vm0, %v4448_v1  ;;  %v500_v2 = vsel (!%p163_p2), %vm498_vm0, %v3268_v0, 0  ;;  %v4456_v3 = vsel (!%p163_p2), %vm498_vm0, %v4448_v1, 0  ;;  %p4460_p3 = scmp.lt.s32.totalorder (!%p163_p2), %s3259_s16, 1  ;;  %v4467_v4 = vld [vmem:[%s5125_s1] sm:$0xf] (!%p163_p2) }
   0x7   : > { %3818 = vmatpush3.bf16.msra.mxu1 (!%p163_p2), %v500_v2  ;;  %3954 = vmatpush3.bf16.msra.mxu0 (!%p163_p2), %v4456_v3  ;;  %v4408_v5 = vmov (!%p163_p2), 0.0   ;;  %v4527_v6 = vld [vmem:[%s5125_s1 + $0x14] sm:$0xf] (!%p163_p2)  ;;  %v712_v62 = vsel (!%p163_p2), %vm498_vm0, %v4467_v4, 0 }
   0x8   : > { %200 = vst.msk [vmem:[#allocation2] sm:$0xff] (!%p163_p2), %vm199_vm1, %v4408_v5  ;;  %201 = vst.msk [vmem:[#allocation2 + $0x8] sm:$0xff] (!%p163_p2), %vm199_vm1, %v4408_v5  ;;  %4382 = vmatprep.subr.msk.bf16.mxu1 (!%p163_p2), %vm498_vm0, %v4467_v4  ;;  %4387 = vmatprep.subr.msk.bf16.mxu0 (!%p163_p2), %vm498_vm0, %v4527_v6  ;;  %v3369_v4 = vld [vmem:[%s5125_s1 + $0x18] sm:$0xf] (!%p163_p2) }
   0x9   : > { %202 = vst.msk [vmem:[#allocation2 + $0x10] sm:$0xff] (!%p163_p2), %vm199_vm1, %v4408_v5  ;;  %203 = vst.msk [vmem:[#allocation2 + $0x18] sm:$0xff] (!%p163_p2), %vm199_vm1, %v4408_v5 }
   0xa   : > { %204 = vst.msk [vmem:[#allocation2 + $0x20] sm:$0xff] (!%p163_p2), %vm199_vm1, %v4408_v5  ;;  %205 = vst.msk [vmem:[#allocation2 + $0x28] sm:$0xff] (!%p163_p2), %vm199_vm1, %v4408_v5 }
   0xb   : > { %206 = vst.msk [vmem:[#allocation2 + $0x30] sm:$0xff] (!%p163_p2), %vm199_vm1, %v4408_v5  ;;  %207 = vst.msk [vmem:[#allocation2 + $0x38] sm:$0xff] (!%p163_p2), %vm199_vm1, %v4408_v5 }
   0xc   : > { %208 = vst.msk [vmem:[#allocation2 + $0x40] sm:$0xff] (!%p163_p2), %vm199_vm1, %v4408_v5  ;;  %209 = vst.msk [vmem:[#allocation2 + $0x48] sm:$0xff] (!%p163_p2), %vm199_vm1, %v4408_v5 }
   0xd   : > { %210 = vst.msk [vmem:[#allocation2 + $0x50] sm:$0xff] %vm199_vm1, %v4408_v5  ;;  %211 = vst.msk [vmem:[#allocation2 + $0x58] sm:$0xff] %vm199_vm1, %v4408_v5  ;;  %s5131_s16 = smov (!%p4460_p3, %s3259_s16), 1 }
   0xe   : > { %212 = vst.msk [vmem:[#allocation2 + $0x60] sm:$0xff] %vm199_vm1, %v4408_v5  ;;  %213 = vst.msk [vmem:[#allocation2 + $0x68] sm:$0xff] %vm199_vm1, %v4408_v5  ;;  %s3456_s26 = sshll.u32 %s5131_s16, 7 }
   0xf   : > { %214 = vst.msk [vmem:[#allocation2 + $0x70] sm:$0xff] %vm199_vm1, %v4408_v5  ;;  %215 = vst.msk [vmem:[#allocation2 + $0x78] sm:$0xff] %vm199_vm1, %v4408_v5  ;;  %s4545_s29 = scalar_lea.vmem %s5124_s0, %s3456_s26  ;;  %v400_v17 = vld [vmem:[#allocation2 + $0x1] sm:$0xff]  ;;  %s5042_s22 = scalar_lea.vmem %s5128_s4, %s3456_s26 }
  0x10   : > { %216 = vst.msk [vmem:[#allocation2 + $0x80] sm:$0xff] %vm199_vm1, %v4408_v5  ;;  %217 = vst.msk [vmem:[#allocation2 + $0x88] sm:$0xff] %vm199_vm1, %v4408_v5  ;;  %v3491_v7 = vld [vmem:[%s4545_s29] sm:$0xff]   ;;  %v3634_v8 = vld [vmem:[%s4545_s29 + $0x8] sm:$0xff]  }
  0x11   : > { %218 = vst.msk [vmem:[#allocation2 + $0x90] sm:$0xff] %vm199_vm1, %v4408_v5  ;;  %219 = vst.msk [vmem:[#allocation2 + $0x98] sm:$0xff] %vm199_vm1, %v4408_v5  ;;  %v3635_v9 = vld [vmem:[%s4545_s29 + $0x10] sm:$0xff]   ;;  %v3492_v10 = vunpack.c.l.bf16 %v3491_v7  ;;  %v3493_v11 = vunpack.c.h.bf16 %v3491_v7  ;;  %v3496_v12 = vunpack.c.l.bf16 %v3634_v8  ;;  %v3497_v13 = vunpack.c.h.bf16 %v3634_v8  ;;  %v3636_v14 = vld [vmem:[%s4545_s29 + $0x18] sm:$0xff]  }
  0x12   : > { %220 = vst.msk [vmem:[#allocation2 + $0xa0] sm:$0xff] %vm199_vm1, %v4408_v5  ;;  %221 = vst.msk [vmem:[#allocation2 + $0xa8] sm:$0xff] %vm199_vm1, %v4408_v5  ;;  %v3637_v15 = vld [vmem:[%s4545_s29 + $0x20] sm:$0xff]   ;;  %v3638_v16 = vld [vmem:[%s4545_s29 + $0x28] sm:$0xff]   ;;  %v3500_v19 = vunpack.c.l.bf16 %v3635_v9  ;;  %v3501_v20 = vunpack.c.h.bf16 %v3635_v9  ;;  %v3504_v21 = vunpack.c.l.bf16 %v3636_v14  ;;  %v3505_v22 = vunpack.c.h.bf16 %v3636_v14 }
  0x13   : > { %222 = vst.msk [vmem:[#allocation2 + $0xb0] sm:$0xff] %vm199_vm1, %v4408_v5  ;;  %223 = vst.msk [vmem:[#allocation2 + $0xb8] sm:$0xff] %vm199_vm1, %v4408_v5  ;;  %v401_v18 = vld [vmem:[#allocation2 + $0x9] sm:$0xff]  ;;  %v3508_v25 = vunpack.c.l.bf16 %v3637_v15  ;;  %v3509_v26 = vunpack.c.h.bf16 %v3637_v15  ;;  %v3512_v27 = vunpack.c.l.bf16 %v3638_v16  ;;  %v3640_v28 = vld [vmem:[%s4545_s29 + $0x38] sm:$0xff]   ;;  %v3513_v31 = vunpack.c.h.bf16 %v3638_v16 }
  0x14   : > { %224 = vst.msk [vmem:[#allocation2 + $0xc0] sm:$0xff] %vm199_vm1, %v4408_v5  ;;  %225 = vst.msk [vmem:[#allocation2 + $0xc8] sm:$0xff] %vm199_vm1, %v4408_v5  ;;  %v3639_v23 = vld [vmem:[%s4545_s29 + $0x30] sm:$0xff]   ;;  %v432_v24 = vpack.c.bf16 %v401_v18, %v400_v17  ;;  %v3641_v29 = vld [vmem:[%s4545_s29 + $0x40] sm:$0xff]   ;;  %v3520_v34 = vunpack.c.l.bf16 %v3640_v28  ;;  %v3521_v38 = vunpack.c.h.bf16 %v3640_v28  ;;  %v1856_v7 = vsel %vm498_vm0, %v4527_v6, 0 }
  0x15   : > { %226 = vst.msk [vmem:[#allocation2 + $0xd0] sm:$0xff] %vm199_vm1, %v4408_v5  ;;  %227 = vst.msk [vmem:[#allocation2 + $0xd8] sm:$0xff] %vm199_vm1, %v4408_v5  ;;  %v3642_v30 = vld [vmem:[%s4545_s29 + $0x48] sm:$0xff]   ;;  %v3516_v32 = vunpack.c.l.bf16 %v3639_v23  ;;  %v3517_v33 = vunpack.c.h.bf16 %v3639_v23  ;;  %v3643_v35 = vld [vmem:[%s4545_s29 + $0x50] sm:$0xff]   ;;  %v3524_v39 = vunpack.c.l.bf16 %v3641_v29  ;;  %v3525_v40 = vunpack.c.h.bf16 %v3641_v29 }
  0x16   : > { %228 = vst.msk [vmem:[#allocation2 + $0xe0] sm:$0xff] %vm199_vm1, %v4408_v5  ;;  %229 = vst.msk [vmem:[#allocation2 + $0xe8] sm:$0xff] %vm199_vm1, %v4408_v5  ;;  %v3644_v36 = vld [vmem:[%s4545_s29 + $0x58] sm:$0xff]   ;;  %v3645_v37 = vld [vmem:[%s4545_s29 + $0x60] sm:$0xff]   ;;  %3819 = vmatprep.mubr.msk.bf16.mxu1 %vm199_vm1, %v432_v24  ;;  %v3528_v41 = vunpack.c.l.bf16 %v3642_v30  ;;  %v3529_v44 = vunpack.c.h.bf16 %v3642_v30  ;;  %v3532_v45 = vunpack.c.l.bf16 %v3643_v35  ;;  %v3533_v46 = vunpack.c.h.bf16 %v3643_v35 }
  0x17   : > { %230 = vst.msk [vmem:[#allocation2 + $0xf0] sm:$0xff] %vm199_vm1, %v4408_v5  ;;  %231 = vst.msk [vmem:[#allocation2 + $0xf8] sm:$0xff] %vm199_vm1, %v4408_v5  ;;  %v3646_v42 = vld [vmem:[%s4545_s29 + $0x68] sm:$0xff]   ;;  %v3647_v43 = vld [vmem:[%s4545_s29 + $0x70] sm:$0xff]   ;;  %v3536_v47 = vunpack.c.l.bf16 %v3644_v36  ;;  %v3537_v49 = vunpack.c.h.bf16 %v3644_v36  ;;  %v3540_v50 = vunpack.c.l.bf16 %v3645_v37  ;;  %v3541_v51 = vunpack.c.h.bf16 %v3645_v37 }
  0x18   : > { %232 = vst.msk [vmem:[#allocation2 + $0x100] sm:$0xff] %vm199_vm1, %v4408_v5  ;;  %233 = vst.msk [vmem:[#allocation2 + $0x108] sm:$0xff] %vm199_vm1, %v4408_v5  ;;  %v3648_v48 = vld [vmem:[%s4545_s29 + $0x78] sm:$0xff]   ;;  %v3544_v52 = vunpack.c.l.bf16 %v3646_v42  ;;  %v3545_v53 = vunpack.c.h.bf16 %v3646_v42  ;;  %v3548_v54 = vunpack.c.l.bf16 %v3647_v43  ;;  %v3549_v55 = vunpack.c.h.bf16 %v3647_v43  ;;  %v4614_v9 = vld [vmem:[%s5125_s1 + $0x8] sm:$0xf] }
  0x19   : > { %234 = vst.msk [vmem:[#allocation2 + $0x110] sm:$0xff] %vm199_vm1, %v4408_v5  ;;  %235 = vst.msk [vmem:[#allocation2 + $0x118] sm:$0xff] %vm199_vm1, %v4408_v5  ;;  %v3552_v56 = vunpack.c.l.bf16 %v3648_v48  ;;  %v3553_v57 = vunpack.c.h.bf16 %v3648_v48 }
  0x1a   : > { %236 = vst.msk [vmem:[#allocation2 + $0x120] sm:$0xff] %vm199_vm1, %v4408_v5  ;;  %237 = vst.msk [vmem:[#allocation2 + $0x128] sm:$0xff] %vm199_vm1, %v4408_v5 }
  0x1b   : > { %238 = vst.msk [vmem:[#allocation2 + $0x130] sm:$0xff] %vm199_vm1, %v4408_v5  ;;  %239 = vst.msk [vmem:[#allocation2 + $0x138] sm:$0xff] %vm199_vm1, %v4408_v5 }
  0x1c   : > { %240 = vst.msk [vmem:[#allocation2 + $0x140] sm:$0xff] %vm199_vm1, %v4408_v5  ;;  %241 = vst.msk [vmem:[#allocation2 + $0x148] sm:$0xff] %vm199_vm1, %v4408_v5 }
  0x1d   : > { %242 = vst.msk [vmem:[#allocation2 + $0x150] sm:$0xff] %vm199_vm1, %v4408_v5  ;;  %243 = vst.msk [vmem:[#allocation2 + $0x158] sm:$0xff] %vm199_vm1, %v4408_v5 }
  0x1e   : > { %244 = vst.msk [vmem:[#allocation2 + $0x160] sm:$0xff] %vm199_vm1, %v4408_v5  ;;  %245 = vst.msk [vmem:[#allocation2 + $0x168] sm:$0xff] %vm199_vm1, %v4408_v5 }
  0x1f   : > { %246 = vst.msk [vmem:[#allocation2 + $0x170] sm:$0xff] %vm199_vm1, %v4408_v5  ;;  %247 = vst.msk [vmem:[#allocation2 + $0x178] sm:$0xff] %vm199_vm1, %v4408_v5 }
  0x20   : > { %248 = vst.msk [vmem:[#allocation2 + $0x180] sm:$0xff] %vm199_vm1, %v4408_v5  ;;  %249 = vst.msk [vmem:[#allocation2 + $0x188] sm:$0xff] %vm199_vm1, %v4408_v5 }
  0x21   : > { %250 = vst.msk [vmem:[#allocation2 + $0x190] sm:$0xff] %vm199_vm1, %v4408_v5  ;;  %251 = vst.msk [vmem:[#allocation2 + $0x198] sm:$0xff] %vm199_vm1, %v4408_v5 }
  0x22   : > { %252 = vst.msk [vmem:[#allocation2 + $0x1a0] sm:$0xff] %vm199_vm1, %v4408_v5  ;;  %253 = vst.msk [vmem:[#allocation2 + $0x1a8] sm:$0xff] %vm199_vm1, %v4408_v5 }
  0x23   : > { %319 = vst.msk [vmem:[#allocation2 + $0x19] sm:$0xff] %vm199_vm1, %v3492_v10  ;;  %320 = vst.msk [vmem:[#allocation2 + $0x21] sm:$0xff] %vm199_vm1, %v3493_v11 }
  0x24   : > { %321 = vst.msk [vmem:[#allocation2 + $0x31] sm:$0xff] %vm199_vm1, %v3496_v12  ;;  %322 = vst.msk [vmem:[#allocation2 + $0x39] sm:$0xff] %vm199_vm1, %v3497_v13 }
  0x25   : > { %323 = vst.msk [vmem:[#allocation2 + $0x49] sm:$0xff] %vm199_vm1, %v3500_v19  ;;  %324 = vst.msk [vmem:[#allocation2 + $0x51] sm:$0xff] %vm199_vm1, %v3501_v20 }
  0x26   : > { %325 = vst.msk [vmem:[#allocation2 + $0x61] sm:$0xff] %vm199_vm1, %v3504_v21  ;;  %326 = vst.msk [vmem:[#allocation2 + $0x69] sm:$0xff] %vm199_vm1, %v3505_v22 }
  0x27   : > { %327 = vst.msk [vmem:[#allocation2 + $0x79] sm:$0xff] %vm199_vm1, %v3508_v25  ;;  %328 = vst.msk [vmem:[#allocation2 + $0x81] sm:$0xff] %vm199_vm1, %v3509_v26 }
  0x28   : > { %329 = vst.msk [vmem:[#allocation2 + $0x91] sm:$0xff] %vm199_vm1, %v3512_v27  ;;  %330 = vst.msk [vmem:[#allocation2 + $0x99] sm:$0xff] %vm199_vm1, %v3513_v31 }
  0x29   : > { %331 = vst.msk [vmem:[#allocation2 + $0xa9] sm:$0xff] %vm199_vm1, %v3516_v32  ;;  %332 = vst.msk [vmem:[#allocation2 + $0xb1] sm:$0xff] %vm199_vm1, %v3517_v33 }
  0x2a   : > { %333 = vst.msk [vmem:[#allocation2 + $0xc1] sm:$0xff] %vm199_vm1, %v3520_v34  ;;  %334 = vst.msk [vmem:[#allocation2 + $0xc9] sm:$0xff] %vm199_vm1, %v3521_v38  ;;  %v402_v58 = vld [vmem:[#allocation2 + $0x19] sm:$0xff]  ;;  %v403_v59 = vld [vmem:[#allocation2 + $0x21] sm:$0xff] }
  0x2b   : > { %335 = vst.msk [vmem:[#allocation2 + $0xd9] sm:$0xff] %vm199_vm1, %v3524_v39  ;;  %336 = vst.msk [vmem:[#allocation2 + $0xe1] sm:$0xff] %vm199_vm1, %v3525_v40  ;;  %v1465_v60 = vld [vmem:[#allocation2 + $0x31] sm:$0xff]  ;;  %v433_v61 = vpack.c.bf16 %v403_v59, %v402_v58  ;;  %v1466_v63 = vld [vmem:[#allocation2 + $0x39] sm:$0xff]  ;;  %v2151_v39 = vsel %vm498_vm0, %v3369_v4, 0 }
  0x2c   : > { %337 = vst.msk [vmem:[#allocation2 + $0xf1] sm:$0xff] %vm199_vm1, %v3528_v41  ;;  %338 = vst.msk [vmem:[#allocation2 + $0xf9] sm:$0xff] %vm199_vm1, %v3529_v44  ;;  %v406_v0 = vld [vmem:[#allocation2 + $0x49] sm:$0xff]  ;;  %v407_v2 = vld [vmem:[#allocation2 + $0x51] sm:$0xff]  ;;  %v4598_v5 = vpack.c.bf16 %v1466_v63, %v1465_v60 }
  0x2d   : > { %339 = vst.msk [vmem:[#allocation2 + $0x109] sm:$0xff] %vm199_vm1, %v3532_v45  ;;  %340 = vst.msk [vmem:[#allocation2 + $0x111] sm:$0xff] %vm199_vm1, %v3533_v46  ;;  %v4602_v8 = vpack.c.bf16 %v407_v2, %v406_v0  ;;  %3820 = vmatmul.mubr.msk.bf16.vlgmr.msra.gmra.mrb[0].mxu1 %vm199_vm1, %v433_v61  ;;  %3955 = vmatprep.mubr.msk.bf16.mxu0 %vm199_vm1, %v433_v61  ;;  %v1469_v6 = vld [vmem:[#allocation2 + $0x61] sm:$0xff]  ;;  %v1470_v10 = vld [vmem:[#allocation2 + $0x69] sm:$0xff] }
  0x2e   : > { %341 = vst.msk [vmem:[#allocation2 + $0x121] sm:$0xff] %vm199_vm1, %v3536_v47  ;;  %342 = vst.msk [vmem:[#allocation2 + $0x129] sm:$0xff] %vm199_vm1, %v3537_v49  ;;  %3852 = vmatpush3.bf16.msra.mxu1 %v712_v62  ;;  %3956 = vmatmul.mubr.msk.bf16.vlgmr.msra.gmra.mrb[0].mxu0 %vm199_vm1, %v4598_v5  ;;  %v410_v11 = vld [vmem:[#allocation2 + $0x79] sm:$0xff]  ;;  %v411_v12 = vld [vmem:[#allocation2 + $0x81] sm:$0xff]  ;;  %v4623_v13 = vpack.c.bf16 %v1470_v10, %v1469_v6 }
  0x2f   : > { %343 = vst.msk [vmem:[#allocation2 + $0x139] sm:$0xff] %vm199_vm1, %v3540_v50  ;;  %344 = vst.msk [vmem:[#allocation2 + $0x141] sm:$0xff] %vm199_vm1, %v3541_v51  ;;  %3988 = vmatpush3.bf16.msra.mxu0 %v1856_v7  ;;  %3823 = vmatprep.mubr.msk.bf16.mxu1 %vm199_vm1, %v4598_v5  ;;  %v4625_v14 = vpack.c.bf16 %v411_v12, %v410_v11  ;;  %v1473_v15 = vld [vmem:[#allocation2 + $0x91] sm:$0xff]  ;;  %v1474_v16 = vld [vmem:[#allocation2 + $0x99] sm:$0xff] }
  0x30   : > { %345 = vst.msk [vmem:[#allocation2 + $0x151] sm:$0xff] %vm199_vm1, %v3544_v52  ;;  %346 = vst.msk [vmem:[#allocation2 + $0x159] sm:$0xff] %vm199_vm1, %v3545_v53  ;;  %3959 = vmatprep.mubr.msk.bf16.mxu0 %vm199_vm1, %v4602_v8  ;;  %4388 = vmatprep.subr.msk.bf16.mxu0 %vm498_vm0, %v3369_v4  ;;  %v414_v17 = vld [vmem:[#allocation2 + $0xa9] sm:$0xff]  ;;  %v415_v18 = vld [vmem:[#allocation2 + $0xb1] sm:$0xff]  ;;  %v4635_v19 = vpack.c.bf16 %v1474_v16, %v1473_v15 }
  0x31   : > { %347 = vst.msk [vmem:[#allocation2 + $0x169] sm:$0xff] %vm199_vm1, %v3548_v54  ;;  %348 = vst.msk [vmem:[#allocation2 + $0x171] sm:$0xff] %vm199_vm1, %v3549_v55  ;;  %4383 = vmatprep.subr.msk.bf16.mxu1 %vm498_vm0, %v4614_v9  ;;  %v4637_v20 = vpack.c.bf16 %v415_v18, %v414_v17  ;;  %v1477_v21 = vld [vmem:[#allocation2 + $0xc1] sm:$0xff]  ;;  %v1478_v22 = vld [vmem:[#allocation2 + $0xc9] sm:$0xff] }
  0x32   : > { %349 = vst.msk [vmem:[#allocation2 + $0x181] sm:$0xff] %vm199_vm1, %v3552_v56  ;;  %350 = vst.msk [vmem:[#allocation2 + $0x189] sm:$0xff] %vm199_vm1, %v3553_v57  ;;  %v1757_v23 = vld [vmem:[#allocation2 + $0x1a] sm:$0xff]  ;;  %v1758_v24 = vld [vmem:[#allocation2 + $0x22] sm:$0xff]  ;;  %v4647_v25 = vpack.c.bf16 %v1478_v22, %v1477_v21 }
  0x33   : > { %v4649_v26 = vpack.c.bf16 %v1758_v24, %v1757_v23  ;;  %v418_v27 = vld [vmem:[#allocation2 + $0xd9] sm:$0xff]  ;;  %v419_v28 = vld [vmem:[#allocation2 + $0xe1] sm:$0xff]  ;;  %v420_v31 = vld [vmem:[#allocation2 + $0xf1] sm:$0xff] }
  0x34   : > { %v1759_v29 = vld [vmem:[#allocation2 + $0x32] sm:$0xff]  ;;  %v1760_v30 = vld [vmem:[#allocation2 + $0x3a] sm:$0xff]  ;;  %v1761_v33 = vld [vmem:[#allocation2 + $0x4a] sm:$0xff]  ;;  %v4659_v35 = vpack.c.bf16 %v419_v28, %v418_v27 }
  0x35   : > { %3824 = vmatmul.mubr.msk.bf16.gmra.mrb[4].mxu1 %vm199_vm1, %v4602_v8  ;;  %v421_v32 = vld [vmem:[#allocation2 + $0xf9] sm:$0xff]  ;;  %v4661_v36 = vpack.c.bf16 %v1760_v30, %v1759_v29  ;;  %v422_v41 = vld [vmem:[#allocation2 + $0x109] sm:$0xff]  ;;  %v423_v42 = vld [vmem:[#allocation2 + $0x111] sm:$0xff] }
  0x36   : > { %3960 = vmatmul.mubr.msk.bf16.gmra.mrb[4].mxu0 %vm199_vm1, %v4623_v13  ;;  %3827 = vmatprep.mubr.msk.bf16.mxu1 %vm199_vm1, %v4623_v13  ;;  %v1762_v34 = vld [vmem:[#allocation2 + $0x52] sm:$0xff]  ;;  %v4663_v37 = vpack.c.bf16 %v421_v32, %v420_v31  ;;  %v4673_v40 = vld [vmem:[%s5125_s1 + $0x1c] sm:$0xf]  ;;  %v1763_v43 = vld [vmem:[#allocation2 + $0x62] sm:$0xff]  ;;  %v4683_v49 = vpack.c.bf16 %v423_v42, %v422_v41 }
  0x37   : > { %3963 = vmatprep.mubr.msk.bf16.mxu0 %vm199_vm1, %v4625_v14  ;;  %v4665_v38 = vpack.c.bf16 %v1762_v34, %v1761_v33  ;;  %v1764_v44 = vld [vmem:[#allocation2 + $0x6a] sm:$0xff]  ;;  %v424_v45 = vld [vmem:[#allocation2 + $0x121] sm:$0xff]  ;;  %v426_v53 = vld [vmem:[#allocation2 + $0x139] sm:$0xff]  ;;  %v974_v34 = vsel %vm498_vm0, %v4614_v9, 0 }
  0x38   : > { %v425_v46 = vld [vmem:[#allocation2 + $0x129] sm:$0xff]  ;;  %v1765_v47 = vld [vmem:[#allocation2 + $0x7a] sm:$0xff]  ;;  %v4685_v50 = vpack.c.bf16 %v1764_v44, %v1763_v43  ;;  %v1767_v55 = vld [vmem:[#allocation2 + $0x92] sm:$0xff] }
  0x39   : > { %v1766_v48 = vld [vmem:[#allocation2 + $0x82] sm:$0xff]  ;;  %v4687_v51 = vpack.c.bf16 %v425_v46, %v424_v45  ;;  %v1768_v56 = vld [vmem:[#allocation2 + $0x9a] sm:$0xff]  ;;  %v428_v57 = vld [vmem:[#allocation2 + $0x151] sm:$0xff] }
  0x3a   : > { %v4689_v52 = vpack.c.bf16 %v1766_v48, %v1765_v47  ;;  %v427_v54 = vld [vmem:[#allocation2 + $0x141] sm:$0xff]  ;;  %v429_v58 = vld [vmem:[#allocation2 + $0x159] sm:$0xff]  ;;  %v1769_v59 = vld [vmem:[#allocation2 + $0xaa] sm:$0xff]  ;;  %v4701_v62 = vpack.c.bf16 %v1768_v56, %v1767_v55 }
  0x3b   : > { %v1770_v60 = vld [vmem:[#allocation2 + $0xb2] sm:$0xff]  ;;  %v4699_v61 = vpack.c.bf16 %v427_v54, %v426_v53  ;;  %v4703_v63 = vpack.c.bf16 %v429_v58, %v428_v57  ;;  %v430_v2 = vld [vmem:[#allocation2 + $0x169] sm:$0xff]  ;;  %v351_v4 = vld [vmem:[#allocation2] sm:$0xff] }
  0x3c   : > { %v4705_v0 = vpack.c.bf16 %v1770_v60, %v1769_v59  ;;  %v431_v7 = vld [vmem:[#allocation2 + $0x171] sm:$0xff]  ;;  %v1771_v6 = vld [vmem:[#allocation2 + $0xc2] sm:$0xff]  ;;  %v1773_v12 = vld [vmem:[#allocation2 + $0xda] sm:$0xff] }
  0x3d   : > { %3828 = vmatmul.mubr.msk.bf16.gmra.mrb[8].mxu1 %vm199_vm1, %v4625_v14  ;;  %v1772_v10 = vld [vmem:[#allocation2 + $0xca] sm:$0xff]  ;;  %v1774_v15 = vld [vmem:[#allocation2 + $0xe2] sm:$0xff]  ;;  %v4715_v16 = vpack.c.bf16 %v431_v7, %v430_v2  ;;  %v353_v22 = vld [vmem:[#allocation2 + $0x18] sm:$0xff] }
  0x3e   : > { %3964 = vmatmul.mubr.msk.bf16.gmra.mrb[8].mxu0 %vm199_vm1, %v4635_v19  ;;  %3831 = vmatprep.mubr.msk.bf16.mxu1 %vm199_vm1, %v4635_v19  ;;  %v352_v11 = vld [vmem:[#allocation2 + $0x8] sm:$0xff]  ;;  %v4717_v17 = vpack.c.bf16 %v1772_v10, %v1771_v6  ;;  %v4719_v21 = vpack.c.bf16 %v1774_v15, %v1773_v12  ;;  %v354_v23 = vld [vmem:[#allocation2 + $0x20] sm:$0xff]  ;;  %v1775_v24 = vld [vmem:[#allocation2 + $0xf2] sm:$0xff] }
  0x3f   : > { %3967 = vmatprep.mubr.msk.bf16.mxu0 %vm199_vm1, %v4637_v20  ;;  %v383_v18 = vpack.c.bf16 %v352_v11, %v351_v4  ;;  %v1776_v27 = vld [vmem:[#allocation2 + $0xfa] sm:$0xff]  ;;  %v355_v28 = vld [vmem:[#allocation2 + $0x30] sm:$0xff]  ;;  %v4728_v32 = vpack.c.bf16 %v354_v23, %v353_v22  ;;  %v4743_v42 = vld [vmem:[%s5125_s1 + $0xc] sm:$0xf] }
  0x40   : > { %v356_v29 = vld [vmem:[#allocation2 + $0x38] sm:$0xff]  ;;  %v1777_v30 = vld [vmem:[#allocation2 + $0x10a] sm:$0xff]  ;;  %v4730_v33 = vpack.c.bf16 %v1776_v27, %v1775_v24  ;;  %v1779_v45 = vld [vmem:[#allocation2 + $0x122] sm:$0xff] }
  0x41   : > { %v1778_v31 = vld [vmem:[#allocation2 + $0x112] sm:$0xff]  ;;  %v357_v43 = vld [vmem:[#allocation2 + $0x48] sm:$0xff]  ;;  %v359_v46 = vld [vmem:[#allocation2 + $0x60] sm:$0xff] }
  0x42   : > { %v4736_v41 = vpack.c.bf16 %v1778_v31, %v1777_v30  ;;  %v358_v44 = vld [vmem:[#allocation2 + $0x50] sm:$0xff]  ;;  %v360_v47 = vld [vmem:[#allocation2 + $0x68] sm:$0xff]  ;;  %v1781_v48 = vld [vmem:[#allocation2 + $0x13a] sm:$0xff] }
  0x43   : > { %v1780_v9 = vld [vmem:[#allocation2 + $0x12a] sm:$0xff]  ;;  %v1782_v53 = vld [vmem:[#allocation2 + $0x142] sm:$0xff]  ;;  %v4753_v54 = vpack.c.bf16 %v358_v44, %v357_v43  ;;  %v4757_v56 = vpack.c.bf16 %v360_v47, %v359_v46  ;;  %v361_v58 = vld [vmem:[#allocation2 + $0x78] sm:$0xff] }
  0x44   : > { %v4755_v55 = vpack.c.bf16 %v1780_v9, %v1779_v45  ;;  %v4759_v57 = vpack.c.bf16 %v1782_v53, %v1781_v48  ;;  %v362_v59 = vld [vmem:[#allocation2 + $0x80] sm:$0xff]  ;;  %v1783_v60 = vld [vmem:[#allocation2 + $0x152] sm:$0xff]  ;;  %v1785_v6 = vld [vmem:[#allocation2 + $0x16a] sm:$0xff]  ;;  %v2445_v48 = vsel %vm498_vm0, %v4673_v40, 0 }
  0x45   : > { %3832 = vmatmul.mubr.msk.bf16.gmra.mrb[12].mxu1 %vm199_vm1, %v4637_v20  ;;  %v1784_v2 = vld [vmem:[#allocation2 + $0x15a] sm:$0xff]  ;;  %v363_v7 = vld [vmem:[#allocation2 + $0x90] sm:$0xff]  ;;  %v4769_v11 = vpack.c.bf16 %v362_v59, %v361_v58  ;;  %v365_v22 = vld [vmem:[#allocation2 + $0xa8] sm:$0xff] }
  0x46   : > { %3968 = vmatmul.mubr.msk.bf16.gmra.mrb[12].mxu0 %vm199_vm1, %v4647_v25  ;;  %3835 = vmatprep.mubr.msk.bf16.mxu1 %vm199_vm1, %v4647_v25  ;;  %v364_v4 = vld [vmem:[#allocation2 + $0x98] sm:$0xff]  ;;  %v4771_v12 = vpack.c.bf16 %v1784_v2, %v1783_v60  ;;  %v366_v23 = vld [vmem:[#allocation2 + $0xb0] sm:$0xff]  ;;  %v1787_v24 = vld [vmem:[#allocation2 + $0x182] sm:$0xff] }
  0x47   : > { %3989 = vmatprep.mubr.msk.bf16.mxu0 %vm199_vm1, %v4649_v26  ;;  %v1786_v10 = vld [vmem:[#allocation2 + $0x172] sm:$0xff]  ;;  %v4773_v15 = vpack.c.bf16 %v364_v4, %v363_v7  ;;  %v1788_v27 = vld [vmem:[#allocation2 + $0x18a] sm:$0xff]  ;;  %v4785_v30 = vpack.c.bf16 %v366_v23, %v365_v22  ;;  %v370_v44 = vld [vmem:[#allocation2 + $0xe0] sm:$0xff] }
  0x48   : > { %v4787_v31 = vpack.c.bf16 %v1788_v27, %v1787_v24  ;;  %v369_v43 = vld [vmem:[#allocation2 + $0xd8] sm:$0xff]  ;;  %v371_v45 = vld [vmem:[#allocation2 + $0xf0] sm:$0xff]  ;;  %v3403_v53 = vld [vmem:[%s5125_s1 + $0x20] sm:$0xf] }
  0x49   : > { %v372_v9 = vld [vmem:[#allocation2 + $0xf8] sm:$0xff]  ;;  %v4799_v46 = vpack.c.bf16 %v370_v44, %v369_v43  ;;  %v373_v58 = vld [vmem:[#allocation2 + $0x108] sm:$0xff]  ;;  %v374_v59 = vld [vmem:[#allocation2 + $0x110] sm:$0xff] }
  0x4a   : > { %v4801_v47 = vpack.c.bf16 %v372_v9, %v371_v45  ;;  %v376_v60 = vld [vmem:[#allocation2 + $0x128] sm:$0xff]  ;;  %v4817_v2 = vpack.c.bf16 %v374_v59, %v373_v58  ;;  %v377_v4 = vld [vmem:[#allocation2 + $0x138] sm:$0xff]  ;;  %v1268_v9 = vsel %vm498_vm0, %v4743_v42, 0  ;;  %v2083_v58 = vld [vmem:[#allocation2 + $0x1a0] sm:$0xff] }
  0x4b   : > { %v380_v22 = vld [vmem:[#allocation2 + $0x158] sm:$0xff]  ;;  %v381_v27 = vld [vmem:[#allocation2 + $0x168] sm:$0xff] }
  0x4c   : > { %v876_v43 = vld [vmem:[#allocation2 + $0xa] sm:$0xff] }
  0x4d   : > { %3836 = vmatmul.mubr.msk.bf16.gmra.mrb[16].mxu1 %vm199_vm1, %v4659_v35 }
  0x4e   : > { %3990 = vmatmul.mubr.msk.bf16.vlgmr.msra.gmra.mrb[0].mxu0 %vm199_vm1, %v4661_v36  ;;  %3839 = vmatprep.mubr.msk.bf16.mxu1 %vm199_vm1, %v4663_v37 }
  0x4f   : > { %4022 = vmatpush3.bf16.msra.mxu0 %v2151_v39  ;;  %3993 = vmatprep.mubr.msk.bf16.mxu0 %vm199_vm1, %v4665_v38  ;;  %v4734_v39 = vpack.c.bf16 %v356_v29, %v355_v28  ;;  %v367_v28 = vld [vmem:[#allocation2 + $0xc0] sm:$0xff]  ;;  %v368_v29 = vld [vmem:[#allocation2 + $0xc8] sm:$0xff] }
  0x50   : > { %4389 = vmatprep.subr.msk.bf16.mxu0 %vm498_vm0, %v4673_v40  ;;  %v375_v40 = vld [vmem:[#allocation2 + $0x120] sm:$0xff] }
  0x51   : > { %v4819_v7 = vpack.c.bf16 %v376_v60, %v375_v40  ;;  %v2739_v40 = vsel %vm498_vm0, %v3403_v53, 0 }
  0x55   : > { %3840 = vmatmul.mubr.msk.bf16.gmra.mrb[20].mxu1 %vm199_vm1, %v4683_v49 }
  0x56   : > { %3994 = vmatmul.mubr.msk.bf16.gmra.mrb[4].mxu0 %vm199_vm1, %v4685_v50  ;;  %3843 = vmatprep.mubr.msk.bf16.mxu1 %vm199_vm1, %v4687_v51 }
  0x57   : > { %3997 = vmatprep.mubr.msk.bf16.mxu0 %vm199_vm1, %v4689_v52 }
  0x5d   : > { %3844 = vmatmul.mubr.msk.bf16.gmra.mrb[24].mxu1 %vm199_vm1, %v4699_v61 }
  0x5e   : > { %3998 = vmatmul.mubr.msk.bf16.gmra.mrb[8].mxu0 %vm199_vm1, %v4701_v62  ;;  %3847 = vmatprep.mubr.msk.bf16.mxu1 %vm199_vm1, %v4703_v63 }
  0x5f   : > { %4001 = vmatprep.mubr.msk.bf16.mxu0 %vm199_vm1, %v4705_v0 }
  0x65   : > { %3848 = vmatmul.mubr.msk.bf16.gmra.mrb[28].mxu1 %vm199_vm1, %v4715_v16 }
  0x66   : > { %4002 = vmatmul.mubr.msk.bf16.gmra.mrb[12].mxu0 %vm199_vm1, %v4717_v17  ;;  %3853 = vmatprep.mubr.msk.bf16.mxu1 %vm199_vm1, %v383_v18  ;;  %v4775_v18 = vpack.c.bf16 %v1786_v10, %v1785_v6  ;;  %v378_v6 = vld [vmem:[#allocation2 + $0x140] sm:$0xff]  ;;  %v379_v10 = vld [vmem:[#allocation2 + $0x150] sm:$0xff] }
  0x67   : > { %4005 = vmatprep.mubr.msk.bf16.mxu0 %vm199_vm1, %v4719_v21  ;;  %v4829_v23 = vpack.c.bf16 %v378_v6, %v377_v4  ;;  %v4831_v24 = vpack.c.bf16 %v380_v22, %v379_v10 }
  0x6d   : > { %3854 = vmatmul.mubr.msk.bf16.vlgmr.msra.gmra.mrb[0].mxu1 %vm199_vm1, %v4728_v32 }
  0x6e   : > { %3886 = vmatpush3.bf16.msra.mxu1 %v974_v34  ;;  %4006 = vmatmul.mubr.msk.bf16.gmra.mrb[16].mxu0 %vm199_vm1, %v4730_v33  ;;  %v4789_v34 = vpack.c.bf16 %v368_v29, %v367_v28  ;;  %v382_v28 = vld [vmem:[#allocation2 + $0x170] sm:$0xff]  ;;  %v875_v29 = vld [vmem:[#allocation2 + $0x2] sm:$0xff] }
  0x6f   : > { %3857 = vmatprep.mubr.msk.bf16.mxu1 %vm199_vm1, %v4734_v39  ;;  %4009 = vmatprep.mubr.msk.bf16.mxu0 %vm199_vm1, %v4736_v41  ;;  %v4841_v44 = vpack.c.bf16 %v382_v28, %v381_v27  ;;  %v907_v45 = vpack.c.bf16 %v876_v43, %v875_v29 }
  0x70   : > { %4384 = vmatprep.subr.msk.bf16.mxu1 %vm498_vm0, %v4743_v42  ;;  %v2081_v42 = vld [vmem:[#allocation2 + $0x188] sm:$0xff] }
  0x75   : > { %3858 = vmatmul.mubr.msk.bf16.gmra.mrb[4].mxu1 %vm199_vm1, %v4753_v54 }
  0x76   : > { %4010 = vmatmul.mubr.msk.bf16.gmra.mrb[20].mxu0 %vm199_vm1, %v4755_v55  ;;  %3861 = vmatprep.mubr.msk.bf16.mxu1 %vm199_vm1, %v4757_v56 }
  0x77   : > { %4013 = vmatprep.mubr.msk.bf16.mxu0 %vm199_vm1, %v4759_v57 }
  0x7d   : > { %3862 = vmatmul.mubr.msk.bf16.gmra.mrb[8].mxu1 %vm199_vm1, %v4769_v11 }
  0x7e   : > { %4014 = vmatmul.mubr.msk.bf16.gmra.mrb[24].mxu0 %vm199_vm1, %v4771_v12  ;;  %3865 = vmatprep.mubr.msk.bf16.mxu1 %vm199_vm1, %v4773_v15 }
  0x7f   : > { %4017 = vmatprep.mubr.msk.bf16.mxu0 %vm199_vm1, %v4775_v18 }
  0x85   : > { %3866 = vmatmul.mubr.msk.bf16.gmra.mrb[12].mxu1 %vm199_vm1, %v4785_v30 }
  0x86   : > { %4018 = vmatmul.mubr.msk.bf16.gmra.mrb[28].mxu0 %vm199_vm1, %v4787_v31  ;;  %3869 = vmatprep.mubr.msk.bf16.mxu1 %vm199_vm1, %v4789_v34 }
  0x87   : > { %4023 = vmatprep.mubr.msk.bf16.mxu0 %vm199_vm1, %v4734_v39 }
  0x8d   : > { %3870 = vmatmul.mubr.msk.bf16.gmra.mrb[16].mxu1 %vm199_vm1, %v4799_v46 }
  0x8e   : > { %4024 = vmatmul.mubr.msk.bf16.vlgmr.msra.gmra.mrb[0].mxu0 %vm199_vm1, %v4753_v54  ;;  %3873 = vmatprep.mubr.msk.bf16.mxu1 %vm199_vm1, %v4801_v47 }
  0x8f   : > { %4056 = vmatpush3.bf16.msra.mxu0 %v2445_v48  ;;  %4027 = vmatprep.mubr.msk.bf16.mxu0 %vm199_vm1, %v4757_v56 }
  0x90   : > { %4390 = vmatprep.subr.msk.bf16.mxu0 %vm498_vm0, %v3403_v53 }
  0x95   : > { %3874 = vmatmul.mubr.msk.bf16.gmra.mrb[20].mxu1 %vm199_vm1, %v4817_v2 }
  0x96   : > { %4028 = vmatmul.mubr.msk.bf16.gmra.mrb[4].mxu0 %vm199_vm1, %v4769_v11  ;;  %3877 = vmatprep.mubr.msk.bf16.mxu1 %vm199_vm1, %v4819_v7 }
  0x97   : > { %4031 = vmatprep.mubr.msk.bf16.mxu0 %vm199_vm1, %v4773_v15 }
  0x9d   : > { %3878 = vmatmul.mubr.msk.bf16.gmra.mrb[24].mxu1 %vm199_vm1, %v4829_v23 }
  0x9e   : > { %4032 = vmatmul.mubr.msk.bf16.gmra.mrb[8].mxu0 %vm199_vm1, %v4785_v30  ;;  %3881 = vmatprep.mubr.msk.bf16.mxu1 %vm199_vm1, %v4831_v24 }
  0x9f   : > { %4035 = vmatprep.mubr.msk.bf16.mxu0 %vm199_vm1, %v4789_v34 }
  0xa5   : > { %3882 = vmatmul.mubr.msk.bf16.gmra.mrb[28].mxu1 %vm199_vm1, %v4841_v44 }
  0xa6   : > { %4036 = vmatmul.mubr.msk.bf16.gmra.mrb[12].mxu0 %vm199_vm1, %v4799_v46  ;;  %3887 = vmatprep.mubr.msk.bf16.mxu1 %vm199_vm1, %v907_v45 }
  0xa7   : > { %4039 = vmatprep.mubr.msk.bf16.mxu0 %vm199_vm1, %v4801_v47 }
  0xad   : > { %3888 = vmatmul.mubr.msk.bf16.vlgmr.msra.gmra.mrb[0].mxu1 %vm199_vm1, %v4649_v26  ;;  %v2080_v26 = vld [vmem:[#allocation2 + $0x180] sm:$0xff] }
  0xae   : > { %3920 = vmatpush3.bf16.msra.mxu1 %v1268_v9  ;;  %4040 = vmatmul.mubr.msk.bf16.gmra.mrb[16].mxu0 %vm199_vm1, %v4817_v2  ;;  %v4870_v48 = vpack.c.bf16 %v2081_v42, %v2080_v26 }
  0xaf   : > { %3891 = vmatprep.mubr.msk.bf16.mxu1 %vm199_vm1, %v4661_v36  ;;  %4043 = vmatprep.mubr.msk.bf16.mxu0 %vm199_vm1, %v4819_v7 }
  0xb0   : > { %4386 = vmatprep.subr.msk.bf16.mxu1 %vm498_vm0, %v4448_v1  ;;  %v2082_v1 = vld [vmem:[#allocation2 + $0x198] sm:$0xff] }
  0xb1   : > { %v2099_v59 = vpack.c.bf16 %v2083_v58, %v2082_v1 }
  0xb5   : > { %3892 = vmatmul.mubr.msk.bf16.gmra.mrb[4].mxu1 %vm199_vm1, %v4665_v38 }
  0xb6   : > { %4044 = vmatmul.mubr.msk.bf16.gmra.mrb[20].mxu0 %vm199_vm1, %v4829_v23  ;;  %3895 = vmatprep.mubr.msk.bf16.mxu1 %vm199_vm1, %v4685_v50 }
  0xb7   : > { %4047 = vmatprep.mubr.msk.bf16.mxu0 %vm199_vm1, %v4831_v24 }
  0xbd   : > { %3896 = vmatmul.mubr.msk.bf16.gmra.mrb[8].mxu1 %vm199_vm1, %v4689_v52 }
  0xbe   : > { %4048 = vmatmul.mubr.msk.bf16.gmra.mrb[24].mxu0 %vm199_vm1, %v4841_v44  ;;  %3899 = vmatprep.mubr.msk.bf16.mxu1 %vm199_vm1, %v4701_v62 }
  0xbf   : > { %4051 = vmatprep.mubr.msk.bf16.mxu0 %vm199_vm1, %v4870_v48 }
  0xc5   : > { %3900 = vmatmul.mubr.msk.bf16.gmra.mrb[12].mxu1 %vm199_vm1, %v4705_v0 }
  0xc6   : > { %4052 = vmatmul.mubr.msk.bf16.gmra.mrb[28].mxu0 %vm199_vm1, %v2099_v59  ;;  %3903 = vmatprep.mubr.msk.bf16.mxu1 %vm199_vm1, %v4717_v17 }
  0xc7   : > { %4057 = vmatprep.mubr.msk.bf16.mxu0 %vm199_vm1, %v4598_v5  ;;  %v2375_v5 = vld [vmem:[#allocation2 + $0x189] sm:$0xff] }
  0xcd   : > { %3904 = vmatmul.mubr.msk.bf16.gmra.mrb[16].mxu1 %vm199_vm1, %v4719_v21 }
  0xce   : > { %4058 = vmatmul.mubr.msk.bf16.vlgmr.msra.gmra.mrb[0].mxu0 %vm199_vm1, %v4602_v8  ;;  %3907 = vmatprep.mubr.msk.bf16.mxu1 %vm199_vm1, %v4730_v33 }
  0xcf   : > { %4090 = vmatpush3.bf16.msra.mxu0 %v2739_v40  ;;  %4061 = vmatprep.mubr.msk.bf16.mxu0 %vm199_vm1, %v4623_v13  ;;  %v2376_v13 = vld [vmem:[#allocation2 + $0x199] sm:$0xff] }
  0xd5   : > { %3908 = vmatmul.mubr.msk.bf16.gmra.mrb[20].mxu1 %vm199_vm1, %v4736_v41 }
  0xd6   : > { %4062 = vmatmul.mubr.msk.bf16.gmra.mrb[4].mxu0 %vm199_vm1, %v4625_v14  ;;  %3911 = vmatprep.mubr.msk.bf16.mxu1 %vm199_vm1, %v4755_v55  ;;  %v2377_v14 = vld [vmem:[#allocation2 + $0x1a1] sm:$0xff] }
  0xd7   : > { %4065 = vmatprep.mubr.msk.bf16.mxu0 %vm199_vm1, %v4635_v19  ;;  %v2393_v19 = vpack.c.bf16 %v2377_v14, %v2376_v13 }
  0xdd   : > { %3912 = vmatmul.mubr.msk.bf16.gmra.mrb[24].mxu1 %vm199_vm1, %v4759_v57 }
  0xde   : > { %4066 = vmatmul.mubr.msk.bf16.gmra.mrb[8].mxu0 %vm199_vm1, %v4637_v20  ;;  %3915 = vmatprep.mubr.msk.bf16.mxu1 %vm199_vm1, %v4771_v12  ;;  %v2670_v20 = vld [vmem:[#allocation2 + $0x19a] sm:$0xff] }
  0xdf   : > { %4069 = vmatprep.mubr.msk.bf16.mxu0 %vm199_vm1, %v4647_v25  ;;  %v2671_v25 = vld [vmem:[#allocation2 + $0x1a2] sm:$0xff] }
  0xe5   : > { %3916 = vmatmul.mubr.msk.bf16.gmra.mrb[28].mxu1 %vm199_vm1, %v4775_v18 }
  0xe6   : > { %4070 = vmatmul.mubr.msk.bf16.gmra.mrb[12].mxu0 %vm199_vm1, %v4659_v35  ;;  %3921 = vmatprep.mubr.msk.bf16.mxu1 %vm199_vm1, %v4728_v32 }
  0xe7   : > { %4073 = vmatprep.mubr.msk.bf16.mxu0 %vm199_vm1, %v4663_v37 }
  0xed   : > { %3922 = vmatmul.mubr.msk.bf16.vlgmr.msra.gmra.mrb[0].mxu1 %vm199_vm1, %v4734_v39 }
  0xee   : > { %4124 = vmatpush3.bf16.msra.mxu1 %v4456_v3  ;;  %4074 = vmatmul.mubr.msk.bf16.gmra.mrb[16].mxu0 %vm199_vm1, %v4683_v49  ;;  %v2374_v3 = vld [vmem:[#allocation2 + $0x181] sm:$0xff] }
  0xef   : > { %3925 = vmatprep.mubr.msk.bf16.mxu1 %vm199_vm1, %v4753_v54  ;;  %4077 = vmatprep.mubr.msk.bf16.mxu0 %vm199_vm1, %v4687_v51  ;;  %v2392_v8 = vpack.c.bf16 %v2375_v5, %v2374_v3 }
  0xf5   : > { %3926 = vmatmul.mubr.msk.bf16.gmra.mrb[4].mxu1 %vm199_vm1, %v4757_v56  ;;  %v5027_v56 = vld [vmem:[%s5127_s3] ss:$0 sm:$0xff] }
  0xf6   : > { %4078 = vmatmul.mubr.msk.bf16.gmra.mrb[20].mxu0 %vm199_vm1, %v4699_v61  ;;  %3929 = vmatprep.mubr.msk.bf16.mxu1 %vm199_vm1, %v4769_v11 }
  0xf7   : > { %4081 = vmatprep.mubr.msk.bf16.mxu0 %vm199_vm1, %v4703_v63 }
  0xfd   : > { %3930 = vmatmul.mubr.msk.bf16.gmra.mrb[8].mxu1 %vm199_vm1, %v4773_v15 }
  0xfe   : > { %4082 = vmatmul.mubr.msk.bf16.gmra.mrb[24].mxu0 %vm199_vm1, %v4715_v16  ;;  %3933 = vmatprep.mubr.msk.bf16.mxu1 %vm199_vm1, %v4785_v30 }
  0xff   : > { %4085 = vmatprep.mubr.msk.bf16.mxu0 %vm199_vm1, %v2392_v8 }
 0x105   : > { %3934 = vmatmul.mubr.msk.bf16.gmra.mrb[12].mxu1 %vm199_vm1, %v4789_v34 }
 0x106   : > { %4086 = vmatmul.mubr.msk.bf16.gmra.mrb[28].mxu0 %vm199_vm1, %v2393_v19  ;;  %3937 = vmatprep.mubr.msk.bf16.mxu1 %vm199_vm1, %v4799_v46 }
 0x107   : > { %4091 = vmatprep.mubr.msk.bf16.mxu0 %vm199_vm1, %v4661_v36 }
 0x10d   : > { %3938 = vmatmul.mubr.msk.bf16.gmra.mrb[16].mxu1 %vm199_vm1, %v4801_v47 }
 0x10e   : > { %4092 = vmatmul.mubr.msk.bf16.vlgmr.msra.gmra.mrb[0].mxu0 %vm199_vm1, %v4665_v38  ;;  %3941 = vmatprep.mubr.msk.bf16.mxu1 %vm199_vm1, %v4817_v2 }
 0x10f   : > { %4095 = vmatprep.mubr.msk.bf16.mxu0 %vm199_vm1, %v4685_v50 }
 0x115   : > { %3942 = vmatmul.mubr.msk.bf16.gmra.mrb[20].mxu1 %vm199_vm1, %v4819_v7 }
 0x116   : > { %4096 = vmatmul.mubr.msk.bf16.gmra.mrb[4].mxu0 %vm199_vm1, %v4689_v52  ;;  %3945 = vmatprep.mubr.msk.bf16.mxu1 %vm199_vm1, %v4829_v23 }
 0x117   : > { %4099 = vmatprep.mubr.msk.bf16.mxu0 %vm199_vm1, %v4701_v62 }
 0x11d   : > { %3946 = vmatmul.mubr.msk.bf16.gmra.mrb[24].mxu1 %vm199_vm1, %v4831_v24 }
 0x11e   : > { %4100 = vmatmul.mubr.msk.bf16.gmra.mrb[8].mxu0 %vm199_vm1, %v4705_v0  ;;  %3949 = vmatprep.mubr.msk.bf16.mxu1 %vm199_vm1, %v4841_v44 }
 0x11f   : > { %4103 = vmatprep.mubr.msk.bf16.mxu0 %vm199_vm1, %v4717_v17 }
 0x125   : > { %3950 = vmatmul.mubr.msk.bf16.gmra.mrb[28].mxu1 %vm199_vm1, %v4870_v48 }
 0x126   : > { %4104 = vmatmul.mubr.msk.bf16.gmra.mrb[12].mxu0 %vm199_vm1, %v4719_v21  ;;  %3971 = vmatprep.mubr.msk.bf16.mxu1 %vm199_vm1, %v4659_v35  ;;  %v2687_v35 = vpack.c.bf16 %v2671_v25, %v2670_v20 }
 0x127   : > { %4107 = vmatprep.mubr.msk.bf16.mxu0 %vm199_vm1, %v4730_v33 }
 0x12d   : > { %3972 = vmatmul.mubr.msk.bf16.vlgmr.msra.gmra.mrb[16].mxu1 %vm199_vm1, %v4663_v37 }
 0x12e   : > { %4108 = vmatmul.mubr.msk.bf16.gmra.mrb[16].mxu0 %vm199_vm1, %v4736_v41  ;;  %3975 = vmatprep.mubr.msk.bf16.mxu1 %vm199_vm1, %v4683_v49  ;;  %v5022_v41 = vld [vmem:[%s5126_s2] ss:$0 sm:$0xff] }
 0x12f   : > { %4111 = vmatprep.mubr.msk.bf16.mxu0 %vm199_vm1, %v4755_v55 }
 0x135   : > { %3976 = vmatmul.mubr.msk.bf16.gmra.mrb[20].mxu1 %vm199_vm1, %v4687_v51 }
 0x136   : > { %4112 = vmatmul.mubr.msk.bf16.gmra.mrb[20].mxu0 %vm199_vm1, %v4759_v57  ;;  %3979 = vmatprep.mubr.msk.bf16.mxu1 %vm199_vm1, %v4699_v61 }
 0x137   : > { %4115 = vmatprep.mubr.msk.bf16.mxu0 %vm199_vm1, %v4771_v12 }
 0x13d   : > { %3980 = vmatmul.mubr.msk.bf16.gmra.mrb[24].mxu1 %vm199_vm1, %v4703_v63 }
 0x13e   : > { %4116 = vmatmul.mubr.msk.bf16.gmra.mrb[24].mxu0 %vm199_vm1, %v4775_v18  ;;  %3983 = vmatprep.mubr.msk.bf16.mxu1 %vm199_vm1, %v4715_v16 }
 0x13f   : > { %4119 = vmatprep.mubr.msk.bf16.mxu0 %vm199_vm1, %v4787_v31 }
 0x145   : > { %3984 = vmatmul.mubr.msk.bf16.gmra.mrb[28].mxu1 %vm199_vm1, %v2392_v8 }
 0x146   : > { %4120 = vmatmul.mubr.msk.bf16.gmra.mrb[28].mxu0 %vm199_vm1, %v2687_v35 }
 0x1c0   : > { %v3923_v36 = vpop.f32.mrb[0].mxu1 }
 0x1c1   : > { %v1304_v37 = vpop.f32.mrb[1].mxu1 }
 0x1c2   : > { %v3924_v38 = vpop.f32.mrb[2].mxu1 }
 0x1c3   : > { %v1307_v49 = vpop.f32.mrb[3].mxu1 }
 0x1c8   : > { %v3927_v50 = vpop.f32.mrb[4].mxu1 }
 0x1c9   : > { %v1320_v51 = vpop.f32.mrb[5].mxu1 }
 0x1ca   : > { %v3928_v52 = vpop.f32.mrb[6].mxu1 }
 0x1cb   : > { %v1323_v61 = vpop.f32.mrb[7].mxu1 }
 0x1d0   : > { %v3931_v62 = vpop.f32.mrb[8].mxu1 }
 0x1d1   : > { %v1336_v63 = vpop.f32.mrb[9].mxu1 }
 0x1d2   : > { %v3932_v0 = vpop.f32.mrb[10].mxu1 }
 0x1d3   : > { %v5009_v16 = vpop.f32.mrb[11].mxu1 }
 0x1d8   : > { %v5011_v17 = vpop.f32.mrb[12].mxu1 }
 0x1d9   : > { %v5013_v21 = vpop.f32.mrb[13].mxu1 }
 0x1da   : > { %v5015_v32 = vpop.f32.mrb[14].mxu1 }
 0x1db   : > { %v5017_v33 = vpop.f32.mrb[15].mxu1 }
 0x1e1   : > { %v4093_v39 = vpop.f32.mrb[0].mxu0 }
 0x1e2   : > { %v4125_v54 = vadd.f32 %v4093_v39, %v3923_v36  ;;  %v2775_v55 = vpop.f32.mrb[1].mxu0 }
 0x1e3   : > { %v4126_v57 = vadd.f32 %v2775_v55, %v1304_v37  ;;  %v4094_v11 = vpop.f32.mrb[2].mxu0 }
 0x1e4   : > { %v2943_v12 = vmul.f32 %v4125_v54, %v5022_v41  ;;  %v4127_v15 = vadd.f32 %v4094_v11, %v3924_v38  ;;  %v2778_v18 = vpop.f32.mrb[3].mxu0 }
 0x1e5   : > { %v2941_v30 = vmul.f32 %v4126_v57, %v5022_v41  ;;  %v4128_v31 = vadd.f32 %v2778_v18, %v1307_v49 }
 0x1e6   : > { %v2982_v34 = vadd.f32 %v5027_v56, %v2943_v12  ;;  %v2944_v46 = vmul.f32 %v4127_v15, %v5022_v41 }
 0x1e7   : > { %v2980_v47 = vadd.f32 %v5027_v56, %v2941_v30  ;;  %v2942_v53 = vmul.f32 %v4128_v31, %v5022_v41 }
 0x1e8   : > { %v2983_v60 = vadd.f32 %v5027_v56, %v2944_v46  ;;  %v3014_v4 = vmax.f32 %v2982_v34, 0.0 }
 0x1e9   : > { %v2981_v2 = vadd.f32 %v5027_v56, %v2942_v53  ;;  %v4097_v7 = vpop.f32.mrb[4].mxu0  ;;  %v3012_v23 = vmax.f32 %v2980_v47, 0.0 }
 0x1ea   : > { %v3015_v6 = vmax.f32 %v2983_v60, 0.0  ;;  %v4129_v10 = vadd.f32 %v4097_v7, %v3927_v50  ;;  %v2791_v22 = vpop.f32.mrb[5].mxu0 }
 0x1eb   : > { %v3013_v24 = vmax.f32 %v2981_v2, 0.0  ;;  %v4130_v27 = vadd.f32 %v2791_v22, %v1320_v51  ;;  %v4098_v28 = vpop.f32.mrb[6].mxu0 }
 0x1ec   : > { %v3562_v29 = vpack.c.bf16 %v3015_v6, %v3014_v4  ;;  %v2947_v43 = vmul.f32 %v4129_v10, %v5022_v41  ;;  %v4131_v44 = vadd.f32 %v4098_v28, %v3928_v52  ;;  %v2794_v45 = vpop.f32.mrb[7].mxu0 }
 0x1ed   : > { %v3557_v9 = vpack.c.bf16 %v3013_v24, %v3012_v23  ;;  %v2945_v26 = vmul.f32 %v4130_v27, %v5022_v41  ;;  %v4132_v42 = vadd.f32 %v2794_v45, %v1323_v61 }
 0x1ee   : > { %3649 = vst [vmem:[%s5042_s22 + $0x8] sm:$0xff] %v3562_v29   ;;  %v2986_v48 = vadd.f32 %v5027_v56, %v2947_v43  ;;  %v2948_v1 = vmul.f32 %v4131_v44, %v5022_v41 }
 0x1ef   : > { %3558 = vst [vmem:[%s5042_s22] sm:$0xff] %v3557_v9   ;;  %v2984_v58 = vadd.f32 %v5027_v56, %v2945_v26  ;;  %v2946_v59 = vmul.f32 %v4132_v42, %v5022_v41 }
 0x1f0   : > { %v2987_v40 = vadd.f32 %v5027_v56, %v2948_v1  ;;  %v3018_v8 = vmax.f32 %v2986_v48, 0.0 }
 0x1f1   : > { %v2985_v3 = vadd.f32 %v5027_v56, %v2946_v59  ;;  %v4101_v5 = vpop.f32.mrb[8].mxu0  ;;  %v3016_v20 = vmax.f32 %v2984_v58, 0.0 }
 0x1f2   : > { %v3019_v13 = vmax.f32 %v2987_v40, 0.0  ;;  %v4133_v14 = vadd.f32 %v4101_v5, %v3931_v62  ;;  %v2807_v19 = vpop.f32.mrb[9].mxu0 }
 0x1f3   : > { %v3017_v25 = vmax.f32 %v2985_v3, 0.0  ;;  %v4134_v35 = vadd.f32 %v2807_v19, %v1336_v63  ;;  %v4102_v36 = vpop.f32.mrb[10].mxu0 }
 0x1f4   : > { %v3572_v37 = vpack.c.bf16 %v3019_v13, %v3018_v8  ;;  %v2951_v38 = vmul.f32 %v4133_v14, %v5022_v41  ;;  %v4135_v49 = vadd.f32 %v4102_v36, %v3932_v0  ;;  %v2810_v50 = vpop.f32.mrb[11].mxu0 }
 0x1f5   : > { %v3567_v51 = vpack.c.bf16 %v3017_v25, %v3016_v20  ;;  %v2949_v52 = vmul.f32 %v4134_v35, %v5022_v41  ;;  %v4136_v61 = vadd.f32 %v2810_v50, %v5009_v16 }
 0x1f6   : > { %3651 = vst [vmem:[%s5042_s22 + $0x18] sm:$0xff] %v3572_v37   ;;  %v2990_v39 = vadd.f32 %v5027_v56, %v2951_v38  ;;  %v2952_v62 = vmul.f32 %v4135_v49, %v5022_v41 }
 0x1f7   : > { %3650 = vst [vmem:[%s5042_s22 + $0x10] sm:$0xff] %v3567_v51   ;;  %v2988_v54 = vadd.f32 %v5027_v56, %v2949_v52  ;;  %v2950_v63 = vmul.f32 %v4136_v61, %v5022_v41 }
 0x1f8   : > { %v2991_v55 = vadd.f32 %v5027_v56, %v2952_v62  ;;  %v3022_v11 = vmax.f32 %v2990_v39, 0.0 }
 0x1f9   : > { %v2989_v0 = vadd.f32 %v5027_v56, %v2950_v63  ;;  %v4105_v57 = vpop.f32.mrb[12].mxu0  ;;  %v3020_v18 = vmax.f32 %v2988_v54, 0.0 }
 0x1fa   : > { %v3023_v12 = vmax.f32 %v2991_v55, 0.0  ;;  %v4137_v16 = vadd.f32 %v4105_v57, %v5011_v17  ;;  %v2823_v15 = vpop.f32.mrb[13].mxu0 }
 0x1fb   : > { %v3021_v30 = vmax.f32 %v2989_v0, 0.0  ;;  %v4138_v31 = vadd.f32 %v2823_v15, %v5013_v21  ;;  %v4106_v34 = vpop.f32.mrb[14].mxu0 }
 0x1fc   : > { %v3582_v46 = vpack.c.bf16 %v3023_v12, %v3022_v11  ;;  %v2955_v47 = vmul.f32 %v4137_v16, %v5022_v41  ;;  %v4139_v53 = vadd.f32 %v4106_v34, %v5015_v32  ;;  %v2826_v60 = vpop.f32.mrb[15].mxu0 }
 0x1fd   : > { %v3577_v2 = vpack.c.bf16 %v3021_v30, %v3020_v18  ;;  %v2953_v7 = vmul.f32 %v4138_v31, %v5022_v41  ;;  %v4140_v4 = vadd.f32 %v2826_v60, %v5017_v33 }
 0x1fe   : > { %3653 = vst [vmem:[%s5042_s22 + $0x28] sm:$0xff] %v3582_v46   ;;  %v2994_v17 = vadd.f32 %v5027_v56, %v2955_v47  ;;  %v2956_v6 = vmul.f32 %v4139_v53, %v5022_v41 }
 0x1ff   : > { %3652 = vst [vmem:[%s5042_s22 + $0x20] sm:$0xff] %v3577_v2   ;;  %v2992_v21 = vadd.f32 %v5027_v56, %v2953_v7  ;;  %v2954_v10 = vmul.f32 %v4140_v4, %v5022_v41 }
 0x200   : > { %v2995_v22 = vadd.f32 %v5027_v56, %v2956_v6  ;;  %v3973_v23 = vpop.f32.mrb[16].mxu1  ;;  %v3026_v28 = vmax.f32 %v2994_v17, 0.0 }
 0x201   : > { %v2993_v32 = vadd.f32 %v5027_v56, %v2954_v10  ;;  %v1662_v24 = vpop.f32.mrb[17].mxu1  ;;  %v4109_v27 = vpop.f32.mrb[16].mxu0  ;;  %v3024_v45 = vmax.f32 %v2992_v21, 0.0 }
 0x202   : > { %v3027_v29 = vmax.f32 %v2995_v22, 0.0  ;;  %v4141_v33 = vadd.f32 %v4109_v27, %v3973_v23  ;;  %v3974_v43 = vpop.f32.mrb[18].mxu1  ;;  %v2839_v44 = vpop.f32.mrb[17].mxu0 }
 0x203   : > { %v3025_v9 = vmax.f32 %v2993_v32, 0.0  ;;  %v4142_v26 = vadd.f32 %v2839_v44, %v1662_v24  ;;  %v1665_v42 = vpop.f32.mrb[19].mxu1  ;;  %v4110_v48 = vpop.f32.mrb[18].mxu0 }
 0x204   : > { %v3592_v1 = vpack.c.bf16 %v3027_v29, %v3026_v28  ;;  %v2959_v58 = vmul.f32 %v4141_v33, %v5022_v41  ;;  %v4143_v59 = vadd.f32 %v4110_v48, %v3974_v43  ;;  %v2842_v40 = vpop.f32.mrb[19].mxu0 }
 0x205   : > { %v3587_v3 = vpack.c.bf16 %v3025_v9, %v3024_v45  ;;  %v2957_v5 = vmul.f32 %v4142_v26, %v5022_v41  ;;  %v4144_v8 = vadd.f32 %v2842_v40, %v1665_v42 }
 0x206   : > { %3655 = vst [vmem:[%s5042_s22 + $0x38] sm:$0xff] %v3592_v1   ;;  %v2998_v13 = vadd.f32 %v5027_v56, %v2959_v58  ;;  %v2960_v14 = vmul.f32 %v4143_v59, %v5022_v41 }
 0x207   : > { %3654 = vst [vmem:[%s5042_s22 + $0x30] sm:$0xff] %v3587_v3   ;;  %v2996_v19 = vadd.f32 %v5027_v56, %v2957_v5  ;;  %v2958_v20 = vmul.f32 %v4144_v8, %v5022_v41 }
 0x208   : > { %v2999_v25 = vadd.f32 %v5027_v56, %v2960_v14  ;;  %v3977_v35 = vpop.f32.mrb[20].mxu1  ;;  %v3030_v49 = vmax.f32 %v2998_v13, 0.0 }
 0x209   : > { %v2997_v36 = vadd.f32 %v5027_v56, %v2958_v20  ;;  %v1678_v37 = vpop.f32.mrb[21].mxu1  ;;  %v4113_v38 = vpop.f32.mrb[20].mxu0  ;;  %v3028_v39 = vmax.f32 %v2996_v19, 0.0 }
 0x20a   : > { %v3031_v50 = vmax.f32 %v2999_v25, 0.0  ;;  %v4145_v51 = vadd.f32 %v4113_v38, %v3977_v35  ;;  %v3978_v52 = vpop.f32.mrb[22].mxu1  ;;  %v2855_v61 = vpop.f32.mrb[21].mxu0 }
 0x20b   : > { %v3029_v62 = vmax.f32 %v2997_v36, 0.0  ;;  %v4146_v54 = vadd.f32 %v2855_v61, %v1678_v37  ;;  %v1681_v63 = vpop.f32.mrb[23].mxu1  ;;  %v4114_v55 = vpop.f32.mrb[22].mxu0 }
 0x20c   : > { %v3602_v0 = vpack.c.bf16 %v3031_v50, %v3030_v49  ;;  %v2963_v57 = vmul.f32 %v4145_v51, %v5022_v41  ;;  %v4147_v11 = vadd.f32 %v4114_v55, %v3978_v52  ;;  %v2858_v12 = vpop.f32.mrb[23].mxu0 }
 0x20d   : > { %v3597_v16 = vpack.c.bf16 %v3029_v62, %v3028_v39  ;;  %v2961_v15 = vmul.f32 %v4146_v54, %v5022_v41  ;;  %v4148_v18 = vadd.f32 %v2858_v12, %v1681_v63 }
 0x20e   : > { %3657 = vst [vmem:[%s5042_s22 + $0x48] sm:$0xff] %v3602_v0   ;;  %v3002_v30 = vadd.f32 %v5027_v56, %v2963_v57  ;;  %v2964_v31 = vmul.f32 %v4147_v11, %v5022_v41 }
 0x20f   : > { %3656 = vst [vmem:[%s5042_s22 + $0x40] sm:$0xff] %v3597_v16   ;;  %v3000_v34 = vadd.f32 %v5027_v56, %v2961_v15  ;;  %v2962_v46 = vmul.f32 %v4148_v18, %v5022_v41 }
 0x210   : > { %v3003_v47 = vadd.f32 %v5027_v56, %v2964_v31  ;;  %v3981_v53 = vpop.f32.mrb[24].mxu1  ;;  %v3034_v4 = vmax.f32 %v3002_v30, 0.0 }
 0x211   : > { %v3001_v60 = vadd.f32 %v5027_v56, %v2962_v46  ;;  %v1694_v2 = vpop.f32.mrb[25].mxu1  ;;  %v4117_v7 = vpop.f32.mrb[24].mxu0  ;;  %v3032_v22 = vmax.f32 %v3000_v34, 0.0 }
 0x212   : > { %v3035_v17 = vmax.f32 %v3003_v47, 0.0  ;;  %v4149_v6 = vadd.f32 %v4117_v7, %v3981_v53  ;;  %v3982_v21 = vpop.f32.mrb[26].mxu1  ;;  %v2871_v10 = vpop.f32.mrb[25].mxu0 }
 0x213   : > { %v3033_v23 = vmax.f32 %v3001_v60, 0.0  ;;  %v4150_v32 = vadd.f32 %v2871_v10, %v1694_v2  ;;  %v1697_v24 = vpop.f32.mrb[27].mxu1  ;;  %v4118_v27 = vpop.f32.mrb[26].mxu0 }
 0x214   : > { %v3612_v28 = vpack.c.bf16 %v3035_v17, %v3034_v4  ;;  %v2967_v29 = vmul.f32 %v4149_v6, %v5022_v41  ;;  %v4151_v33 = vadd.f32 %v4118_v27, %v3982_v21  ;;  %v2874_v43 = vpop.f32.mrb[27].mxu0 }
 0x215   : > { %v3607_v44 = vpack.c.bf16 %v3033_v23, %v3032_v22  ;;  %v2965_v45 = vmul.f32 %v4150_v32, %v5022_v41  ;;  %v4152_v9 = vadd.f32 %v2874_v43, %v1697_v24 }
 0x216   : > { %3659 = vst [vmem:[%s5042_s22 + $0x58] sm:$0xff] %v3612_v28   ;;  %v3006_v26 = vadd.f32 %v5027_v56, %v2967_v29  ;;  %v2968_v42 = vmul.f32 %v4151_v33, %v5022_v41 }
 0x217   : > { %3658 = vst [vmem:[%s5042_s22 + $0x50] sm:$0xff] %v3607_v44   ;;  %v3004_v48 = vadd.f32 %v5027_v56, %v2965_v45  ;;  %v2966_v1 = vmul.f32 %v4152_v9, %v5022_v41 }
 0x218   : > { %v3007_v58 = vadd.f32 %v5027_v56, %v2968_v42  ;;  %v3985_v59 = vpop.f32.mrb[28].mxu1  ;;  %v3038_v8 = vmax.f32 %v3006_v26, 0.0 }
 0x219   : > { %v3005_v40 = vadd.f32 %v5027_v56, %v2966_v1  ;;  %v1710_v3 = vpop.f32.mrb[29].mxu1  ;;  %v4121_v5 = vpop.f32.mrb[28].mxu0  ;;  %v3036_v25 = vmax.f32 %v3004_v48, 0.0 }
 0x21a   : > { %v3039_v13 = vmax.f32 %v3007_v58, 0.0  ;;  %v4153_v14 = vadd.f32 %v4121_v5, %v3985_v59  ;;  %v3986_v19 = vpop.f32.mrb[30].mxu1  ;;  %v2887_v20 = vpop.f32.mrb[29].mxu0 }
 0x21b   : > { %v3037_v35 = vmax.f32 %v3005_v40, 0.0  ;;  %v4154_v36 = vadd.f32 %v2887_v20, %v1710_v3  ;;  %v1713_v37 = vpop.f32.mrb[31].mxu1  ;;  %v4122_v38 = vpop.f32.mrb[30].mxu0 }
 0x21c   : > { %v3622_v49 = vpack.c.bf16 %v3039_v13, %v3038_v8  ;;  %v2971_v50 = vmul.f32 %v4153_v14, %v5022_v41  ;;  %v4155_v51 = vadd.f32 %v4122_v38, %v3986_v19  ;;  %v2890_v52 = vpop.f32.mrb[31].mxu0 }
 0x21d   : > { %v3617_v61 = vpack.c.bf16 %v3037_v35, %v3036_v25  ;;  %v2969_v39 = vmul.f32 %v4154_v36, %v5022_v41  ;;  %v4156_v62 = vadd.f32 %v2890_v52, %v1713_v37 }
 0x21e   : > { %3661 = vst [vmem:[%s5042_s22 + $0x68] sm:$0xff] %v3622_v49   ;;  %v3010_v54 = vadd.f32 %v5027_v56, %v2971_v50  ;;  %v2972_v63 = vmul.f32 %v4155_v51, %v5022_v41 }
 0x21f   : > { %3660 = vst [vmem:[%s5042_s22 + $0x60] sm:$0xff] %v3617_v61   ;;  %v3008_v55 = vadd.f32 %v5027_v56, %v2969_v39  ;;  %v2970_v0 = vmul.f32 %v4156_v62, %v5022_v41 }
 0x220   : > { %v3011_v57 = vadd.f32 %v5027_v56, %v2972_v63  ;;  %v3042_v12 = vmax.f32 %v3010_v54, 0.0 }
 0x221   : > { %v3009_v11 = vadd.f32 %v5027_v56, %v2970_v0  ;;  %v3040_v15 = vmax.f32 %v3008_v55, 0.0 }
 0x222   : > { %v3043_v16 = vmax.f32 %v3011_v57, 0.0 }
 0x223   : > { %v3041_v18 = vmax.f32 %v3009_v11, 0.0 }
 0x224   : > { %v3632_v30 = vpack.c.bf16 %v3043_v16, %v3042_v12 }
 0x225   : > { %v3627_v31 = vpack.c.bf16 %v3041_v18, %v3040_v15 }
 0x226   : > { %3663 = vst [vmem:[%s5042_s22 + $0x78] sm:$0xff] %v3632_v30  }
 0x227   : > { %3662 = vst [vmem:[%s5042_s22 + $0x70] sm:$0xff] %v3627_v31  }
 0x228 PF: > { %s14_s15 = sadd.s32 1, %s4406_s15  }
 0x229   : > { %p11_p4 = scmp.ge.s32.totalorder %s14_s15, 4  }
 0x22b   :  { %13 = sbr.rel (!%p11_p4) target bundleno = 1 (0x1), region = 76 }

// kernel: resnet_forward.9
= control target key start
LH: loop header
LB: loop body
LE: loop exit
PB: predicated region body
PF: predicated region fallthrough
CT: control target
= control target key end

     0   :  { %s1450_s24 = smov 0   ;;  %s1611_s0 = inlined_call_operand.vmem [shape: bf16[2,4,4,128], index: 0, kind: input, shape index: {}]   ;;  %s1612_s1 = inlined_call_operand.vmem [shape: bf16[128,16], index: 1, kind: input, shape index: {}]   ;;  %s1613_s2 = inlined_call_operand.vmem [shape: f32[1,16], index: 2, kind: input, shape index: {}]   ;;  %s1614_s3 = inlined_call_operand.vmem [shape: f32[1,16], index: 3, kind: input, shape index: {}]   ;;  %s1615_s4 = inlined_call_operand.vmem [shape: bf16[9,16,128], index: 4, kind: input, shape index: {}]   ;;  %s1616_s5 = inlined_call_operand.vmem [shape: f32[1,128], index: 5, kind: input, shape index: {}]   ;;  %s1617_s6 = inlined_call_operand.vmem [shape: f32[1,128], index: 6, kind: input, shape index: {}]   ;;  %s1618_s7 = inlined_call_operand.vmem [shape: bf16[2,4,4,128], index: 7, kind: output, shape index: {}]  }
   0x1 LB: > { %s1163_s25 = sadd.s32 4294967295, %s1405_s24   ;;  %p1167_p0 = scmp.ge.s32.totalorder %s1405_s24, 1  ;;  %s1405_s24 = sphi %s1450_s24, %s17_s24  }
   0x2   : > { %p237_p1 = scmp.lt.s32.totalorder %s1405_s24, 3 }
   0x4   : > { %p238_p2 = pnand %p1167_p0, %p237_p1 }
   0x5   : > { %v1364_v0 = vld [vmem:[%s1612_s1] sm:$0xff] (!%p238_p2)   ;;  %v1407_v1 = vmov (!%p238_p2), 0.0   ;;  %v1365_v2 = vld [vmem:[%s1612_s1 + $0x8] sm:$0xff] (!%p238_p2)   ;;  %vm1408_vm0 = vmmov (!%p238_p2), 0   ;;  %p269_p3 = scmp.lt.s32.totalorder (!%p238_p2), %s1163_s25, 1  ;;  %v1366_v3 = vld [vmem:[%s1612_s1 + $0x10] sm:$0xff] (!%p238_p2)   ;;  %v313_v8 = vlaneseq (!%p238_p2) }
   0x6   : > { %241 = sbr.rel (%p238_p2) target bundleno = 572 (0x23c), region = 48  ;;  %1249 = vmatprep.subr.bf16.mxu0 (!%p238_p2), %v1407_v1  ;;  %1281 = vmatprep.subr.bf16.mxu1 (!%p238_p2), %v1407_v1  ;;  %v1367_v4 = vld [vmem:[%s1612_s1 + $0x18] sm:$0xff] (!%p238_p2)   ;;  %v1368_v5 = vld [vmem:[%s1612_s1 + $0x20] sm:$0xff] (!%p238_p2)   ;;  %v1409_v6 = vmov (!%p238_p2), 1983009808   ;;  %v1369_v9 = vld [vmem:[%s1612_s1 + $0x28] sm:$0xff] (!%p238_p2)  }
   0x7   : > { %1250 = vmatpush3.bf16.msra.mxu0 (!%p238_p2), %v1364_v0  ;;  %1265 = vmatprep.mubr.msk.bf16.mxu0 (!%p238_p2), %vm1408_vm0, %v1407_v1  ;;  %v311_v7 = vunpack.c.l.s4 (!%p238_p2), %v1409_v6  ;;  %v314_v12 = vshrl.u32 (!%p238_p2), %v313_v8, 7  ;;  %v1370_v19 = vld [vmem:[%s1612_s1 + $0x30] sm:$0xff] (!%p238_p2)   ;;  %v1371_v22 = vld [vmem:[%s1612_s1 + $0x38] sm:$0xff] (!%p238_p2)   ;;  %vm435_vm1 = vcmask (!%p238_p2), 130048   ;;  %v1373_v25 = vld [vmem:[%s1615_s4 + $0x8] sm:$0xff] (!%p238_p2)   ;;  %vm449_vm2 = vcmask (!%p238_p2), 125952  }
   0x8   : > { %1251 = vmatprep.subr.bf16.mxu0 (!%p238_p2), %v1407_v1  ;;  %1283 = vmatprep.mubr.msk.bf16.mxu1 (!%p238_p2), %vm1408_vm0, %v1407_v1  ;;  %437 = vst.msk [vmem:[#allocation2 + $0x8] sm:$0xff] (!%p238_p2), %vm435_vm1, %v1407_v1  ;;  %438 = vst.msk [vmem:[#allocation2 + $0x10] sm:$0xff] (!%p238_p2), %vm435_vm1, %v1407_v1  ;;  %v1372_v24 = vld [vmem:[%s1615_s4 + $0x10] sm:$0xff] (!%p238_p2)   ;;  %v1180_v26 = vld [vmem:[%s1613_s2] ss:$0 sm:$0xff] (!%p238_p2) }
   0x9   : > { %v312_v11 = vunpack.c.0.s8 (!%p238_p2), %v311_v7  ;;  %436 = vst.msk [vmem:[#allocation2] sm:$0xff] (!%p238_p2), %vm435_vm1, %v1407_v1  ;;  %439 = vst.msk [vmem:[#allocation2 + $0x18] sm:$0xff] (!%p238_p2), %vm435_vm1, %v1407_v1  ;;  %1282 = vmatpush3.bf16.msra.mxu1 (!%p238_p2), %v1372_v24  ;;  %v1181_v28 = vld [vmem:[%s1614_s3] ss:$0 sm:$0xff] (!%p238_p2)  ;;  %v1378_v46 = vld [vmem:[%s1615_s4 + $0x18] sm:$0xff] (!%p238_p2)  }
   0xa   : > { %440 = vst.msk [vmem:[#allocation2 + $0x20] sm:$0xff] (!%p238_p2), %vm435_vm1, %v1407_v1  ;;  %441 = vst.msk [vmem:[#allocation2 + $0x28] sm:$0xff] (!%p238_p2), %vm435_vm1, %v1407_v1  ;;  %1287 = vmatprep.subr.bf16.mxu1 (!%p238_p2), %v1407_v1  ;;  %v1379_v42 = vld [vmem:[%s1615_s4] sm:$0xff] (!%p238_p2)   ;;  %v1387_v57 = vld [vmem:[%s1615_s4 + $0x28] sm:$0xff] (!%p238_p2)  }
   0xb   : > { %1252 = vmatpush3.bf16.msra.mxu0 (!%p238_p2), %v1365_v2  ;;  %v315_v18 = vsub.s32 (!%p238_p2), %v312_v11, %v314_v12  ;;  %v1384_v53 = vld [vmem:[%s1615_s4 + $0x20] sm:$0xff] (!%p238_p2)   ;;  %v1390_v61 = vld [vmem:[%s1615_s4 + $0x30] sm:$0xff] (!%p238_p2)   ;;  %v1393_v2 = vld [vmem:[%s1615_s4 + $0x38] sm:$0xff] (!%p238_p2)  }
   0xc   : > { %1253 = vmatprep.subr.bf16.mxu0 (!%p238_p2), %v1407_v1  ;;  %v1396_v6 = vld [vmem:[%s1615_s4 + $0x40] sm:$0xff] (!%p238_p2)  }
   0xd   : > { %s1620_s25 = smov (!%p269_p3, %s1163_s25), 1 }
   0xe   : > { %s1220_s11 = sshll.u32 %s1620_s25, 3 }
   0xf   : > { %1254 = vmatpush3.bf16.msra.mxu0 %v1366_v3  ;;  %s273_s16 = scalar_lea.vmem %s1611_s0, %s1220_s11  ;;  %s278_s10 = scalar_lea.vmem %s1618_s7, %s1220_s11 }
  0x10   : > { %1255 = vmatprep.subr.bf16.mxu0 %v1407_v1  ;;  %v1494_v10 = vld [vmem:[%s273_s16] sm:$0x3]  ;;  %v1496_v13 = vld [vmem:[%s273_s16 + $0x2] sm:$0x3]  ;;  %v1498_v14 = vld [vmem:[%s273_s16 + $0x4] sm:$0x3] }
  0x11   : > { %v1500_v15 = vld [vmem:[%s273_s16 + $0x6] sm:$0x3]  ;;  %v308_v16 = vcombine.low %v1494_v10, %v1496_v13  ;;  %v284_v12 = vunpack.c.l.bf16 %v1494_v10 }
  0x12   : > { %v309_v17 = vcombine.low %v1498_v14, %v1500_v15 }
  0x13   : > { %1256 = vmatpush3.bf16.msra.mxu0 %v1367_v4  ;;  %v316_v20 = vrot.slane %v308_v16, %v315_v18  ;;  %v285_v16 = vunpack.c.l.bf16 %v1496_v13  ;;  %v1217_v13 = vld [vmem:[%s1617_s6] ss:$0 sm:$0xff] }
  0x14   : > { %1257 = vmatprep.subr.bf16.mxu0 %v1407_v1  ;;  %v323_v21 = vrot.slane %v309_v17, %v315_v18  ;;  %v286_v18 = vunpack.c.l.bf16 %v1498_v14 }
  0x15   : > { %v1086_v17 = vcombine.low %v284_v12, %v285_v16 }
  0x16   : > { %v324_v23 = vcombine.low %v316_v20, %v323_v21 }
  0x17   : > { %1258 = vmatpush3.bf16.msra.mxu0 %v1368_v5 }
  0x18   : > { %1259 = vmatprep.subr.bf16.mxu0 %v1407_v1 }
  0x1b   : > { %1260 = vmatpush3.bf16.msra.mxu0 %v1369_v9 }
  0x1c   : > { %1261 = vmatprep.subr.bf16.mxu0 %v1407_v1 }
  0x1f   : > { %1262 = vmatpush3.bf16.msra.mxu0 %v1370_v19  ;;  %v287_v19 = vunpack.c.l.bf16 %v1500_v15 }
  0x20   : > { %1263 = vmatprep.subr.bf16.mxu0 %v1407_v1 }
  0x21   : > { %v1087_v20 = vcombine.low %v286_v18, %v287_v19 }
  0x23   : > { %1264 = vmatpush3.bf16.msra.mxu0 %v1371_v22 }
  0x24   : > { %1269 = vmatprep.subr.bf16.mxu0 %v1407_v1 }
  0x26   : > { %1266 = vmatmul.mubr.bf16.vlgmr.msra.gmra.mrb[0].mxu0 %v324_v23 }
  0x27   : > { %1271 = vmatprep.mubr.msk.bf16.mxu0 %vm1408_vm0, %v1407_v1  ;;  %1270 = vmatpush3.bf16.msra.mxu0 %v1373_v25  ;;  %v1216_v25 = vld [vmem:[%s1616_s5] ss:$0 sm:$0xff] }
  0x28   : > { %1275 = vmatprep.subr.bf16.mxu0 %v1407_v1 }
  0xf9   : > { %v408_v27 = vpop.f32.mrb[0].mxu0 }
  0xfa   : > { %v422_v29 = vmul.f32 %v1180_v26, %v408_v27  ;;  %v1267_v30 = vpop.f32.mrb[1].mxu0 }
  0xfb   : > { %v411_v31 = vpop.f32.mrb[2].mxu0 }
  0xfc   : > { %v431_v32 = vadd.f32 %v1181_v28, %v422_v29  ;;  %v423_v33 = vmul.f32 %v1180_v26, %v411_v31  ;;  %v1268_v34 = vpop.f32.mrb[3].mxu0 }
  0xfe   : > { %v433_v35 = vmax.f32 %v431_v32, 0.0  ;;  %v432_v36 = vadd.f32 %v1181_v28, %v423_v33 }
 0x100   : > { %v444_v37 = vcombine.high %v433_v35, %v433_v35  ;;  %450 = vst.msk [vmem:[#allocation2 + $0x9] sm:$0xf] %vm449_vm2, %v433_v35  ;;  %v434_v38 = vmax.f32 %v432_v36, 0.0 }
 0x102   : > { %451 = vst.msk [vmem:[#allocation2 + $0x11] sm:$0xf] %vm449_vm2, %v444_v37  ;;  %v445_v39 = vcombine.high %v434_v38, %v434_v38  ;;  %452 = vst.msk [vmem:[#allocation2 + $0x19] sm:$0xf] %vm449_vm2, %v434_v38 }
 0x104   : > { %453 = vst.msk [vmem:[#allocation2 + $0x21] sm:$0xf] %vm449_vm2, %v445_v39 }
 0x107   : > { %v1374_v40 = vld [vmem:[#allocation2 + $0x1] ss:$8 sps:$4 sm:$0xff]  }
 0x108   : > { %v1376_v41 = vld [vmem:[#allocation2 + $0x2] ss:$8 sps:$4 sm:$0xff]  }
 0x109   : > { %v1375_v43 = vld [vmem:[#allocation2 + $0x11] ss:$8 sps:$4 sm:$0xff]   ;;  %v1380_v50 = vld [vmem:[#allocation2] ss:$8 sps:$4 sm:$0xff]  }
 0x10a   : > { %v1377_v44 = vld [vmem:[#allocation2 + $0x12] ss:$8 sps:$4 sm:$0xff]   ;;  %v481_v45 = vpack.c.bf16 %v1375_v43, %v1374_v40 }
 0x10b   : > { %v597_v47 = vpack.c.bf16 %v1377_v44, %v1376_v41  ;;  %v1381_v48 = vld [vmem:[#allocation2 + $0x10] ss:$8 sps:$4 sm:$0xff]   ;;  %v1392_v63 = vld [vmem:[#allocation2 + $0x20] ss:$8 sps:$4 sm:$0xff]  }
 0x10c   : > { %1272 = vmatmul.mubr.msk.bf16.vlgmr.msra.gmra.mrb[4].mxu0 %vm435_vm1, %v481_v45  ;;  %v1383_v49 = vld [vmem:[#allocation2 + $0x18] ss:$8 sps:$4 sm:$0xff]   ;;  %v1382_v51 = vld [vmem:[#allocation2 + $0x8] ss:$8 sps:$4 sm:$0xff]   ;;  %v466_v52 = vpack.c.bf16 %v1381_v48, %v1380_v50 }
 0x10d   : > { %1284 = vmatmul.mubr.msk.bf16.vlgmr.msra.gmra.mrb[0].mxu1 %vm435_vm1, %v597_v47  ;;  %1276 = vmatpush3.bf16.msra.mxu0 %v1379_v42  ;;  %v665_v54 = vpack.c.bf16 %v1383_v49, %v1382_v51  ;;  %v1386_v55 = vld [vmem:[#allocation2 + $0x19] ss:$8 sps:$4 sm:$0xff]   ;;  %v1385_v56 = vld [vmem:[#allocation2 + $0x9] ss:$8 sps:$4 sm:$0xff]  }
 0x10e   : > { %1288 = vmatpush3.bf16.msra.mxu1 %v1378_v46  ;;  %1277 = vmatprep.mubr.msk.bf16.mxu0 %vm1408_vm0, %v1407_v1  ;;  %v733_v58 = vpack.c.bf16 %v1386_v55, %v1385_v56  ;;  %v1389_v59 = vld [vmem:[#allocation2 + $0x1a] ss:$8 sps:$4 sm:$0xff]   ;;  %v1388_v60 = vld [vmem:[#allocation2 + $0xa] ss:$8 sps:$4 sm:$0xff]  }
 0x10f   : > { %1289 = vmatprep.mubr.msk.bf16.mxu1 %vm1408_vm0, %v1407_v1  ;;  %1293 = vmatprep.subr.bf16.mxu1 %v1407_v1  ;;  %v801_v62 = vpack.c.bf16 %v1389_v59, %v1388_v60  ;;  %v1391_v0 = vld [vmem:[#allocation2 + $0x10] ss:$8 sps:$4 sm:$0xff]   ;;  %v1395_v4 = vld [vmem:[#allocation2 + $0x21] ss:$8 sps:$4 sm:$0xff]  }
 0x110   : > { %v870_v3 = vpack.c.bf16 %v1392_v63, %v1391_v0  ;;  %v1394_v5 = vld [vmem:[#allocation2 + $0x11] ss:$8 sps:$4 sm:$0xff]   ;;  %v1398_v8 = vld [vmem:[#allocation2 + $0x22] ss:$8 sps:$4 sm:$0xff]  }
 0x111   : > { %v938_v7 = vpack.c.bf16 %v1395_v4, %v1394_v5  ;;  %v1397_v9 = vld [vmem:[#allocation2 + $0x12] ss:$8 sps:$4 sm:$0xff]  }
 0x112   : > { %v1006_v11 = vpack.c.bf16 %v1398_v8, %v1397_v9 }
 0x118   : > { %1278 = vmatmul.mubr.msk.bf16.vlgmr.msra.gmra.mrb[4].mxu0 %vm435_vm1, %v466_v52 }
 0x119   : > { %1290 = vmatmul.mubr.msk.bf16.vlgmr.msra.gmra.mrb[0].mxu1 %vm435_vm1, %v665_v54 }
 0x11a   : > { %1294 = vmatpush3.bf16.msra.mxu1 %v1384_v53  ;;  %1295 = vmatprep.mubr.msk.bf16.mxu1 %vm1408_vm0, %v1407_v1 }
 0x11b   : > { %1299 = vmatprep.subr.bf16.mxu1 %v1407_v1 }
 0x125   : > { %1296 = vmatmul.mubr.msk.bf16.vlgmr.msra.gmra.mrb[0].mxu1 %vm435_vm1, %v733_v58 }
 0x126   : > { %1300 = vmatpush3.bf16.msra.mxu1 %v1387_v57  ;;  %1301 = vmatprep.mubr.msk.bf16.mxu1 %vm1408_vm0, %v1407_v1 }
 0x127   : > { %1305 = vmatprep.subr.bf16.mxu1 %v1407_v1 }
 0x131   : > { %1302 = vmatmul.mubr.msk.bf16.vlgmr.msra.gmra.mrb[0].mxu1 %vm435_vm1, %v801_v62 }
 0x132   : > { %1306 = vmatpush3.bf16.msra.mxu1 %v1390_v61  ;;  %1307 = vmatprep.mubr.msk.bf16.mxu1 %vm1408_vm0, %v1407_v1 }
 0x133   : > { %1311 = vmatprep.subr.bf16.mxu1 %v1407_v1 }
 0x13d   : > { %1308 = vmatmul.mubr.msk.bf16.vlgmr.msra.gmra.mrb[0].mxu1 %vm435_vm1, %v870_v3 }
 0x13e   : > { %1312 = vmatpush3.bf16.msra.mxu1 %v1393_v2  ;;  %1313 = vmatprep.mubr.msk.bf16.mxu1 %vm1408_vm0, %v1407_v1 }
 0x13f   : > { %1317 = vmatprep.subr.bf16.mxu1 %v1407_v1 }
 0x149   : > { %1314 = vmatmul.mubr.msk.bf16.vlgmr.msra.gmra.mrb[0].mxu1 %vm435_vm1, %v938_v7 }
 0x14a   : > { %1318 = vmatpush3.bf16.msra.mxu1 %v1396_v6  ;;  %1319 = vmatprep.mubr.msk.bf16.mxu1 %vm1408_vm0, %v1407_v1 }
 0x155   : > { %1320 = vmatmul.mubr.msk.bf16.vlgmr.msra.gmra.mrb[0].mxu1 %vm435_vm1, %v1006_v11 }
 0x1eb   : > { %v578_v21 = vpop.f32.mrb[4].mxu0 }
 0x1ec   : > { %v1279_v22 = vpop.f32.mrb[5].mxu0 }
 0x1ed   : > { %v581_v23 = vpop.f32.mrb[6].mxu0 }
 0x1ee   : > { %v1280_v24 = vpop.f32.mrb[7].mxu0 }
 0x228   : > { %v1053_v1 = vpop.f32.mrb[0].mxu1 }
 0x229   : > { %v1323_v26 = vadd.f32 %v1053_v1, %v578_v21  ;;  %v1321_v10 = vpop.f32.mrb[1].mxu1 }
 0x22a   : > { %v1056_v14 = vpop.f32.mrb[2].mxu1 }
 0x22b   : > { %v1069_v27 = vmul.f32 %v1323_v26, %v1216_v25  ;;  %v1324_v15 = vadd.f32 %v1056_v14, %v581_v23  ;;  %v1322_v28 = vpop.f32.mrb[3].mxu1 }
 0x22d   : > { %v1078_v29 = vadd.f32 %v1217_v13, %v1069_v27  ;;  %v1070_v30 = vmul.f32 %v1324_v15, %v1216_v25 }
 0x22f   : > { %v1080_v31 = vmax.f32 %v1078_v29, 0.0  ;;  %v1079_v32 = vadd.f32 %v1217_v13, %v1070_v30 }
 0x231   : > { %v1090_v33 = vadd.f32 %v1086_v17, %v1080_v31  ;;  %v1081_v34 = vmax.f32 %v1079_v32, 0.0 }
 0x233   : > { %v1092_v35 = vmax.f32 %v1090_v33, 0.0  ;;  %v1091_v36 = vadd.f32 %v1087_v20, %v1081_v34 }
 0x235   : > { %v1096_v37 = vcombine.high %v1092_v35, %v1092_v35  ;;  %v1100_v38 = vpack.c.bf16 %v1092_v35, %v1092_v35  ;;  %v1093_v39 = vmax.f32 %v1091_v36, 0.0 }
 0x237   : > { %v1101_v40 = vpack.c.bf16 %v1096_v37, %v1096_v37  ;;  %1104 = vst [vmem:[%s278_s10] sm:$0x3] %v1100_v38  ;;  %v1097_v41 = vcombine.high %v1093_v39, %v1093_v39  ;;  %v1102_v42 = vpack.c.bf16 %v1093_v39, %v1093_v39 }
 0x239   : > { %1105 = vst [vmem:[%s278_s10 + $0x2] sm:$0x3] %v1101_v40  ;;  %v1103_v43 = vpack.c.bf16 %v1097_v41, %v1097_v41  ;;  %1106 = vst [vmem:[%s278_s10 + $0x4] sm:$0x3] %v1102_v42 }
 0x23b   : > { %1107 = vst [vmem:[%s278_s10 + $0x6] sm:$0x3] %v1103_v43 }
 0x23c PF: > { %s17_s24 = sadd.s32 1, %s1405_s24  }
 0x23d   : > { %p14_p4 = scmp.ge.s32.totalorder %s17_s24, 4  }
 0x23f   :  { %16 = sbr.rel (!%p14_p4) target bundleno = 1 (0x1), region = 88 }

</bundles_post_ra>
